<compile_context>
chip_gen: v5e
topology: v5e:2x2
jax: 0.10.0
libtpu: 0.0.40
codegen_flags: <defaults>
</compile_context>

<pallas_src>
import jax
import jax.numpy as jnp
from jax.experimental import pallas as pl
from jax.experimental.pallas import tpu as pltpu

LANE = 128   # TPU lane tile
BT_MAX = 256 # max batch tile (VMEM-bounded at demo/medium sizes)


def _round_up(x, m):
    return (x + m - 1) // m * m


def lstm_kernel(x_ref, wih_ref, b_ref, whh_ref, wfc_ref, bfc_ref, out_ref, gx_ref):
    """One batch tile: batched input projection + serial LSTM recurrence + fused Linear.

    x_ref   : (S, BT, EP)    bf16  time-major embedded tokens (E zero-padded to EP)
    wih_ref : (EP, 4*HP)     bf16  input->gates weight, per-gate lane padding (zero cols)
    b_ref   : (1, 4*HP)      f32   bias_ih + bias_hh (padding lanes exactly 0)
    whh_ref : (HP, 4*HP)     f32   hidden->gates weight (f32: recurrence is latency-bound)
    wfc_ref : (HP, CP)       f32   final Linear weight (zero-padded)
    bfc_ref : (1, CP)        f32
    out_ref : (BT, CP)       f32   lane-dense output store
    gx_ref  : (S, BT, 4*HP)  f32   VMEM scratch: precomputed input projections
    """
    S, Bt, Ep = x_ref.shape
    Hp = whh_ref.shape[0]

    # ---- 1) Hoisted input projection: one big MXU matmul (M = S*BT actually fills the
    #         systolic array), bias folded in here exactly once, result parked in VMEM. ----
    x_all = x_ref[...].reshape(S * Bt, Ep)
    gx_ref[...] = (jnp.dot(x_all, wih_ref[...], preferred_element_type=jnp.float32)
                   + b_ref[...]).reshape(S, Bt, 4 * Hp)

    # ---- 2) Serial recurrence: only h @ W_hh (K = HP) on the critical path.
    #         Padded-lane invariant: bias/weight padding columns are exactly 0 and h0 = c0 = 0,
    #         so i = f = o = 0.5, g = 0 on lanes >= H and h, c stay exactly 0 there. ----
    h0 = jnp.zeros((Bt, Hp), jnp.float32)
    c0 = jnp.zeros((Bt, Hp), jnp.float32)

    def step(t, carry):
        h, c = carry
        gates = gx_ref[t] + jnp.dot(h, whh_ref[...], preferred_element_type=jnp.float32)
        i = jax.nn.sigmoid(gates[:, 0 * Hp:1 * Hp])   # lane-aligned static slices
        f = jax.nn.sigmoid(gates[:, 1 * Hp:2 * Hp])
        g = jnp.tanh(gates[:, 2 * Hp:3 * Hp])
        o = jax.nn.sigmoid(gates[:, 3 * Hp:4 * Hp])
        c = f * c + i * g
        h = o * jnp.tanh(c)
        return h, c

    if S <= 16:
        # Small static S: fully unrolled -> one visible basic block for the LLO scheduler.
        h, c = h0, c0
        for t in range(S):
            h, c = step(t, (h, c))
    else:
        # Long sequences: bound code size and vreg live ranges, keep modest unroll visible.
        h, c = jax.lax.fori_loop(0, S, step, (h0, c0), unroll=8)

    # ---- 3) Fused final Linear on the last hidden state: unmasked lane-dense store. ----
    out_ref[...] = jnp.dot(h, wfc_ref[...], preferred_element_type=jnp.float32) + bfc_ref[...]


def _pad_gate_cols(w, H, HP):
    """(..., 4H) -> (..., 4*HP): each PyTorch gate block [i|f|g|o] zero-padded from H to HP."""
    if HP == H:
        return w
    w4 = w.reshape(w.shape[:-1] + (4, H))
    w4 = jnp.pad(w4, [(0, 0)] * (w4.ndim - 1) + [(0, HP - H)])
    return w4.reshape(w.shape[:-1] + (4 * HP,))


def prepare_params(params):
    """One-time repack of PyTorch-style params into the kernel layout (lane-padded)."""
    V, E = params["embedding"].shape
    H = params["w_hh_t"].shape[0]
    C = params["w_fc_t"].shape[1]
    EP = _round_up(E, LANE)
    HP = _round_up(H, LANE)   # per-gate padding is a no-op when H % 128 == 0 (production)
    CP = _round_up(C, LANE)

    emb_p = jnp.pad(params["embedding"], ((0, 0), (0, EP - E))).astype(jnp.bfloat16)
    w_ih_p = _pad_gate_cols(jnp.pad(params["w_ih_t"], ((0, EP - E), (0, 0))), H, HP)
    w_hh_p = _pad_gate_cols(jnp.pad(params["w_hh_t"], ((0, HP - H), (0, 0))), H, HP)
    b_p = _pad_gate_cols(params["b"], H, HP).astype(jnp.float32)
    w_fc_p = jnp.pad(params["w_fc_t"], ((0, HP - H), (0, CP - C))).astype(jnp.float32)
    b_fc_p = jnp.pad(params["b_fc"], ((0, 0), (0, CP - C))).astype(jnp.float32)
    # NOTE: the kernel's padded-lane invariant requires these pads to be exactly zero and the
    # initial hidden/cell state to be zero.  Do not replace the zero padding with anything else.
    return dict(embedding=emb_p,
                w_ih=w_ih_p.astype(jnp.bfloat16),   # big x-projection operand: bf16
                w_hh=w_hh_p.astype(jnp.float32),    # recurrent operand: f32 (latency + accuracy)
                b=b_p, w_fc=w_fc_p, b_fc=b_fc_p,
                dims=(E, H, C, EP, HP, CP))


def _choose_batch_tile(B):
    """Batch is the only MXU-M the serial recurrence gets: make tiles big (VMEM-bounded),
    a multiple of 16 (bf16 sublane tile), and >= 2 tiles for large B so v7x's two TensorCores
    both get work through the 'parallel' grid axis."""
    if B <= BT_MAX:
        target = B if B < 32 else -(-B // 2)   # split into two tiles once B is large enough
    else:
        target = BT_MAX
    return min(_round_up(target, 16), BT_MAX)


def lstm_model_forward(token_ids, kp):
    """token_ids: (B, S) int32.  kp: prepare_params(...).  Returns logits (B, num_classes) f32."""
    B, S = token_ids.shape
    E, H, C, EP, HP, CP = kp["dims"]

    # Glue: embedding gather, emitted directly in time-major layout (only the tiny int32 token
    # matrix is transposed).
    # TODO(synk): at production sizes move the gather in-kernel (scalar-prefetched token ids +
    #             manual DMA row gather) to avoid the HBM round-trip of the padded activations.
    x_tm = jnp.take(kp["embedding"], token_ids.T, axis=0)          # (S, B, EP) bf16

    BT = _choose_batch_tile(B)
    Bp = pl.cdiv(B, BT) * BT
    if Bp != B:
        x_tm = jnp.pad(x_tm, ((0, 0), (0, Bp - B), (0, 0)))

    # TODO(synk): at production S/E/H, time-chunk the x block inside the kernel
    #             (pltpu.emit_pipeline over S) and budget vmem_limit_bytes for v7x's 64 MiB VMEM.
    out = pl.pallas_call(
        lstm_kernel,
        out_shape=jax.ShapeDtypeStruct((Bp, CP), jnp.float32),
        grid_spec=pltpu.PrefetchScalarGridSpec(
            num_scalar_prefetch=0,
            grid=(Bp // BT,),                                  # batch tiles (parallel across TCs)
            in_specs=[
                pl.BlockSpec((S, BT, EP), lambda bi: (0, bi, 0)),          # x, one batch tile
                # Constant operands: single-buffered (block never changes across the grid).
                pl.BlockSpec((EP, 4 * HP), lambda bi: (0, 0),
                             pipeline_mode=pl.Buffered(1)),                # W_ih
                pl.BlockSpec((1, 4 * HP), lambda bi: (0, 0),
                             pipeline_mode=pl.Buffered(1)),                # bias
                pl.BlockSpec((HP, 4 * HP), lambda bi: (0, 0),
                             pipeline_mode=pl.Buffered(1)),                # W_hh
                pl.BlockSpec((HP, CP), lambda bi: (0, 0),
                             pipeline_mode=pl.Buffered(1)),                # fc weight
                pl.BlockSpec((1, CP), lambda bi: (0, 0),
                             pipeline_mode=pl.Buffered(1)),                # fc bias
            ],
            out_specs=pl.BlockSpec((BT, CP), lambda bi: (bi, 0)),
            scratch_shapes=[pltpu.VMEM((S, BT, 4 * HP), jnp.float32)],     # gates_x scratch
        ),
        compiler_params=pltpu.CompilerParams(
            dimension_semantics=("parallel",)),
    )(x_tm, kp["w_ih"], kp["b"], kp["w_hh"], kp["w_fc"], kp["b_fc"])
    return out[:B, :C]


def lstm_model_reference(token_ids, params):
    """Pure-JAX f32 reference matching PyTorch nn.LSTM(batch_first=True) + Linear."""
    emb = jnp.take(params["embedding"], token_ids, axis=0)   # (B, S, E)
    H = params["w_hh_t"].shape[0]
    B = emb.shape[0]
    h = jnp.zeros((B, H), jnp.float32)
    c = jnp.zeros((B, H), jnp.float32)

    def step(carry, x_t):
        h, c = carry
        gates = x_t @ params["w_ih_t"] + h @ params["w_hh_t"] + params["b"]
        i = jax.nn.sigmoid(gates[:, 0 * H:1 * H])
        f = jax.nn.sigmoid(gates[:, 1 * H:2 * H])
        g = jnp.tanh(gates[:, 2 * H:3 * H])
        o = jax.nn.sigmoid(gates[:, 3 * H:4 * H])
        c = f * c + i * g
        h = o * jnp.tanh(c)
        return (h, c), None

    (h, _), _ = jax.lax.scan(step, (h, c), jnp.transpose(emb, (1, 0, 2)))
    return h @ params["w_fc_t"] + params["b_fc"]


def init_params(key, vocab_size, embedding_dim, lstm_units, num_classes):
    ks = jax.random.split(key, 7)
    k_lstm = 1.0 / jnp.sqrt(lstm_units)
    return {
        "embedding": jax.random.normal(ks[0], (vocab_size, embedding_dim), jnp.float32),
        # PyTorch stores weight_ih_l0 as (4H, E); we keep the transposed form (E, 4H).
        "w_ih_t": jax.random.uniform(ks[1], (embedding_dim, 4 * lstm_units),
                                     jnp.float32, -k_lstm, k_lstm),
        "w_hh_t": jax.random.uniform(ks[2], (lstm_units, 4 * lstm_units),
                                     jnp.float32, -k_lstm, k_lstm),
        "b": (jax.random.uniform(ks[3], (1, 4 * lstm_units), jnp.float32, -k_lstm, k_lstm)
              + jax.random.uniform(ks[4], (1, 4 * lstm_units), jnp.float32, -k_lstm, k_lstm)),
        # fc: PyTorch weight (C, H); transposed to (H, C).
        "w_fc_t": jax.random.uniform(ks[5], (lstm_units, num_classes),
                                     jnp.float32, -k_lstm, k_lstm),
        "b_fc": jax.random.uniform(ks[6], (1, num_classes), jnp.float32, -k_lstm, k_lstm),
    }


if __name__ == "__main__":
    vocab_size, embedding_dim, lstm_units, num_classes = 50, 32, 32, 4
    batch, seq_len = 2, 8

    key = jax.random.PRNGKey(0)
    k_param, k_tok = jax.random.split(key)
    params = init_params(k_param, vocab_size, embedding_dim, lstm_units, num_classes)
    token_ids = jax.random.randint(k_tok, (batch, seq_len), 0, vocab_size, jnp.int32)

    kparams = prepare_params(params)
    logits = jax.block_until_ready(lstm_model_forward(token_ids, kparams))
    ref = jax.block_until_ready(lstm_model_reference(token_ids, params))

    assert logits.shape == (batch, num_classes)
    # Only the x-projection uses bf16 operands (f32 accumulation); recurrence and fc are f32.
    assert jnp.allclose(logits, ref, rtol=2e-2, atol=2e-2), (logits, ref)
    print("KERNEL_OK")
</pallas_src>

<mosaic_0001>
module attributes {stable_mosaic.version = 11 : i64} {
  func.func @lstm_kernel(%arg0: i32, %arg1: memref<8x16x128xbf16, #tpu.memory_space<vmem>>, %arg2: memref<128x512xbf16, #tpu.memory_space<vmem>>, %arg3: memref<1x512xf32, #tpu.memory_space<vmem>>, %arg4: memref<128x512xf32, #tpu.memory_space<vmem>>, %arg5: memref<128x128xf32, #tpu.memory_space<vmem>>, %arg6: memref<1x128xf32, #tpu.memory_space<vmem>>, %arg7: memref<16x128xf32, #tpu.memory_space<vmem>>, %arg8: memref<8x16x512xf32, #tpu.memory_space<vmem>>) attributes {dimension_semantics = [#tpu.dimension_semantics<parallel>], iteration_bounds = array<i64: 1>, scalar_prefetch = 0 : i64, scratch_operands = 1 : i64, tpu.core_type = #tpu.core_type<tc>, window_params = [{transform_indices = @transform_0, window_bounds = array<i64: 8, 16, 128>}, {pipeline_mode = #tpu.pipeline_mode<synchronous>, transform_indices = @transform_1, window_bounds = array<i64: 128, 512>}, {pipeline_mode = #tpu.pipeline_mode<synchronous>, transform_indices = @transform_2, window_bounds = array<i64: 1, 512>}, {pipeline_mode = #tpu.pipeline_mode<synchronous>, transform_indices = @transform_3, window_bounds = array<i64: 128, 512>}, {pipeline_mode = #tpu.pipeline_mode<synchronous>, transform_indices = @transform_4, window_bounds = array<i64: 128, 128>}, {pipeline_mode = #tpu.pipeline_mode<synchronous>, transform_indices = @transform_5, window_bounds = array<i64: 1, 128>}, {transform_indices = @transform_6, window_bounds = array<i64: 16, 128>}]} {
    %c0 = arith.constant 0 : index
    %c0_0 = arith.constant 0 : index
    %c0_1 = arith.constant 0 : index
    %0 = vector.load %arg1[%c0, %c0_0, %c0_1] : memref<8x16x128xbf16, #tpu.memory_space<vmem>>, vector<8x16x128xbf16>
    %1 = vector.shape_cast %0 : vector<8x16x128xbf16> to vector<128x128xbf16>
    %c0_2 = arith.constant 0 : index
    %c0_3 = arith.constant 0 : index
    %2 = vector.load %arg2[%c0_2, %c0_3] : memref<128x512xbf16, #tpu.memory_space<vmem>>, vector<128x512xbf16>
    %cst = arith.constant dense<0.000000e+00> : vector<128x512xf32>
    %3 = tpu.matmul %1, %2, %cst {dimension_numbers = #tpu.dot_dimension_numbers<[1], [0], [0], [1], [0, 0, 1, 1], [], []>} : vector<128x128xbf16>, vector<128x512xbf16>, vector<128x512xf32> -> vector<128x512xf32>
    %c0_4 = arith.constant 0 : index
    %c0_5 = arith.constant 0 : index
    %4 = vector.load %arg3[%c0_4, %c0_5] : memref<1x512xf32, #tpu.memory_space<vmem>>, vector<1x512xf32>
    %5 = vector.broadcast %4 : vector<1x512xf32> to vector<128x512xf32>
    %6 = arith.addf %3, %5 : vector<128x512xf32>
    %7 = vector.shape_cast %6 : vector<128x512xf32> to vector<8x16x512xf32>
    %c0_6 = arith.constant 0 : index
    %c0_7 = arith.constant 0 : index
    %c0_8 = arith.constant 0 : index
    %8 = vector.load %arg8[%c0_6, %c0_7, %c0_8] : memref<8x16x512xf32, #tpu.memory_space<vmem>>, vector<8x16x512xf32>
    tpu.vector_store %arg8[%c0_6, %c0_7, %c0_8], %7 {strides = array<i32>} : memref<8x16x512xf32, #tpu.memory_space<vmem>>, vector<8x16x512xf32>,
    %cst_9 = arith.constant 0.000000e+00 : f32
    %9 = vector.broadcast %cst_9 : f32 to vector<16x128xf32>
    %cst_10 = arith.constant 0.000000e+00 : f32
    %10 = vector.broadcast %cst_10 : f32 to vector<16x128xf32>
    %c0_11 = arith.constant 0 : index
    %c0_12 = arith.constant 0 : index
    %c0_13 = arith.constant 0 : index
    %11 = vector.load %arg8[%c0_11, %c0_12, %c0_13] : memref<8x16x512xf32, #tpu.memory_space<vmem>>, vector<1x16x512xf32>
    %12 = vector.shape_cast %11 : vector<1x16x512xf32> to vector<16x512xf32>
    %c0_14 = arith.constant 0 : index
    %c0_15 = arith.constant 0 : index
    %13 = vector.load %arg4[%c0_14, %c0_15] : memref<128x512xf32, #tpu.memory_space<vmem>>, vector<128x512xf32>
    %cst_16 = arith.constant dense<0.000000e+00> : vector<16x512xf32>
    %14 = tpu.matmul %9, %13, %cst_16 {dimension_numbers = #tpu.dot_dimension_numbers<[1], [0], [0], [1], [0, 0, 1, 1], [], []>} : vector<16x128xf32>, vector<128x512xf32>, vector<16x512xf32> -> vector<16x512xf32>
    %15 = arith.addf %12, %14 : vector<16x512xf32>
    %16 = vector.extract_strided_slice %15 {offsets = [0, 0], sizes = [16, 128], strides = [1, 1]} : vector<16x512xf32> to vector<16x128xf32>
    %17 = arith.negf %16 : vector<16x128xf32>
    %18 = math.exp %17 : vector<16x128xf32>
    %cst_17 = arith.constant 1.000000e+00 : f32
    %19 = vector.broadcast %cst_17 : f32 to vector<16x128xf32>
    %20 = arith.addf %19, %18 : vector<16x128xf32>
    %21 = arith.divf %19, %20 : vector<16x128xf32>
    %22 = vector.extract_strided_slice %15 {offsets = [0, 128], sizes = [16, 128], strides = [1, 1]} : vector<16x512xf32> to vector<16x128xf32>
    %23 = arith.negf %22 : vector<16x128xf32>
    %24 = math.exp %23 : vector<16x128xf32>
    %cst_18 = arith.constant 1.000000e+00 : f32
    %25 = vector.broadcast %cst_18 : f32 to vector<16x128xf32>
    %26 = arith.addf %25, %24 : vector<16x128xf32>
    %27 = arith.divf %25, %26 : vector<16x128xf32>
    %28 = vector.extract_strided_slice %15 {offsets = [0, 256], sizes = [16, 128], strides = [1, 1]} : vector<16x512xf32> to vector<16x128xf32>
    %29 = math.tanh %28 : vector<16x128xf32>
    %30 = vector.extract_strided_slice %15 {offsets = [0, 384], sizes = [16, 128], strides = [1, 1]} : vector<16x512xf32> to vector<16x128xf32>
    %31 = arith.negf %30 : vector<16x128xf32>
    %32 = math.exp %31 : vector<16x128xf32>
    %cst_19 = arith.constant 1.000000e+00 : f32
    %33 = vector.broadcast %cst_19 : f32 to vector<16x128xf32>
    %34 = arith.addf %33, %32 : vector<16x128xf32>
    %35 = arith.divf %33, %34 : vector<16x128xf32>
    %36 = arith.mulf %27, %10 : vector<16x128xf32>
    %37 = arith.mulf %21, %29 : vector<16x128xf32>
    %38 = arith.addf %36, %37 : vector<16x128xf32>
    %39 = math.tanh %38 : vector<16x128xf32>
    %40 = arith.mulf %35, %39 : vector<16x128xf32>
    %c1 = arith.constant 1 : index
    %c0_20 = arith.constant 0 : index
    %c0_21 = arith.constant 0 : index
    %41 = vector.load %arg8[%c1, %c0_20, %c0_21] : memref<8x16x512xf32, #tpu.memory_space<vmem>>, vector<1x16x512xf32>
    %42 = vector.shape_cast %41 : vector<1x16x512xf32> to vector<16x512xf32>
    %c0_22 = arith.constant 0 : index
    %c0_23 = arith.constant 0 : index
    %43 = vector.load %arg4[%c0_22, %c0_23] : memref<128x512xf32, #tpu.memory_space<vmem>>, vector<128x512xf32>
    %cst_24 = arith.constant dense<0.000000e+00> : vector<16x512xf32>
    %44 = tpu.matmul %40, %43, %cst_24 {dimension_numbers = #tpu.dot_dimension_numbers<[1], [0], [0], [1], [0, 0, 1, 1], [], []>} : vector<16x128xf32>, vector<128x512xf32>, vector<16x512xf32> -> vector<16x512xf32>
    %45 = arith.addf %42, %44 : vector<16x512xf32>
    %46 = vector.extract_strided_slice %45 {offsets = [0, 0], sizes = [16, 128], strides = [1, 1]} : vector<16x512xf32> to vector<16x128xf32>
    %47 = arith.negf %46 : vector<16x128xf32>
    %48 = math.exp %47 : vector<16x128xf32>
    %cst_25 = arith.constant 1.000000e+00 : f32
    %49 = vector.broadcast %cst_25 : f32 to vector<16x128xf32>
    %50 = arith.addf %49, %48 : vector<16x128xf32>
    %51 = arith.divf %49, %50 : vector<16x128xf32>
    %52 = vector.extract_strided_slice %45 {offsets = [0, 128], sizes = [16, 128], strides = [1, 1]} : vector<16x512xf32> to vector<16x128xf32>
    %53 = arith.negf %52 : vector<16x128xf32>
    %54 = math.exp %53 : vector<16x128xf32>
    %cst_26 = arith.constant 1.000000e+00 : f32
    %55 = vector.broadcast %cst_26 : f32 to vector<16x128xf32>
    %56 = arith.addf %55, %54 : vector<16x128xf32>
    %57 = arith.divf %55, %56 : vector<16x128xf32>
    %58 = vector.extract_strided_slice %45 {offsets = [0, 256], sizes = [16, 128], strides = [1, 1]} : vector<16x512xf32> to vector<16x128xf32>
    %59 = math.tanh %58 : vector<16x128xf32>
    %60 = vector.extract_strided_slice %45 {offsets = [0, 384], sizes = [16, 128], strides = [1, 1]} : vector<16x512xf32> to vector<16x128xf32>
    %61 = arith.negf %60 : vector<16x128xf32>
    %62 = math.exp %61 : vector<16x128xf32>
    %cst_27 = arith.constant 1.000000e+00 : f32
    %63 = vector.broadcast %cst_27 : f32 to vector<16x128xf32>
    %64 = arith.addf %63, %62 : vector<16x128xf32>
    %65 = arith.divf %63, %64 : vector<16x128xf32>
    %66 = arith.mulf %57, %38 : vector<16x128xf32>
    %67 = arith.mulf %51, %59 : vector<16x128xf32>
    %68 = arith.addf %66, %67 : vector<16x128xf32>
    %69 = math.tanh %68 : vector<16x128xf32>
    %70 = arith.mulf %65, %69 : vector<16x128xf32>
    %c2 = arith.constant 2 : index
    %c0_28 = arith.constant 0 : index
    %c0_29 = arith.constant 0 : index
    %71 = vector.load %arg8[%c2, %c0_28, %c0_29] : memref<8x16x512xf32, #tpu.memory_space<vmem>>, vector<1x16x512xf32>
    %72 = vector.shape_cast %71 : vector<1x16x512xf32> to vector<16x512xf32>
    %c0_30 = arith.constant 0 : index
    %c0_31 = arith.constant 0 : index
    %73 = vector.load %arg4[%c0_30, %c0_31] : memref<128x512xf32, #tpu.memory_space<vmem>>, vector<128x512xf32>
    %cst_32 = arith.constant dense<0.000000e+00> : vector<16x512xf32>
    %74 = tpu.matmul %70, %73, %cst_32 {dimension_numbers = #tpu.dot_dimension_numbers<[1], [0], [0], [1], [0, 0, 1, 1], [], []>} : vector<16x128xf32>, vector<128x512xf32>, vector<16x512xf32> -> vector<16x512xf32>
    %75 = arith.addf %72, %74 : vector<16x512xf32>
    %76 = vector.extract_strided_slice %75 {offsets = [0, 0], sizes = [16, 128], strides = [1, 1]} : vector<16x512xf32> to vector<16x128xf32>
    %77 = arith.negf %76 : vector<16x128xf32>
    %78 = math.exp %77 : vector<16x128xf32>
    %cst_33 = arith.constant 1.000000e+00 : f32
    %79 = vector.broadcast %cst_33 : f32 to vector<16x128xf32>
    %80 = arith.addf %79, %78 : vector<16x128xf32>
    %81 = arith.divf %79, %80 : vector<16x128xf32>
    %82 = vector.extract_strided_slice %75 {offsets = [0, 128], sizes = [16, 128], strides = [1, 1]} : vector<16x512xf32> to vector<16x128xf32>
    %83 = arith.negf %82 : vector<16x128xf32>
    %84 = math.exp %83 : vector<16x128xf32>
    %cst_34 = arith.constant 1.000000e+00 : f32
    %85 = vector.broadcast %cst_34 : f32 to vector<16x128xf32>
    %86 = arith.addf %85, %84 : vector<16x128xf32>
    %87 = arith.divf %85, %86 : vector<16x128xf32>
    %88 = vector.extract_strided_slice %75 {offsets = [0, 256], sizes = [16, 128], strides = [1, 1]} : vector<16x512xf32> to vector<16x128xf32>
    %89 = math.tanh %88 : vector<16x128xf32>
    %90 = vector.extract_strided_slice %75 {offsets = [0, 384], sizes = [16, 128], strides = [1, 1]} : vector<16x512xf32> to vector<16x128xf32>
    %91 = arith.negf %90 : vector<16x128xf32>
    %92 = math.exp %91 : vector<16x128xf32>
    %cst_35 = arith.constant 1.000000e+00 : f32
    %93 = vector.broadcast %cst_35 : f32 to vector<16x128xf32>
    %94 = arith.addf %93, %92 : vector<16x128xf32>
    %95 = arith.divf %93, %94 : vector<16x128xf32>
    %96 = arith.mulf %87, %68 : vector<16x128xf32>
    %97 = arith.mulf %81, %89 : vector<16x128xf32>
    %98 = arith.addf %96, %97 : vector<16x128xf32>
    %99 = math.tanh %98 : vector<16x128xf32>
    %100 = arith.mulf %95, %99 : vector<16x128xf32>
    %c3 = arith.constant 3 : index
    %c0_36 = arith.constant 0 : index
    %c0_37 = arith.constant 0 : index
    %101 = vector.load %arg8[%c3, %c0_36, %c0_37] : memref<8x16x512xf32, #tpu.memory_space<vmem>>, vector<1x16x512xf32>
    %102 = vector.shape_cast %101 : vector<1x16x512xf32> to vector<16x512xf32>
    %c0_38 = arith.constant 0 : index
    %c0_39 = arith.constant 0 : index
    %103 = vector.load %arg4[%c0_38, %c0_39] : memref<128x512xf32, #tpu.memory_space<vmem>>, vector<128x512xf32>
    %cst_40 = arith.constant dense<0.000000e+00> : vector<16x512xf32>
    %104 = tpu.matmul %100, %103, %cst_40 {dimension_numbers = #tpu.dot_dimension_numbers<[1], [0], [0], [1], [0, 0, 1, 1], [], []>} : vector<16x128xf32>, vector<128x512xf32>, vector<16x512xf32> -> vector<16x512xf32>
    %105 = arith.addf %102, %104 : vector<16x512xf32>
    %106 = vector.extract_strided_slice %105 {offsets = [0, 0], sizes = [16, 128], strides = [1, 1]} : vector<16x512xf32> to vector<16x128xf32>
    %107 = arith.negf %106 : vector<16x128xf32>
    %108 = math.exp %107 : vector<16x128xf32>
    %cst_41 = arith.constant 1.000000e+00 : f32
    %109 = vector.broadcast %cst_41 : f32 to vector<16x128xf32>
    %110 = arith.addf %109, %108 : vector<16x128xf32>
    %111 = arith.divf %109, %110 : vector<16x128xf32>
    %112 = vector.extract_strided_slice %105 {offsets = [0, 128], sizes = [16, 128], strides = [1, 1]} : vector<16x512xf32> to vector<16x128xf32>
    %113 = arith.negf %112 : vector<16x128xf32>
    %114 = math.exp %113 : vector<16x128xf32>
    %cst_42 = arith.constant 1.000000e+00 : f32
    %115 = vector.broadcast %cst_42 : f32 to vector<16x128xf32>
    %116 = arith.addf %115, %114 : vector<16x128xf32>
    %117 = arith.divf %115, %116 : vector<16x128xf32>
    %118 = vector.extract_strided_slice %105 {offsets = [0, 256], sizes = [16, 128], strides = [1, 1]} : vector<16x512xf32> to vector<16x128xf32>
    %119 = math.tanh %118 : vector<16x128xf32>
    %120 = vector.extract_strided_slice %105 {offsets = [0, 384], sizes = [16, 128], strides = [1, 1]} : vector<16x512xf32> to vector<16x128xf32>
    %121 = arith.negf %120 : vector<16x128xf32>
    %122 = math.exp %121 : vector<16x128xf32>
    %cst_43 = arith.constant 1.000000e+00 : f32
    %123 = vector.broadcast %cst_43 : f32 to vector<16x128xf32>
    %124 = arith.addf %123, %122 : vector<16x128xf32>
    %125 = arith.divf %123, %124 : vector<16x128xf32>
    %126 = arith.mulf %117, %98 : vector<16x128xf32>
    %127 = arith.mulf %111, %119 : vector<16x128xf32>
    %128 = arith.addf %126, %127 : vector<16x128xf32>
    %129 = math.tanh %128 : vector<16x128xf32>
    %130 = arith.mulf %125, %129 : vector<16x128xf32>
    %c4 = arith.constant 4 : index
    %c0_44 = arith.constant 0 : index
    %c0_45 = arith.constant 0 : index
    %131 = vector.load %arg8[%c4, %c0_44, %c0_45] : memref<8x16x512xf32, #tpu.memory_space<vmem>>, vector<1x16x512xf32>
    %132 = vector.shape_cast %131 : vector<1x16x512xf32> to vector<16x512xf32>
    %c0_46 = arith.constant 0 : index
    %c0_47 = arith.constant 0 : index
    %133 = vector.load %arg4[%c0_46, %c0_47] : memref<128x512xf32, #tpu.memory_space<vmem>>, vector<128x512xf32>
    %cst_48 = arith.constant dense<0.000000e+00> : vector<16x512xf32>
    %134 = tpu.matmul %130, %133, %cst_48 {dimension_numbers = #tpu.dot_dimension_numbers<[1], [0], [0], [1], [0, 0, 1, 1], [], []>} : vector<16x128xf32>, vector<128x512xf32>, vector<16x512xf32> -> vector<16x512xf32>
    %135 = arith.addf %132, %134 : vector<16x512xf32>
    %136 = vector.extract_strided_slice %135 {offsets = [0, 0], sizes = [16, 128], strides = [1, 1]} : vector<16x512xf32> to vector<16x128xf32>
    %137 = arith.negf %136 : vector<16x128xf32>
    %138 = math.exp %137 : vector<16x128xf32>
    %cst_49 = arith.constant 1.000000e+00 : f32
    %139 = vector.broadcast %cst_49 : f32 to vector<16x128xf32>
    %140 = arith.addf %139, %138 : vector<16x128xf32>
    %141 = arith.divf %139, %140 : vector<16x128xf32>
    %142 = vector.extract_strided_slice %135 {offsets = [0, 128], sizes = [16, 128], strides = [1, 1]} : vector<16x512xf32> to vector<16x128xf32>
    %143 = arith.negf %142 : vector<16x128xf32>
    %144 = math.exp %143 : vector<16x128xf32>
    %cst_50 = arith.constant 1.000000e+00 : f32
    %145 = vector.broadcast %cst_50 : f32 to vector<16x128xf32>
    %146 = arith.addf %145, %144 : vector<16x128xf32>
    %147 = arith.divf %145, %146 : vector<16x128xf32>
    %148 = vector.extract_strided_slice %135 {offsets = [0, 256], sizes = [16, 128], strides = [1, 1]} : vector<16x512xf32> to vector<16x128xf32>
    %149 = math.tanh %148 : vector<16x128xf32>
    %150 = vector.extract_strided_slice %135 {offsets = [0, 384], sizes = [16, 128], strides = [1, 1]} : vector<16x512xf32> to vector<16x128xf32>
    %151 = arith.negf %150 : vector<16x128xf32>
    %152 = math.exp %151 : vector<16x128xf32>
    %cst_51 = arith.constant 1.000000e+00 : f32
    %153 = vector.broadcast %cst_51 : f32 to vector<16x128xf32>
    %154 = arith.addf %153, %152 : vector<16x128xf32>
    %155 = arith.divf %153, %154 : vector<16x128xf32>
    %156 = arith.mulf %147, %128 : vector<16x128xf32>
    %157 = arith.mulf %141, %149 : vector<16x128xf32>
    %158 = arith.addf %156, %157 : vector<16x128xf32>
    %159 = math.tanh %158 : vector<16x128xf32>
    %160 = arith.mulf %155, %159 : vector<16x128xf32>
    %c5 = arith.constant 5 : index
    %c0_52 = arith.constant 0 : index
    %c0_53 = arith.constant 0 : index
    %161 = vector.load %arg8[%c5, %c0_52, %c0_53] : memref<8x16x512xf32, #tpu.memory_space<vmem>>, vector<1x16x512xf32>
    %162 = vector.shape_cast %161 : vector<1x16x512xf32> to vector<16x512xf32>
    %c0_54 = arith.constant 0 : index
    %c0_55 = arith.constant 0 : index
    %163 = vector.load %arg4[%c0_54, %c0_55] : memref<128x512xf32, #tpu.memory_space<vmem>>, vector<128x512xf32>
    %cst_56 = arith.constant dense<0.000000e+00> : vector<16x512xf32>
    %164 = tpu.matmul %160, %163, %cst_56 {dimension_numbers = #tpu.dot_dimension_numbers<[1], [0], [0], [1], [0, 0, 1, 1], [], []>} : vector<16x128xf32>, vector<128x512xf32>, vector<16x512xf32> -> vector<16x512xf32>
    %165 = arith.addf %162, %164 : vector<16x512xf32>
    %166 = vector.extract_strided_slice %165 {offsets = [0, 0], sizes = [16, 128], strides = [1, 1]} : vector<16x512xf32> to vector<16x128xf32>
    %167 = arith.negf %166 : vector<16x128xf32>
    %168 = math.exp %167 : vector<16x128xf32>
    %cst_57 = arith.constant 1.000000e+00 : f32
    %169 = vector.broadcast %cst_57 : f32 to vector<16x128xf32>
    %170 = arith.addf %169, %168 : vector<16x128xf32>
    %171 = arith.divf %169, %170 : vector<16x128xf32>
    %172 = vector.extract_strided_slice %165 {offsets = [0, 128], sizes = [16, 128], strides = [1, 1]} : vector<16x512xf32> to vector<16x128xf32>
    %173 = arith.negf %172 : vector<16x128xf32>
    %174 = math.exp %173 : vector<16x128xf32>
    %cst_58 = arith.constant 1.000000e+00 : f32
    %175 = vector.broadcast %cst_58 : f32 to vector<16x128xf32>
    %176 = arith.addf %175, %174 : vector<16x128xf32>
    %177 = arith.divf %175, %176 : vector<16x128xf32>
    %178 = vector.extract_strided_slice %165 {offsets = [0, 256], sizes = [16, 128], strides = [1, 1]} : vector<16x512xf32> to vector<16x128xf32>
    %179 = math.tanh %178 : vector<16x128xf32>
    %180 = vector.extract_strided_slice %165 {offsets = [0, 384], sizes = [16, 128], strides = [1, 1]} : vector<16x512xf32> to vector<16x128xf32>
    %181 = arith.negf %180 : vector<16x128xf32>
    %182 = math.exp %181 : vector<16x128xf32>
    %cst_59 = arith.constant 1.000000e+00 : f32
    %183 = vector.broadcast %cst_59 : f32 to vector<16x128xf32>
    %184 = arith.addf %183, %182 : vector<16x128xf32>
    %185 = arith.divf %183, %184 : vector<16x128xf32>
    %186 = arith.mulf %177, %158 : vector<16x128xf32>
    %187 = arith.mulf %171, %179 : vector<16x128xf32>
    %188 = arith.addf %186, %187 : vector<16x128xf32>
    %189 = math.tanh %188 : vector<16x128xf32>
    %190 = arith.mulf %185, %189 : vector<16x128xf32>
    %c6 = arith.constant 6 : index
    %c0_60 = arith.constant 0 : index
    %c0_61 = arith.constant 0 : index
    %191 = vector.load %arg8[%c6, %c0_60, %c0_61] : memref<8x16x512xf32, #tpu.memory_space<vmem>>, vector<1x16x512xf32>
    %192 = vector.shape_cast %191 : vector<1x16x512xf32> to vector<16x512xf32>
    %c0_62 = arith.constant 0 : index
    %c0_63 = arith.constant 0 : index
    %193 = vector.load %arg4[%c0_62, %c0_63] : memref<128x512xf32, #tpu.memory_space<vmem>>, vector<128x512xf32>
    %cst_64 = arith.constant dense<0.000000e+00> : vector<16x512xf32>
    %194 = tpu.matmul %190, %193, %cst_64 {dimension_numbers = #tpu.dot_dimension_numbers<[1], [0], [0], [1], [0, 0, 1, 1], [], []>} : vector<16x128xf32>, vector<128x512xf32>, vector<16x512xf32> -> vector<16x512xf32>
    %195 = arith.addf %192, %194 : vector<16x512xf32>
    %196 = vector.extract_strided_slice %195 {offsets = [0, 0], sizes = [16, 128], strides = [1, 1]} : vector<16x512xf32> to vector<16x128xf32>
    %197 = arith.negf %196 : vector<16x128xf32>
    %198 = math.exp %197 : vector<16x128xf32>
    %cst_65 = arith.constant 1.000000e+00 : f32
    %199 = vector.broadcast %cst_65 : f32 to vector<16x128xf32>
    %200 = arith.addf %199, %198 : vector<16x128xf32>
    %201 = arith.divf %199, %200 : vector<16x128xf32>
    %202 = vector.extract_strided_slice %195 {offsets = [0, 128], sizes = [16, 128], strides = [1, 1]} : vector<16x512xf32> to vector<16x128xf32>
    %203 = arith.negf %202 : vector<16x128xf32>
    %204 = math.exp %203 : vector<16x128xf32>
    %cst_66 = arith.constant 1.000000e+00 : f32
    %205 = vector.broadcast %cst_66 : f32 to vector<16x128xf32>
    %206 = arith.addf %205, %204 : vector<16x128xf32>
    %207 = arith.divf %205, %206 : vector<16x128xf32>
    %208 = vector.extract_strided_slice %195 {offsets = [0, 256], sizes = [16, 128], strides = [1, 1]} : vector<16x512xf32> to vector<16x128xf32>
    %209 = math.tanh %208 : vector<16x128xf32>
    %210 = vector.extract_strided_slice %195 {offsets = [0, 384], sizes = [16, 128], strides = [1, 1]} : vector<16x512xf32> to vector<16x128xf32>
    %211 = arith.negf %210 : vector<16x128xf32>
    %212 = math.exp %211 : vector<16x128xf32>
    %cst_67 = arith.constant 1.000000e+00 : f32
    %213 = vector.broadcast %cst_67 : f32 to vector<16x128xf32>
    %214 = arith.addf %213, %212 : vector<16x128xf32>
    %215 = arith.divf %213, %214 : vector<16x128xf32>
    %216 = arith.mulf %207, %188 : vector<16x128xf32>
    %217 = arith.mulf %201, %209 : vector<16x128xf32>
    %218 = arith.addf %216, %217 : vector<16x128xf32>
    %219 = math.tanh %218 : vector<16x128xf32>
    %220 = arith.mulf %215, %219 : vector<16x128xf32>
    %c7 = arith.constant 7 : index
    %c0_68 = arith.constant 0 : index
    %c0_69 = arith.constant 0 : index
    %221 = vector.load %arg8[%c7, %c0_68, %c0_69] : memref<8x16x512xf32, #tpu.memory_space<vmem>>, vector<1x16x512xf32>
    %222 = vector.shape_cast %221 : vector<1x16x512xf32> to vector<16x512xf32>
    %c0_70 = arith.constant 0 : index
    %c0_71 = arith.constant 0 : index
    %223 = vector.load %arg4[%c0_70, %c0_71] : memref<128x512xf32, #tpu.memory_space<vmem>>, vector<128x512xf32>
    %cst_72 = arith.constant dense<0.000000e+00> : vector<16x512xf32>
    %224 = tpu.matmul %220, %223, %cst_72 {dimension_numbers = #tpu.dot_dimension_numbers<[1], [0], [0], [1], [0, 0, 1, 1], [], []>} : vector<16x128xf32>, vector<128x512xf32>, vector<16x512xf32> -> vector<16x512xf32>
    %225 = arith.addf %222, %224 : vector<16x512xf32>
    %226 = vector.extract_strided_slice %225 {offsets = [0, 0], sizes = [16, 128], strides = [1, 1]} : vector<16x512xf32> to vector<16x128xf32>
    %227 = arith.negf %226 : vector<16x128xf32>
    %228 = math.exp %227 : vector<16x128xf32>
    %cst_73 = arith.constant 1.000000e+00 : f32
    %229 = vector.broadcast %cst_73 : f32 to vector<16x128xf32>
    %230 = arith.addf %229, %228 : vector<16x128xf32>
    %231 = arith.divf %229, %230 : vector<16x128xf32>
    %232 = vector.extract_strided_slice %225 {offsets = [0, 128], sizes = [16, 128], strides = [1, 1]} : vector<16x512xf32> to vector<16x128xf32>
    %233 = arith.negf %232 : vector<16x128xf32>
    %234 = math.exp %233 : vector<16x128xf32>
    %cst_74 = arith.constant 1.000000e+00 : f32
    %235 = vector.broadcast %cst_74 : f32 to vector<16x128xf32>
    %236 = arith.addf %235, %234 : vector<16x128xf32>
    %237 = arith.divf %235, %236 : vector<16x128xf32>
    %238 = vector.extract_strided_slice %225 {offsets = [0, 256], sizes = [16, 128], strides = [1, 1]} : vector<16x512xf32> to vector<16x128xf32>
    %239 = math.tanh %238 : vector<16x128xf32>
    %240 = vector.extract_strided_slice %225 {offsets = [0, 384], sizes = [16, 128], strides = [1, 1]} : vector<16x512xf32> to vector<16x128xf32>
    %241 = arith.negf %240 : vector<16x128xf32>
    %242 = math.exp %241 : vector<16x128xf32>
    %cst_75 = arith.constant 1.000000e+00 : f32
    %243 = vector.broadcast %cst_75 : f32 to vector<16x128xf32>
    %244 = arith.addf %243, %242 : vector<16x128xf32>
    %245 = arith.divf %243, %244 : vector<16x128xf32>
    %246 = arith.mulf %237, %218 : vector<16x128xf32>
    %247 = arith.mulf %231, %239 : vector<16x128xf32>
    %248 = arith.addf %246, %247 : vector<16x128xf32>
    %249 = math.tanh %248 : vector<16x128xf32>
    %250 = arith.mulf %245, %249 : vector<16x128xf32>
    %c0_76 = arith.constant 0 : index
    %c0_77 = arith.constant 0 : index
    %251 = vector.load %arg5[%c0_76, %c0_77] : memref<128x128xf32, #tpu.memory_space<vmem>>, vector<128x128xf32>
    %cst_78 = arith.constant dense<0.000000e+00> : vector<16x128xf32>
    %252 = tpu.matmul %250, %251, %cst_78 {dimension_numbers = #tpu.dot_dimension_numbers<[1], [0], [0], [1], [0, 0, 1, 1], [], []>} : vector<16x128xf32>, vector<128x128xf32>, vector<16x128xf32> -> vector<16x128xf32>
    %c0_79 = arith.constant 0 : index
    %c0_80 = arith.constant 0 : index
    %253 = vector.load %arg6[%c0_79, %c0_80] : memref<1x128xf32, #tpu.memory_space<vmem>>, vector<1x128xf32>
    %254 = vector.broadcast %253 : vector<1x128xf32> to vector<16x128xf32>
    %255 = arith.addf %252, %254 : vector<16x128xf32>
    %c0_81 = arith.constant 0 : index
    %c0_82 = arith.constant 0 : index
    %256 = vector.load %arg7[%c0_81, %c0_82] : memref<16x128xf32, #tpu.memory_space<vmem>>, vector<16x128xf32>
    tpu.vector_store %arg7[%c0_81, %c0_82], %255 {strides = array<i32>} : memref<16x128xf32, #tpu.memory_space<vmem>>, vector<16x128xf32>,
    return
  }
  func.func @transform_0(%arg0: i32) -> (i32, i32, i32) {
    %c0_i32 = arith.constant 0 : i32
    %c0_i32_0 = arith.constant 0 : i32
    %c0_i32_1 = arith.constant 0 : i32
    return %c0_i32, %arg0, %c0_i32_0 : i32, i32, i32
  }
  func.func @transform_1(%arg0: i32) -> (i32, i32) {
    %c0_i32 = arith.constant 0 : i32
    %c0_i32_0 = arith.constant 0 : i32
    %c0_i32_1 = arith.constant 0 : i32
    return %c0_i32, %c0_i32_0 : i32, i32
  }
  func.func @transform_2(%arg0: i32) -> (i32, i32) {
    %c0_i32 = arith.constant 0 : i32
    %c0_i32_0 = arith.constant 0 : i32
    %c0_i32_1 = arith.constant 0 : i32
    return %c0_i32, %c0_i32_0 : i32, i32
  }
  func.func @transform_3(%arg0: i32) -> (i32, i32) {
    %c0_i32 = arith.constant 0 : i32
    %c0_i32_0 = arith.constant 0 : i32
    %c0_i32_1 = arith.constant 0 : i32
    return %c0_i32, %c0_i32_0 : i32, i32
  }
  func.func @transform_4(%arg0: i32) -> (i32, i32) {
    %c0_i32 = arith.constant 0 : i32
    %c0_i32_0 = arith.constant 0 : i32
    %c0_i32_1 = arith.constant 0 : i32
    return %c0_i32, %c0_i32_0 : i32, i32
  }
  func.func @transform_5(%arg0: i32) -> (i32, i32) {
    %c0_i32 = arith.constant 0 : i32
    %c0_i32_0 = arith.constant 0 : i32
    %c0_i32_1 = arith.constant 0 : i32
    return %c0_i32, %c0_i32_0 : i32, i32
  }
  func.func @transform_6(%arg0: i32) -> (i32, i32) {
    %c0_i32 = arith.constant 0 : i32
    %c0_i32_0 = arith.constant 0 : i32
    return %arg0, %c0_i32 : i32, i32
  }
}

</mosaic_0001>

<bundles_post_ra>
// kernel: tpu_custom_call.1
= control target key start
LH: loop header
LB: loop body
LE: loop exit
PB: predicated region body
PF: predicated region fallthrough
CT: control target
= control target key end

     0   :  { %11 = vsyncpa [#allocation4], 0  ;;  %s4898_s0 = inlined_call_operand.hbm [shape: bf16[8,16,128], index: 0, kind: input, shape index: {}]   ;;  %s4899_s1 = inlined_call_operand.hbm [shape: bf16[128,512], index: 1, kind: input, shape index: {}]   ;;  %s4900_s2 = inlined_call_operand.hbm [shape: f32[1,512], index: 2, kind: input, shape index: {}]   ;;  %s4901_s3 = inlined_call_operand.hbm [shape: f32[128,512], index: 3, kind: input, shape index: {}]   ;;  %s4902_s4 = inlined_call_operand.hbm [shape: f32[128,128], index: 4, kind: input, shape index: {}]   ;;  %s4903_s5 = inlined_call_operand.vmem [shape: f32[1,128], index: 5, kind: input, shape index: {}]   ;;  %s4904_s6 = inlined_call_operand.hbm [shape: f32[16,128], index: 6, kind: output, shape index: {}]  }
   0x1   :  { %12 = vsyncpa [#allocation7], 0 }
   0x2   :  { %13 = vsyncpa [#allocation10], 0  ;;  %s32_s23 = sshll.u32 %s4899_s1, 4  ;;  %s33_s23 = int_to_ptr.hbm [resolvable:$true] %s32_s23 }
   0x3   :  { %14 = vsyncpa [#allocation5], 0  ;;  %s3451_s24 = smov [#allocation6]   ;;  %s56_s28 = sshll.u32 %s4901_s3, 4  ;;  %s57_s28 = int_to_ptr.hbm [resolvable:$true] %s56_s28 }
   0x4   :  { %s34_s25 = sshll.u32 %s3451_s24, 4  ;;  %s3452_s29 = smov 256   ;;  %s35_s25 = int_to_ptr.vmem [resolvable:$true] %s34_s25 }
   0x5   :  { %s3453_s30 = smov 16   ;;  %s3454_s7 = smov [#allocation9]  }
   0x6   :  { %40 = dma.hbm_to_vmem [thread:$0]  %s33_s23, 4096, %s35_s25, [#allocation7], %s3452_s29, %s3452_s29, %s3453_s30  }
   0x7   :  { %s58_s8 = sshll.u32 %s3454_s7, 4  ;;  %s3455_s9 = smov 512   ;;  %s59_s8 = int_to_ptr.vmem [resolvable:$true] %s58_s8 }
   0x8   :  { %s3456_s10 = smov 32   ;;  %s19_s12 = sshll.u32 %s4898_s0, 4  ;;  %s20_s12 = int_to_ptr.hbm [resolvable:$true] %s19_s12 }
   0x9   :  { %64 = dma.hbm_to_vmem [thread:$0]  %s57_s28, 8192, %s59_s8, [#allocation10], %s3455_s9, %s3455_s9, %s3456_s10  }
   0xa   :  { %s3457_s13 = smov [#allocation3]   ;;  %s46_s16 = sshll.u32 %s4900_s2, 4  ;;  %s47_s16 = int_to_ptr.hbm [resolvable:$true] %s46_s16 }
   0xb   :  { %s21_s14 = sshll.u32 %s3457_s13, 4  ;;  %s3458_s17 = smov 64   ;;  %s22_s14 = int_to_ptr.vmem [resolvable:$true] %s21_s14 }
   0xc   :  { %s3459_s18 = smov 4   ;;  %s3460_s19 = smov [#allocation8]  }
   0xd   :  { %27 = dma.hbm_to_vmem [thread:$0]  %s20_s12, 1024, %s22_s14, [#allocation4], %s3458_s17, %s3458_s17, %s3459_s18  }
   0xe   :  { %s48_s20 = sshll.u32 %s3460_s19, 4  ;;  %s69_s23 = sshll.u32 %s4902_s4, 4  ;;  %s49_s20 = int_to_ptr.vmem [resolvable:$true] %s48_s20  ;;  %s70_s23 = int_to_ptr.hbm [resolvable:$true] %s69_s23 }
   0xf   :  { %51 = dma.hbm_to_vmem [thread:$0]  %s47_s16, 64, %s49_s20, [#allocation7]  }
  0x10   :  { %s3461_s0 = smov [#allocation11]   ;;  %s3462_s25 = smov 128  }
  0x11   :  { %s71_s24 = sshll.u32 %s3461_s0, 4  ;;  %s3463_s26 = smov 8   ;;  %s72_s24 = int_to_ptr.vmem [resolvable:$true] %s71_s24 }
  0x12   :  { %77 = dma.hbm_to_vmem [thread:$0]  %s70_s23, 2048, %s72_s24, [#allocation10], %s3462_s25, %s3462_s25, %s3463_s26  }
  0x13   :  { %3443 = dma.done.wait [#allocation4], 1024  }
  0x14   :  { %3444 = vsyncadd [#allocation4], 4294966272 }
  0x15   :  { %3445 = dma.done.wait [#allocation7], 4160  }
  0x16   :  { %3446 = vsyncadd [#allocation7], 4294963136 }
  0x17   :  { %3447 = dma.done.wait [#allocation10], 10240  }
  0x18   :  { %3448 = vsyncadd [#allocation10], 4294957056  ;;  %v2781_v0 = vld [vmem:[#allocation6 + $0xe0] sm:$0xf]  ;;  %v2881_v1 = vld [vmem:[#allocation6 + $0xec] sm:$0xf0] }
  0x19   :  { %v2879_v2 = vld [vmem:[#allocation6 + $0xe4] sm:$0xf]  ;;  %v2782_v3 = vor.u32 %v2881_v1, %v2781_v0  ;;  %v2783_v4 = vld [vmem:[#allocation6 + $0xf0] sm:$0xf0]  ;;  %v2789_v5 = vld [vmem:[#allocation6 + $0xe8] sm:$0xf] }
  0x1a   :  { %v2882_v6 = vld [vmem:[#allocation6 + $0xf4] sm:$0xf0]  ;;  %v2786_v7 = vor.u32 %v2879_v2, %v2783_v4  ;;  %v2880_v9 = vld [vmem:[#allocation6 + $0xec] sm:$0xf]  ;;  %v2791_v10 = vld [vmem:[#allocation6 + $0xf8] sm:$0xf0] }
  0x1b   :  { %v2790_v8 = vor.u32 %v2882_v6, %v2789_v5  ;;  %v2765_v11 = vld [vmem:[#allocation6 + $0xc0] sm:$0xf]  ;;  %366 = vmatpush.bf16.msra.mxu0 %v2782_v3  ;;  %v2794_v12 = vor.u32 %v2880_v9, %v2791_v10  ;;  %v2877_v13 = vld [vmem:[#allocation6 + $0xcc] sm:$0xf0]  ;;  %v2875_v14 = vld [vmem:[#allocation6 + $0xc4] sm:$0xf] }
  0x1c   :  { %v2767_v15 = vld [vmem:[#allocation6 + $0xd0] sm:$0xf0]  ;;  %415 = vmatpush.bf16.msra.mxu1 %v2786_v7  ;;  %v2766_v16 = vor.u32 %v2877_v13, %v2765_v11  ;;  %v2773_v18 = vld [vmem:[#allocation6 + $0xc8] sm:$0xf]  ;;  %v2878_v19 = vld [vmem:[#allocation6 + $0xd4] sm:$0xf0] }
  0x1d   :  { %464 = vmatpush.bf16.msra.mxu2 %v2790_v8  ;;  %v2770_v17 = vor.u32 %v2875_v14, %v2767_v15  ;;  %v2876_v20 = vld [vmem:[#allocation6 + $0xcc] sm:$0xf]  ;;  %513 = vmatpush.bf16.msra.mxu3 %v2794_v12  ;;  %v2774_v21 = vor.u32 %v2878_v19, %v2773_v18  ;;  %v2775_v22 = vld [vmem:[#allocation6 + $0xd8] sm:$0xf0]  ;;  %v2749_v23 = vld [vmem:[#allocation6 + $0xa0] sm:$0xf] }
  0x1e   :  { %v2873_v24 = vld [vmem:[#allocation6 + $0xac] sm:$0xf0]  ;;  %v2778_v25 = vor.u32 %v2876_v20, %v2775_v22  ;;  %v2871_v26 = vld [vmem:[#allocation6 + $0xa4] sm:$0xf]  ;;  %v2751_v27 = vld [vmem:[#allocation6 + $0xb0] sm:$0xf0] }
  0x1f   :  { %v2757_v28 = vld [vmem:[#allocation6 + $0xa8] sm:$0xf]  ;;  %367 = vmatpush.bf16.msra.mxu0 %v2766_v16  ;;  %v2750_v29 = vor.u32 %v2873_v24, %v2749_v23  ;;  %v2874_v30 = vld [vmem:[#allocation6 + $0xb4] sm:$0xf0]  ;;  %v2872_v31 = vld [vmem:[#allocation6 + $0xac] sm:$0xf]  ;;  %v2754_v33 = vor.u32 %v2871_v26, %v2751_v27 }
  0x20   :  { %v2759_v32 = vld [vmem:[#allocation6 + $0xb8] sm:$0xf0]  ;;  %416 = vmatpush.bf16.msra.mxu1 %v2770_v17  ;;  %v2758_v34 = vor.u32 %v2874_v30, %v2757_v28  ;;  %v2733_v35 = vld [vmem:[#allocation6 + $0x80] sm:$0xf]  ;;  %v2869_v36 = vld [vmem:[#allocation6 + $0x8c] sm:$0xf0] }
  0x21   :  { %465 = vmatpush.bf16.msra.mxu2 %v2774_v21  ;;  %v2867_v37 = vld [vmem:[#allocation6 + $0x84] sm:$0xf]  ;;  %514 = vmatpush.bf16.msra.mxu3 %v2778_v25  ;;  %v2762_v38 = vor.u32 %v2872_v31, %v2759_v32  ;;  %v2735_v39 = vld [vmem:[#allocation6 + $0x90] sm:$0xf0]  ;;  %v2741_v40 = vld [vmem:[#allocation6 + $0x88] sm:$0xf]  ;;  %v2734_v44 = vor.u32 %v2869_v36, %v2733_v35 }
  0x22   :  { %v2870_v41 = vld [vmem:[#allocation6 + $0x94] sm:$0xf0]  ;;  %v2868_v42 = vld [vmem:[#allocation6 + $0x8c] sm:$0xf]  ;;  %v2743_v43 = vld [vmem:[#allocation6 + $0x98] sm:$0xf0]  ;;  %v2738_v45 = vor.u32 %v2867_v37, %v2735_v39 }
  0x23   :  { %368 = vmatpush.bf16.msra.mxu0 %v2750_v29  ;;  %v2742_v46 = vor.u32 %v2870_v41, %v2741_v40  ;;  %v2717_v47 = vld [vmem:[#allocation6 + $0x60] sm:$0xf]  ;;  %v2865_v48 = vld [vmem:[#allocation6 + $0x6c] sm:$0xf0]  ;;  %v2863_v49 = vld [vmem:[#allocation6 + $0x64] sm:$0xf]  ;;  %v2746_v50 = vor.u32 %v2868_v42, %v2743_v43 }
  0x24   :  { %417 = vmatpush.bf16.msra.mxu1 %v2754_v33  ;;  %v2719_v51 = vld [vmem:[#allocation6 + $0x70] sm:$0xf0]  ;;  %v2725_v52 = vld [vmem:[#allocation6 + $0x68] sm:$0xf]  ;;  %v2866_v53 = vld [vmem:[#allocation6 + $0x74] sm:$0xf0]  ;;  %v2718_v56 = vor.u32 %v2865_v48, %v2717_v47 }
  0x25   :  { %466 = vmatpush.bf16.msra.mxu2 %v2758_v34  ;;  %515 = vmatpush.bf16.msra.mxu3 %v2762_v38  ;;  %v2864_v54 = vld [vmem:[#allocation6 + $0x6c] sm:$0xf]  ;;  %v2727_v55 = vld [vmem:[#allocation6 + $0x78] sm:$0xf0]  ;;  %v2722_v57 = vor.u32 %v2863_v49, %v2719_v51  ;;  %v2726_v58 = vor.u32 %v2866_v53, %v2725_v52  ;;  %v2701_v59 = vld [vmem:[#allocation6 + $0x40] sm:$0xf] }
  0x26   :  { %v2861_v60 = vld [vmem:[#allocation6 + $0x4c] sm:$0xf0]  ;;  %v2859_v61 = vld [vmem:[#allocation6 + $0x44] sm:$0xf]  ;;  %v2730_v62 = vor.u32 %v2864_v54, %v2727_v55  ;;  %v2703_v63 = vld [vmem:[#allocation6 + $0x50] sm:$0xf0] }
  0x27   :  { %369 = vmatpush.bf16.msra.mxu0 %v2734_v44  ;;  %v2709_v0 = vld [vmem:[#allocation6 + $0x48] sm:$0xf]  ;;  %v2862_v1 = vld [vmem:[#allocation6 + $0x54] sm:$0xf0]  ;;  %v2860_v2 = vld [vmem:[#allocation6 + $0x4c] sm:$0xf]  ;;  %v2702_v4 = vor.u32 %v2861_v60, %v2701_v59  ;;  %v2706_v5 = vor.u32 %v2859_v61, %v2703_v63 }
  0x28   :  { %418 = vmatpush.bf16.msra.mxu1 %v2738_v45  ;;  %v2711_v3 = vld [vmem:[#allocation6 + $0x58] sm:$0xf0]  ;;  %v2710_v6 = vor.u32 %v2862_v1, %v2709_v0  ;;  %v2685_v7 = vld [vmem:[#allocation6 + $0x20] sm:$0xf]  ;;  %v2857_v8 = vld [vmem:[#allocation6 + $0x2c] sm:$0xf0] }
  0x29   :  { %467 = vmatpush.bf16.msra.mxu2 %v2742_v46  ;;  %516 = vmatpush.bf16.msra.mxu3 %v2746_v50  ;;  %v2855_v9 = vld [vmem:[#allocation6 + $0x24] sm:$0xf]  ;;  %v2714_v10 = vor.u32 %v2860_v2, %v2711_v3  ;;  %v2687_v11 = vld [vmem:[#allocation6 + $0x30] sm:$0xf0]  ;;  %v2693_v12 = vld [vmem:[#allocation6 + $0x28] sm:$0xf]  ;;  %v2686_v16 = vor.u32 %v2857_v8, %v2685_v7 }
  0x2a   :  { %v2858_v13 = vld [vmem:[#allocation6 + $0x34] sm:$0xf0]  ;;  %v2856_v14 = vld [vmem:[#allocation6 + $0x2c] sm:$0xf]  ;;  %v2695_v15 = vld [vmem:[#allocation6 + $0x38] sm:$0xf0]  ;;  %v2690_v17 = vor.u32 %v2855_v9, %v2687_v11 }
  0x2b   :  { %370 = vmatpush.bf16.msra.mxu0 %v2718_v56  ;;  %v2694_v18 = vor.u32 %v2858_v13, %v2693_v12  ;;  %v2669_v19 = vld [vmem:[#allocation6] sm:$0xf]  ;;  %v2853_v20 = vld [vmem:[#allocation6 + $0xc] sm:$0xf0]  ;;  %v2851_v21 = vld [vmem:[#allocation6 + $0x4] sm:$0xf]  ;;  %v2698_v22 = vor.u32 %v2856_v14, %v2695_v15 }
  0x2c   :  { %419 = vmatpush.bf16.msra.mxu1 %v2722_v57  ;;  %v2671_v23 = vld [vmem:[#allocation6 + $0x10] sm:$0xf0]  ;;  %v2677_v24 = vld [vmem:[#allocation6 + $0x8] sm:$0xf]  ;;  %v2854_v25 = vld [vmem:[#allocation6 + $0x14] sm:$0xf0]  ;;  %v2670_v28 = vor.u32 %v2853_v20, %v2669_v19 }
  0x2d   :  { %468 = vmatpush.bf16.msra.mxu2 %v2726_v58  ;;  %517 = vmatpush.bf16.msra.mxu3 %v2730_v62  ;;  %v2852_v26 = vld [vmem:[#allocation6 + $0xc] sm:$0xf]  ;;  %v2679_v27 = vld [vmem:[#allocation6 + $0x18] sm:$0xf0]  ;;  %v2674_v29 = vor.u32 %v2851_v21, %v2671_v23  ;;  %v2678_v30 = vor.u32 %v2854_v25, %v2677_v24  ;;  %v2843_v32 = vld [vmem:[#allocation3] sm:$0xff]  ;;  %s3465_s27 = smov [#allocation12]  }
  0x2e   :  { %v2682_v31 = vor.u32 %v2852_v26, %v2679_v27  ;;  %v3519_v33 = vld [vmem:[#allocation9 + $0x1e0] sm:$0xff]  ;;  %v3521_v34 = vld [vmem:[#allocation9 + $0x1e8] sm:$0xff]  ;;  %v3527_v36 = vld [vmem:[#allocation9 + $0x1f8] sm:$0xff]  ;;  %s2618_s28 = sshll.u32 %s3465_s27, 4  ;;  %s2620_s7 = sshll.u32 %s4904_s6, 4  ;;  %s2619_s28 = int_to_ptr.vmem [resolvable:$true] %s2618_s28  ;;  %s2621_s7 = int_to_ptr.hbm [resolvable:$true] %s2620_s7 }
  0x2f   :  { %371 = vmatpush.bf16.msra.mxu0 %v2702_v4  ;;  %v3524_v35 = vld [vmem:[#allocation9 + $0x1c0] sm:$0xff]  ;;  %v3529_v37 = vld [vmem:[#allocation9 + $0x1c8] sm:$0xff]  ;;  %v3531_v38 = vld [vmem:[#allocation9 + $0x1f0] sm:$0xff] }
  0x30   :  { %420 = vmatpush.bf16.msra.mxu1 %v2706_v5  ;;  %4993 = vst [vmem:[#allocation17_spill] sm:$0xff] %v3529_v37  ;;  %v3533_v39 = vld [vmem:[#allocation9 + $0x1a0] sm:$0xff]  ;;  %v3536_v40 = vld [vmem:[#allocation9 + $0x1d8] sm:$0xff]  ;;  %v3538_v41 = vld [vmem:[#allocation9 + $0x1a8] sm:$0xff] }
  0x31   :  { %469 = vmatpush.bf16.msra.mxu2 %v2710_v6  ;;  %518 = vmatpush.bf16.msra.mxu3 %v2714_v10  ;;  %v3542_v42 = vld [vmem:[#allocation9 + $0x1d0] sm:$0xff]  ;;  %v3544_v43 = vld [vmem:[#allocation9 + $0x180] sm:$0xff]  ;;  %v3548_v44 = vld [vmem:[#allocation9 + $0x1b8] sm:$0xff] }
  0x32   :  { %v3550_v45 = vld [vmem:[#allocation9 + $0x188] sm:$0xff]  ;;  %v3554_v46 = vld [vmem:[#allocation9 + $0x1b0] sm:$0xff]  ;;  %v3556_v47 = vld [vmem:[#allocation9 + $0x160] sm:$0xff] }
  0x33   :  { %372 = vmatpush.bf16.msra.mxu0 %v2686_v16  ;;  %v3560_v48 = vld [vmem:[#allocation9 + $0x198] sm:$0xff]  ;;  %v3562_v49 = vld [vmem:[#allocation9 + $0x168] sm:$0xff]  ;;  %v3566_v50 = vld [vmem:[#allocation9 + $0x190] sm:$0xff] }
  0x34   :  { %421 = vmatpush.bf16.msra.mxu1 %v2690_v17  ;;  %v3568_v51 = vld [vmem:[#allocation9 + $0x140] sm:$0xff]  ;;  %v3572_v52 = vld [vmem:[#allocation9 + $0x178] sm:$0xff]  ;;  %v3574_v53 = vld [vmem:[#allocation9 + $0x148] sm:$0xff] }
  0x35   :  { %470 = vmatpush.bf16.msra.mxu2 %v2694_v18  ;;  %519 = vmatpush.bf16.msra.mxu3 %v2698_v22  ;;  %v3578_v54 = vld [vmem:[#allocation9 + $0x170] sm:$0xff]  ;;  %v3582_v55 = vld [vmem:[#allocation9 + $0x158] sm:$0xff]  ;;  %v2844_v56 = vld [vmem:[#allocation3 + $0x8] sm:$0xff] }
  0x36   :  { %v3588_v57 = vld [vmem:[#allocation9 + $0x120] sm:$0xff]  ;;  %v3590_v58 = vld [vmem:[#allocation9 + $0x128] sm:$0xff]  ;;  %v3592_v59 = vld [vmem:[#allocation9 + $0x138] sm:$0xff] }
  0x37   :  { %373 = vmatpush.bf16.msra.mxu0 %v2670_v28  ;;  %v3596_v60 = vld [vmem:[#allocation9 + $0x150] sm:$0xff]  ;;  %v3598_v61 = vld [vmem:[#allocation9 + $0x100] sm:$0xff]  ;;  %v3600_v62 = vld [vmem:[#allocation9 + $0x108] sm:$0xff] }
  0x38   :  { %422 = vmatpush.bf16.msra.mxu1 %v2674_v29  ;;  %v3604_v63 = vld [vmem:[#allocation9 + $0x118] sm:$0xff]  ;;  %v3606_v0 = vld [vmem:[#allocation9 + $0x130] sm:$0xff]  ;;  %v3612_v2 = vld [vmem:[#allocation9 + $0xe0] sm:$0xff] }
  0x39   :  { %471 = vmatpush.bf16.msra.mxu2 %v2678_v30  ;;  %520 = vmatpush.bf16.msra.mxu3 %v2682_v31  ;;  %v2845_v1 = vld [vmem:[#allocation3 + $0x10] sm:$0xff]  ;;  %v3616_v4 = vld [vmem:[#allocation9 + $0xf8] sm:$0xff]  ;;  %v3622_v6 = vld [vmem:[#allocation9 + $0xc0] sm:$0xff] }
  0x3a   :  { %374 = vmatmul.bf16.vlgmr.msra.gmra.mxu0 %v2843_v32  ;;  %v3614_v3 = vld [vmem:[#allocation9 + $0xe8] sm:$0xff]  ;;  %v3620_v5 = vld [vmem:[#allocation9 + $0x110] sm:$0xff]  ;;  %v3628_v8 = vld [vmem:[#allocation9 + $0xd8] sm:$0xff] }
  0x3b   :  { %698 = vmatpush.msrb.mxu0 %v3519_v33  ;;  %423 = vmatmul.bf16.vlgmr.msra.gmra.mxu1 %v2843_v32  ;;  %v3624_v7 = vld [vmem:[#allocation9 + $0xc8] sm:$0xff]  ;;  %v3630_v9 = vld [vmem:[#allocation9 + $0xf0] sm:$0xff]  ;;  %v3636_v11 = vld [vmem:[#allocation9 + $0xa0] sm:$0xff] }
  0x3c   :  { %721 = vmatpush.msrb.mxu1 %v3521_v34  ;;  %472 = vmatmul.bf16.vlgmr.msra.gmra.mxu2 %v2843_v32  ;;  %v2846_v10 = vld [vmem:[#allocation3 + $0x18] sm:$0xff]  ;;  %v3638_v12 = vld [vmem:[#allocation9 + $0xa8] sm:$0xff]  ;;  %v3646_v15 = vld [vmem:[#allocation9 + $0x80] sm:$0xff] }
  0x3d   :  { %521 = vmatmul.bf16.vlgmr.msra.gmra.mxu3 %v2843_v32  ;;  %699 = vmatpush.msrb.mxu0 %v3524_v35  ;;  %v3640_v13 = vld [vmem:[#allocation9 + $0xb8] sm:$0xff]  ;;  %v3644_v14 = vld [vmem:[#allocation9 + $0xd0] sm:$0xff]  ;;  %v3648_v16 = vld [vmem:[#allocation9 + $0x88] sm:$0xff] }
  0x3e   :  { %767 = vmatpush.msrb.mxu3 %v3527_v36  ;;  %722 = vmatpush.msrb.mxu1 %v3529_v37  ;;  %v3652_v17 = vld [vmem:[#allocation9 + $0x98] sm:$0xff]  ;;  %v3654_v18 = vld [vmem:[#allocation9 + $0xb0] sm:$0xff]  ;;  %v3660_v20 = vld [vmem:[#allocation9 + $0x60] sm:$0xff] }
  0x3f   :  { %744 = vmatpush.msrb.mxu2 %v3531_v38  ;;  %700 = vmatpush.msrb.mxu0 %v3533_v39  ;;  %v2847_v19 = vld [vmem:[#allocation3 + $0x20] sm:$0xff]  ;;  %v3662_v21 = vld [vmem:[#allocation9 + $0x68] sm:$0xff]  ;;  %v3668_v23 = vld [vmem:[#allocation9 + $0x90] sm:$0xff] }
  0x40   :  { %768 = vmatpush.msrb.mxu3 %v3536_v40  ;;  %723 = vmatpush.msrb.mxu1 %v3538_v41  ;;  %v3664_v22 = vld [vmem:[#allocation9 + $0x78] sm:$0xff]  ;;  %v3670_v24 = vld [vmem:[#allocation9 + $0x40] sm:$0xff]  ;;  %v3672_v25 = vld [vmem:[#allocation9 + $0x48] sm:$0xff] }
  0x41   :  { %745 = vmatpush.msrb.mxu2 %v3542_v42  ;;  %701 = vmatpush.msrb.mxu0 %v3544_v43  ;;  %4994 = vst [vmem:[#allocation18_spill] sm:$0xff] %v3672_v25  ;;  %v3676_v26 = vld [vmem:[#allocation9 + $0x58] sm:$0xff]  ;;  %v3678_v27 = vld [vmem:[#allocation9 + $0x70] sm:$0xff]  ;;  %v2848_v28 = vld [vmem:[#allocation3 + $0x28] sm:$0xff] }
  0x42   :  { %769 = vmatpush.msrb.mxu3 %v3548_v44  ;;  %724 = vmatpush.msrb.mxu1 %v3550_v45  ;;  %4995 = vst [vmem:[#allocation19_spill] sm:$0xff] %v3676_v26  ;;  %v3684_v29 = vld [vmem:[#allocation9 + $0x20] sm:$0xff]  ;;  %v3686_v30 = vld [vmem:[#allocation9 + $0x28] sm:$0xff]  ;;  %v3688_v31 = vld [vmem:[#allocation9 + $0x38] sm:$0xff] }
  0x43   :  { %746 = vmatpush.msrb.mxu2 %v3554_v46  ;;  %702 = vmatpush.msrb.mxu0 %v3556_v47  ;;  %4996 = vst [vmem:[#allocation20_spill] sm:$0xff] %v3684_v29  ;;  %v3692_v32 = vld [vmem:[#allocation9 + $0x50] sm:$0xff] }
  0x44   :  { %770 = vmatpush.msrb.mxu3 %v3560_v48  ;;  %725 = vmatpush.msrb.mxu1 %v3562_v49  ;;  %4997 = vst [vmem:[#allocation21_spill] sm:$0xff] %v3686_v30 }
  0x45   :  { %747 = vmatpush.msrb.mxu2 %v3566_v50  ;;  %703 = vmatpush.msrb.mxu0 %v3568_v51  ;;  %4998 = vst [vmem:[#allocation22_spill] sm:$0xff] %v3688_v31 }
  0x46   :  { %771 = vmatpush.msrb.mxu3 %v3572_v52  ;;  %726 = vmatpush.msrb.mxu1 %v3574_v53 }
  0x47   :  { %748 = vmatpush.msrb.mxu2 %v3578_v54  ;;  %704 = vmatpush.msrb.mxu0 %v3588_v57 }
  0x48   :  { %772 = vmatpush.msrb.mxu3 %v3582_v55  ;;  %727 = vmatpush.msrb.mxu1 %v3590_v58 }
  0x49   :  { %749 = vmatpush.msrb.mxu2 %v3596_v60  ;;  %705 = vmatpush.msrb.mxu0 %v3598_v61 }
  0x4a   :  { %379 = vmatmul.bf16.gmra.mxu0 %v2844_v56  ;;  %773 = vmatpush.msrb.mxu3 %v3592_v59 }
  0x4b   :  { %428 = vmatmul.bf16.gmra.mxu1 %v2844_v56  ;;  %750 = vmatpush.msrb.mxu2 %v3606_v0 }
  0x4c   :  { %477 = vmatmul.bf16.gmra.mxu2 %v2844_v56  ;;  %728 = vmatpush.msrb.mxu1 %v3600_v62 }
  0x4d   :  { %526 = vmatmul.bf16.gmra.mxu3 %v2844_v56  ;;  %706 = vmatpush.msrb.mxu0 %v3612_v2  ;;  %v3694_v56 = vld [vmem:[#allocation9] sm:$0xff] }
  0x4e   :  { %774 = vmatpush.msrb.mxu3 %v3604_v63  ;;  %729 = vmatpush.msrb.mxu1 %v3614_v3  ;;  %4999 = vst [vmem:[#allocation23_spill] sm:$0xff] %v3694_v56 }
  0x4f   :  { %751 = vmatpush.msrb.mxu2 %v3620_v5  ;;  %707 = vmatpush.msrb.mxu0 %v3622_v6 }
  0x50   :  { %775 = vmatpush.msrb.mxu3 %v3616_v4  ;;  %730 = vmatpush.msrb.mxu1 %v3624_v7 }
  0x51   :  { %752 = vmatpush.msrb.mxu2 %v3630_v9  ;;  %708 = vmatpush.msrb.mxu0 %v3636_v11 }
  0x52   :  { %776 = vmatpush.msrb.mxu3 %v3628_v8  ;;  %731 = vmatpush.msrb.mxu1 %v3638_v12 }
  0x53   :  { %753 = vmatpush.msrb.mxu2 %v3644_v14  ;;  %709 = vmatpush.msrb.mxu0 %v3646_v15 }
  0x54   :  { %777 = vmatpush.msrb.mxu3 %v3640_v13  ;;  %732 = vmatpush.msrb.mxu1 %v3648_v16 }
  0x55   :  { %754 = vmatpush.msrb.mxu2 %v3654_v18  ;;  %710 = vmatpush.msrb.mxu0 %v3660_v20 }
  0x56   :  { %778 = vmatpush.msrb.mxu3 %v3652_v17  ;;  %733 = vmatpush.msrb.mxu1 %v3662_v21 }
  0x57   :  { %755 = vmatpush.msrb.mxu2 %v3668_v23  ;;  %711 = vmatpush.msrb.mxu0 %v3670_v24 }
  0x58   :  { %779 = vmatpush.msrb.mxu3 %v3664_v22  ;;  %734 = vmatpush.msrb.mxu1 %v3672_v25 }
  0x59   :  { %756 = vmatpush.msrb.mxu2 %v3678_v27  ;;  %712 = vmatpush.msrb.mxu0 %v3684_v29 }
  0x5a   :  { %384 = vmatmul.bf16.gmra.mxu0 %v2845_v1  ;;  %780 = vmatpush.msrb.mxu3 %v3676_v26 }
  0x5b   :  { %433 = vmatmul.bf16.gmra.mxu1 %v2845_v1  ;;  %757 = vmatpush.msrb.mxu2 %v3692_v32 }
  0x5c   :  { %482 = vmatmul.bf16.gmra.mxu2 %v2845_v1  ;;  %735 = vmatpush.msrb.mxu1 %v3686_v30 }
  0x5d   :  { %531 = vmatmul.bf16.gmra.mxu3 %v2845_v1  ;;  %v3696_v1 = vld [vmem:[#allocation9 + $0x8] sm:$0xff]  ;;  %713 = vmatpush.msrb.mxu0 %v3694_v56 }
  0x5e   :  { %5000 = vst [vmem:[#allocation24_spill] sm:$0xff] %v3696_v1  ;;  %781 = vmatpush.msrb.mxu3 %v3688_v31  ;;  %736 = vmatpush.msrb.mxu1 %v3696_v1 }
  0x5f   :  { %933 = vmatpush.msra.mxu0 %v3519_v33 }
  0x60   :  { %956 = vmatpush.msra.mxu1 %v3521_v34 }
  0x61   :  { %934 = vmatpush.msra.mxu0 %v3524_v35 }
  0x62   :  { %957 = vmatpush.msra.mxu1 %v3529_v37  ;;  %v3717_v37 = vld [vmem:[#allocation9 + $0x10] sm:$0xff] }
  0x63   :  { %935 = vmatpush.msra.mxu0 %v3533_v39  ;;  %5003 = vst [vmem:[#allocation27_spill] sm:$0xff] %v3717_v37 }
  0x64   :  { %958 = vmatpush.msra.mxu1 %v3538_v41 }
  0x65   :  { %936 = vmatpush.msra.mxu0 %v3544_v43 }
  0x66   :  { %959 = vmatpush.msra.mxu1 %v3550_v45 }
  0x67   :  { %937 = vmatpush.msra.mxu0 %v3556_v47 }
  0x68   :  { %960 = vmatpush.msra.mxu1 %v3562_v49 }
  0x69   :  { %938 = vmatpush.msra.mxu0 %v3568_v51 }
  0x6a   :  { %389 = vmatmul.bf16.gmra.mxu0 %v2846_v10  ;;  %961 = vmatpush.msra.mxu1 %v3574_v53 }
  0x6b   :  { %438 = vmatmul.bf16.gmra.mxu1 %v2846_v10  ;;  %939 = vmatpush.msra.mxu0 %v3588_v57 }
  0x6c   :  { %487 = vmatmul.bf16.gmra.mxu2 %v2846_v10  ;;  %962 = vmatpush.msra.mxu1 %v3590_v58 }
  0x6d   :  { %536 = vmatmul.bf16.gmra.mxu3 %v2846_v10  ;;  %v2849_v10 = vld [vmem:[#allocation3 + $0x30] sm:$0xff]  ;;  %940 = vmatpush.msra.mxu0 %v3598_v61 }
  0x6e   :  { %963 = vmatpush.msra.mxu1 %v3600_v62 }
  0x6f   :  { %941 = vmatpush.msra.mxu0 %v3612_v2 }
  0x70   :  { %964 = vmatpush.msra.mxu1 %v3614_v3 }
  0x71   :  { %942 = vmatpush.msra.mxu0 %v3622_v6 }
  0x72   :  { %965 = vmatpush.msra.mxu1 %v3624_v7 }
  0x73   :  { %943 = vmatpush.msra.mxu0 %v3636_v11 }
  0x74   :  { %966 = vmatpush.msra.mxu1 %v3638_v12 }
  0x75   :  { %944 = vmatpush.msra.mxu0 %v3646_v15 }
  0x76   :  { %967 = vmatpush.msra.mxu1 %v3648_v16 }
  0x77   :  { %945 = vmatpush.msra.mxu0 %v3660_v20 }
  0x78   :  { %968 = vmatpush.msra.mxu1 %v3662_v21 }
  0x79   :  { %946 = vmatpush.msra.mxu0 %v3670_v24 }
  0x7a   :  { %394 = vmatmul.bf16.gmra.mxu0 %v2847_v19  ;;  %969 = vmatpush.msra.mxu1 %v3672_v25 }
  0x7b   :  { %443 = vmatmul.bf16.gmra.mxu1 %v2847_v19  ;;  %947 = vmatpush.msra.mxu0 %v3684_v29 }
  0x7c   :  { %492 = vmatmul.bf16.gmra.mxu2 %v2847_v19  ;;  %970 = vmatpush.msra.mxu1 %v3686_v30  ;;  %v3464_v30 = vmov 0.0  }
  0x7d   :  { %541 = vmatmul.bf16.gmra.mxu3 %v2847_v19  ;;  %v3710_v19 = vld [vmem:[#allocation9 + $0x30] sm:$0xff]  ;;  %948 = vmatpush.msra.mxu0 %v3694_v56 }
  0x7e   :  { %5001 = vst [vmem:[#allocation25_spill] sm:$0xff] %v3710_v19  ;;  %758 = vmatpush.msrb.mxu2 %v3710_v19  ;;  %971 = vmatpush.msra.mxu1 %v3696_v1 }
  0x80   :  { %759 = vmatpush.msrb.mxu2 %v3717_v37 }
  0x82   :  { %979 = vmatpush.msra.mxu2 %v3531_v38 }
  0x84   :  { %980 = vmatpush.msra.mxu2 %v3542_v42 }
  0x86   :  { %981 = vmatpush.msra.mxu2 %v3554_v46 }
  0x88   :  { %982 = vmatpush.msra.mxu2 %v3566_v50 }
  0x8a   :  { %399 = vmatmul.bf16.gmra.mxu0 %v2848_v28  ;;  %983 = vmatpush.msra.mxu2 %v3578_v54 }
  0x8b   :  { %448 = vmatmul.bf16.gmra.mxu1 %v2848_v28 }
  0x8c   :  { %497 = vmatmul.bf16.gmra.mxu2 %v2848_v28 }
  0x8d   :  { %546 = vmatmul.bf16.gmra.mxu3 %v2848_v28  ;;  %v3715_v28 = vld [vmem:[#allocation9 + $0x18] sm:$0xff]  ;;  %984 = vmatpush.msra.mxu2 %v3596_v60 }
  0x8e   :  { %5002 = vst [vmem:[#allocation26_spill] sm:$0xff] %v3715_v28  ;;  %782 = vmatpush.msrb.mxu3 %v3715_v28 }
  0x8f   :  { %985 = vmatpush.msra.mxu2 %v3606_v0 }
  0x90   :  { %1002 = vmatpush.msra.mxu3 %v3527_v36 }
  0x91   :  { %986 = vmatpush.msra.mxu2 %v3620_v5 }
  0x92   :  { %1003 = vmatpush.msra.mxu3 %v3536_v40 }
  0x93   :  { %987 = vmatpush.msra.mxu2 %v3630_v9 }
  0x94   :  { %1004 = vmatpush.msra.mxu3 %v3548_v44 }
  0x95   :  { %988 = vmatpush.msra.mxu2 %v3644_v14 }
  0x96   :  { %1005 = vmatpush.msra.mxu3 %v3560_v48 }
  0x97   :  { %989 = vmatpush.msra.mxu2 %v3654_v18 }
  0x98   :  { %1006 = vmatpush.msra.mxu3 %v3572_v52 }
  0x99   :  { %990 = vmatpush.msra.mxu2 %v3668_v23 }
  0x9a   :  { %404 = vmatmul.bf16.gmra.mxu0 %v2849_v10  ;;  %1007 = vmatpush.msra.mxu3 %v3582_v55 }
  0x9b   :  { %453 = vmatmul.bf16.gmra.mxu1 %v2849_v10  ;;  %991 = vmatpush.msra.mxu2 %v3678_v27 }
  0x9c   :  { %502 = vmatmul.bf16.gmra.mxu2 %v2849_v10  ;;  %1008 = vmatpush.msra.mxu3 %v3592_v59 }
  0x9d   :  { %551 = vmatmul.bf16.gmra.mxu3 %v2849_v10  ;;  %v2850_v10 = vld [vmem:[#allocation3 + $0x38] sm:$0xff]  ;;  %992 = vmatpush.msra.mxu2 %v3692_v32 }
  0x9e   :  { %1009 = vmatpush.msra.mxu3 %v3604_v63 }
  0x9f   :  { %993 = vmatpush.msra.mxu2 %v3710_v19 }
  0xa0   :  { %1010 = vmatpush.msra.mxu3 %v3616_v4 }
  0xa1   :  { %994 = vmatpush.msra.mxu2 %v3717_v37  ;;  %v5006_v37 = vld [vmem:[#allocation17_spill] sm:$0xff] }
  0xa2   :  { %1011 = vmatpush.msra.mxu3 %v3628_v8 }
  0xa4   :  { %1012 = vmatpush.msra.mxu3 %v3640_v13 }
  0xa6   :  { %1013 = vmatpush.msra.mxu3 %v3652_v17 }
  0xa8   :  { %1014 = vmatpush.msra.mxu3 %v3664_v22 }
  0xaa   :  { %409 = vmatmul.bf16.gmra.mxu0 %v2850_v10  ;;  %1015 = vmatpush.msra.mxu3 %v3676_v26 }
  0xab   :  { %458 = vmatmul.bf16.gmra.mxu1 %v2850_v10 }
  0xac   :  { %507 = vmatmul.bf16.gmra.mxu2 %v2850_v10  ;;  %1016 = vmatpush.msra.mxu3 %v3688_v31 }
  0xad   :  { %556 = vmatmul.bf16.gmra.mxu3 %v2850_v10 }
  0xae   :  { %1017 = vmatpush.msra.mxu3 %v3715_v28 }
  0xb7   :  { %v3768_v10 = vpop.f32.mrf.mxu0 }
  0xb8   :  { %5004 = vst [vmem:[#allocation28_spill] sm:$0xff] %v3768_v10  ;;  %v3771_v25 = vpop.f32.mrf.mxu1 }
  0xb9   :  { %5005 = vst [vmem:[#allocation29_spill] sm:$0xff] %v3771_v25 }
  0xba   :  { %714 = vmatmul.f32.vlgmr.msrb.gmra.mxu0 %v3464_v30 }
  0xbb   :  { %737 = vmatmul.f32.vlgmr.msrb.gmra.mxu1 %v3464_v30  ;;  %1168 = vmatpush.msrb.mxu0 %v3519_v33 }
  0xbc   :  { %760 = vmatmul.f32.vlgmr.msrb.gmra.mxu2 %v3464_v30  ;;  %1191 = vmatpush.msrb.mxu1 %v3521_v34 }
  0xbd   :  { %783 = vmatmul.f32.vlgmr.msrb.gmra.mxu3 %v3464_v30  ;;  %1214 = vmatpush.msrb.mxu2 %v3531_v38 }
  0xbe   :  { %1169 = vmatpush.msrb.mxu0 %v3524_v35  ;;  %1237 = vmatpush.msrb.mxu3 %v3527_v36 }
  0xbf   :  { %v3779_v10 = vpop.f32.mrf.mxu2  ;;  %v3785_v1 = vpop.f32.mrf.mxu0  ;;  %1192 = vmatpush.msrb.mxu1 %v5006_v37  ;;  %1215 = vmatpush.msrb.mxu2 %v3542_v42 }
  0xc0   :  { %v3783_v25 = vpop.f32.mrf.mxu3  ;;  %v3789_v56 = vpop.f32.mrf.mxu1  ;;  %1170 = vmatpush.msrb.mxu0 %v3533_v39  ;;  %1238 = vmatpush.msrb.mxu3 %v3536_v40 }
  0xc1   :  { %1193 = vmatpush.msrb.mxu1 %v3538_v41  ;;  %1216 = vmatpush.msrb.mxu2 %v3554_v46  ;;  %v5018_v46 = vld [vmem:[#allocation21_spill] sm:$0xff] }
  0xc2   :  { %717 = vmatmul.f32.gmra.mxu0 %v3464_v30  ;;  %1239 = vmatpush.msrb.mxu3 %v3548_v44 }
  0xc3   :  { %740 = vmatmul.f32.gmra.mxu1 %v3464_v30  ;;  %1171 = vmatpush.msrb.mxu0 %v3544_v43 }
  0xc4   :  { %763 = vmatmul.f32.gmra.mxu2 %v3464_v30  ;;  %1194 = vmatpush.msrb.mxu1 %v3550_v45  ;;  %v5017_v45 = vld [vmem:[#allocation18_spill] sm:$0xff] }
  0xc5   :  { %786 = vmatmul.f32.gmra.mxu3 %v3464_v30  ;;  %1217 = vmatpush.msrb.mxu2 %v3566_v50 }
  0xc6   :  { %1240 = vmatpush.msrb.mxu3 %v3560_v48  ;;  %1172 = vmatpush.msrb.mxu0 %v3556_v47  ;;  %v5020_v48 = vld [vmem:[#allocation23_spill] sm:$0xff] }
  0xc7   :  { %v3799_v33 = vpop.f32.mrf.mxu2  ;;  %v3805_v35 = vpop.f32.mrf.mxu0  ;;  %1195 = vmatpush.msrb.mxu1 %v3562_v49  ;;  %1218 = vmatpush.msrb.mxu2 %v3578_v54  ;;  %v5021_v49 = vld [vmem:[#allocation24_spill] sm:$0xff] }
  0xc8   :  { %v3803_v34 = vpop.f32.mrf.mxu3  ;;  %5007 = vst [vmem:[#allocation17_spill] sm:$0xff] %v3805_v35  ;;  %v3809_v36 = vpop.f32.mrf.mxu1  ;;  %1241 = vmatpush.msrb.mxu3 %v3572_v52  ;;  %1173 = vmatpush.msrb.mxu0 %v3568_v51 }
  0xc9   :  { %5008 = vst [vmem:[#allocation30_spill] sm:$0xff] %v3809_v36  ;;  %1196 = vmatpush.msrb.mxu1 %v3574_v53  ;;  %1219 = vmatpush.msrb.mxu2 %v3596_v60  ;;  %v5024_v53 = vld [vmem:[#allocation27_spill] sm:$0xff] }
  0xca   :  { %1242 = vmatpush.msrb.mxu3 %v3582_v55  ;;  %1174 = vmatpush.msrb.mxu0 %v3588_v57 }
  0xcb   :  { %1197 = vmatpush.msrb.mxu1 %v3590_v58  ;;  %1220 = vmatpush.msrb.mxu2 %v3606_v0 }
  0xcc   :  { %1243 = vmatpush.msrb.mxu3 %v3592_v59  ;;  %1175 = vmatpush.msrb.mxu0 %v3598_v61 }
  0xcd   :  { %1198 = vmatpush.msrb.mxu1 %v3600_v62  ;;  %1221 = vmatpush.msrb.mxu2 %v3620_v5 }
  0xce   :  { %1244 = vmatpush.msrb.mxu3 %v3604_v63  ;;  %1176 = vmatpush.msrb.mxu0 %v3612_v2 }
  0xcf   :  { %v3823_v37 = vpop.f32.mrf.mxu2  ;;  %v3829_v39 = vpop.f32.mrf.mxu0  ;;  %1199 = vmatpush.msrb.mxu1 %v3614_v3  ;;  %1222 = vmatpush.msrb.mxu2 %v3630_v9 }
  0xd0   :  { %5009 = vst [vmem:[#allocation31_spill] sm:$0xff] %v3823_v37  ;;  %v3827_v38 = vpop.f32.mrf.mxu3  ;;  %v3833_v40 = vpop.f32.mrf.mxu1  ;;  %1245 = vmatpush.msrb.mxu3 %v3616_v4  ;;  %1177 = vmatpush.msrb.mxu0 %v3622_v6 }
  0xd1   :  { %5010 = vst [vmem:[#allocation32_spill] sm:$0xff] %v3827_v38  ;;  %1200 = vmatpush.msrb.mxu1 %v3624_v7  ;;  %1223 = vmatpush.msrb.mxu2 %v3644_v14 }
  0xd2   :  { %5011 = vst [vmem:[#allocation33_spill] sm:$0xff] %v3829_v39  ;;  %1246 = vmatpush.msrb.mxu3 %v3628_v8  ;;  %1178 = vmatpush.msrb.mxu0 %v3636_v11 }
  0xd3   :  { %5012 = vst [vmem:[#allocation34_spill] sm:$0xff] %v3833_v40  ;;  %1201 = vmatpush.msrb.mxu1 %v3638_v12  ;;  %1224 = vmatpush.msrb.mxu2 %v3654_v18 }
  0xd4   :  { %1247 = vmatpush.msrb.mxu3 %v3640_v13  ;;  %1179 = vmatpush.msrb.mxu0 %v3646_v15 }
  0xd5   :  { %1202 = vmatpush.msrb.mxu1 %v3648_v16  ;;  %1225 = vmatpush.msrb.mxu2 %v3668_v23 }
  0xd6   :  { %1248 = vmatpush.msrb.mxu3 %v3652_v17  ;;  %1180 = vmatpush.msrb.mxu0 %v3660_v20 }
  0xd7   :  { %v3847_v41 = vpop.f32.mrf.mxu2  ;;  %v3853_v43 = vpop.f32.mrf.mxu0  ;;  %1203 = vmatpush.msrb.mxu1 %v3662_v21  ;;  %1226 = vmatpush.msrb.mxu2 %v3678_v27 }
  0xd8   :  { %5013 = vst [vmem:[#allocation35_spill] sm:$0xff] %v3847_v41  ;;  %v3851_v42 = vpop.f32.mrf.mxu3  ;;  %v3857_v44 = vpop.f32.mrf.mxu1  ;;  %1249 = vmatpush.msrb.mxu3 %v3664_v22  ;;  %1181 = vmatpush.msrb.mxu0 %v3670_v24 }
  0xd9   :  { %5014 = vst [vmem:[#allocation36_spill] sm:$0xff] %v3851_v42  ;;  %1204 = vmatpush.msrb.mxu1 %v5017_v45  ;;  %1227 = vmatpush.msrb.mxu2 %v3692_v32 }
  0xda   :  { %5015 = vst [vmem:[#allocation37_spill] sm:$0xff] %v3853_v43  ;;  %1250 = vmatpush.msrb.mxu3 %v3676_v26  ;;  %1182 = vmatpush.msrb.mxu0 %v3684_v29 }
  0xdb   :  { %5016 = vst [vmem:[#allocation38_spill] sm:$0xff] %v3857_v44  ;;  %1205 = vmatpush.msrb.mxu1 %v5018_v46  ;;  %1228 = vmatpush.msrb.mxu2 %v3710_v19 }
  0xdc   :  { %1251 = vmatpush.msrb.mxu3 %v3688_v31  ;;  %1183 = vmatpush.msrb.mxu0 %v5020_v48 }
  0xdd   :  { %1206 = vmatpush.msrb.mxu1 %v5021_v49  ;;  %1229 = vmatpush.msrb.mxu2 %v5024_v53 }
  0xde   :  { %1252 = vmatpush.msrb.mxu3 %v3715_v28 }
  0xdf   :  { %v3871_v47 = vpop.f32.mrf.mxu2  ;;  %v3877_v52 = vpop.f32.mrf.mxu0 }
  0xe0   :  { %5019 = vst [vmem:[#allocation18_spill] sm:$0xff] %v3871_v47  ;;  %v3875_v51 = vpop.f32.mrf.mxu3  ;;  %v3881_v55 = vpop.f32.mrf.mxu1 }
  0xe1   :  { %5022 = vst [vmem:[#allocation39_spill] sm:$0xff] %v3875_v51 }
  0xe2   :  { %5023 = vst [vmem:[#allocation40_spill] sm:$0xff] %v3877_v52 }
  0xe3   :  { %5025 = vst [vmem:[#allocation41_spill] sm:$0xff] %v3881_v55 }
  0xe7   :  { %v3883_v30 = vpop.f32.mrf.mxu2  ;;  %v3887_v43 = vpop.f32.mrf.mxu0 }
  0xe8   :  { %5026 = vst [vmem:[#allocation42_spill] sm:$0xff] %v3883_v30  ;;  %v3885_v44 = vpop.f32.mrf.mxu3  ;;  %v3889_v47 = vpop.f32.mrf.mxu1 }
  0xe9   :  { %5027 = vst [vmem:[#allocation43_spill] sm:$0xff] %v3885_v44 }
  0xea   :  { %5028 = vst [vmem:[#allocation44_spill] sm:$0xff] %v3887_v43 }
  0xeb   :  { %5029 = vst [vmem:[#allocation45_spill] sm:$0xff] %v3889_v47 }
  0xef   :  { %v3891_v41 = vpop.f32.mrf.mxu2  ;;  %v3895_v51 = vpop.f32.mrf.mxu0 }
  0xf0   :  { %5030 = vst [vmem:[#allocation46_spill] sm:$0xff] %v3891_v41  ;;  %v3893_v37 = vpop.f32.mrf.mxu3  ;;  %v3897_v52 = vpop.f32.mrf.mxu1 }
  0xf1   :  { %5031 = vst [vmem:[#allocation47_spill] sm:$0xff] %v3893_v37 }
  0xf2   :  { %5032 = vst [vmem:[#allocation48_spill] sm:$0xff] %v3895_v51 }
  0xf3   :  { %5033 = vst [vmem:[#allocation49_spill] sm:$0xff] %v3897_v52 }
  0xf7   :  { %v3899_v42 = vpop.f32.mrf.mxu2  ;;  %v3903_v55 = vpop.f32.mrf.mxu0 }
  0xf8   :  { %5034 = vst [vmem:[#allocation50_spill] sm:$0xff] %v3899_v42  ;;  %v3901_v40 = vpop.f32.mrf.mxu3  ;;  %v3905_v30 = vpop.f32.mrf.mxu1 }
  0xf9   :  { %5035 = vst [vmem:[#allocation51_spill] sm:$0xff] %v3901_v40 }
  0xfa   :  { %5036 = vst [vmem:[#allocation52_spill] sm:$0xff] %v3903_v55 }
  0xfb   :  { %5037 = vst [vmem:[#allocation53_spill] sm:$0xff] %v3905_v30 }
  0xff   :  { %v3907_v44 = vpop.f32.mrf.mxu2  ;;  %v3911_v47 = vpop.f32.mrf.mxu0 }
 0x100   :  { %5038 = vst [vmem:[#allocation54_spill] sm:$0xff] %v3907_v44  ;;  %v3909_v43 = vpop.f32.mrf.mxu3  ;;  %v3913_v41 = vpop.f32.mrf.mxu1 }
 0x101   :  { %5039 = vst [vmem:[#allocation55_spill] sm:$0xff] %v3909_v43 }
 0x102   :  { %5040 = vst [vmem:[#allocation56_spill] sm:$0xff] %v3911_v47 }
 0x103   :  { %5041 = vst [vmem:[#allocation57_spill] sm:$0xff] %v3913_v41 }
 0x107   :  { %v3915_v37 = vpop.f32.mrf.mxu2  ;;  %v3919_v52 = vpop.f32.mrf.mxu0 }
 0x108   :  { %5042 = vst [vmem:[#allocation58_spill] sm:$0xff] %v3915_v37  ;;  %v3917_v51 = vpop.f32.mrf.mxu3  ;;  %v3921_v42 = vpop.f32.mrf.mxu1 }
 0x109   :  { %5043 = vst [vmem:[#allocation59_spill] sm:$0xff] %v3917_v51 }
 0x10a   :  { %5044 = vst [vmem:[#allocation60_spill] sm:$0xff] %v3919_v52 }
 0x10b   :  { %5045 = vst [vmem:[#allocation61_spill] sm:$0xff] %v3921_v42 }
 0x10f   :  { %v3923_v40 = vpop.f32.mrf.mxu2  ;;  %v3927_v30 = vpop.f32.mrf.mxu0 }
 0x110   :  { %5046 = vst [vmem:[#allocation62_spill] sm:$0xff] %v3923_v40  ;;  %v3925_v55 = vpop.f32.mrf.mxu3  ;;  %v3929_v44 = vpop.f32.mrf.mxu1 }
 0x111   :  { %5047 = vst [vmem:[#allocation63_spill] sm:$0xff] %v3925_v55 }
 0x112   :  { %5048 = vst [vmem:[#allocation64_spill] sm:$0xff] %v3927_v30 }
 0x113   :  { %5049 = vst [vmem:[#allocation65_spill] sm:$0xff] %v3929_v44 }
 0x117   :  { %v3931_v43 = vpop.f32.mrf.mxu2  ;;  %v3935_v41 = vpop.f32.mrf.mxu0 }
 0x118   :  { %5050 = vst [vmem:[#allocation66_spill] sm:$0xff] %v3931_v43  ;;  %v3933_v47 = vpop.f32.mrf.mxu3  ;;  %v3937_v37 = vpop.f32.mrf.mxu1 }
 0x119   :  { %5051 = vst [vmem:[#allocation67_spill] sm:$0xff] %v3933_v47  ;;  %v148_v47 = vld [vmem:[#allocation8] sm:$0xf] }
 0x11a   :  { %5052 = vst [vmem:[#allocation68_spill] sm:$0xff] %v3935_v41  ;;  %v3973_v35 = vperm.slane %v148_v47, 3  ;;  %v3983_v48 = vperm.slane %v148_v47, 2 }
 0x11b   :  { %5053 = vst [vmem:[#allocation69_spill] sm:$0xff] %v3937_v37 }
 0x11c   :  { %5073 = vst [vmem:[#allocation85_spill] sm:$0xff] %v3983_v48 }
 0x11f   :  { %v3939_v51 = vpop.f32.mrf.mxu2  ;;  %v3943_v42 = vpop.f32.mrf.mxu0 }
 0x120   :  { %5054 = vst [vmem:[#allocation70_spill] sm:$0xff] %v3939_v51  ;;  %v3941_v52 = vpop.f32.mrf.mxu3  ;;  %v3945_v40 = vpop.f32.mrf.mxu1 }
 0x121   :  { %5055 = vst [vmem:[#allocation71_spill] sm:$0xff] %v3941_v52  ;;  %v3961_v52 = vperm.slane %v148_v47, 0 }
 0x122   :  { %5056 = vst [vmem:[#allocation72_spill] sm:$0xff] %v3943_v42 }
 0x123   :  { %5057 = vst [vmem:[#allocation73_spill] sm:$0xff] %v3945_v40  ;;  %v3965_v40 = vperm.slane %v148_v47, 1 }
 0x124   :  { %5065 = vst [vmem:[#allocation81_spill] sm:$0xff] %v3961_v52 }
 0x125   :  { %5067 = vst [vmem:[#allocation83_spill] sm:$0xff] %v3965_v40 }
 0x127   :  { %v3949_v30 = vpop.f32.mrf.mxu0  ;;  %v3951_v44 = vpop.f32.mrf.mxu2 }
 0x128   :  { %v3947_v55 = vpop.f32.mrf.mxu3  ;;  %5059 = vst [vmem:[#allocation75_spill] sm:$0xff] %v3949_v30  ;;  %v3953_v43 = vpop.f32.mrf.mxu1 }
 0x129   :  { %5058 = vst [vmem:[#allocation74_spill] sm:$0xff] %v3947_v55  ;;  %v5068_v55 = vld [vmem:[#allocation28_spill] sm:$0xff] }
 0x12a   :  { %5060 = vst [vmem:[#allocation76_spill] sm:$0xff] %v3951_v44  ;;  %v376_v30 = vadd.f32 %v5068_v55, %v3961_v52  ;;  %v5069_v44 = vld [vmem:[#allocation29_spill] sm:$0xff]  ;;  %v523_v55 = vadd.f32 %v3783_v25, %v3973_v35 }
 0x12b   :  { %5061 = vst [vmem:[#allocation77_spill] sm:$0xff] %v3953_v43  ;;  %v425_v39 = vadd.f32 %v5069_v44, %v3965_v40  ;;  %v378_v44 = vadd.f32 %v3785_v1, %v3961_v52 }
 0x12c   :  { %5071 = vst [vmem:[#allocation29_spill] sm:$0xff] %v3973_v35 }
 0x12f   :  { %v3957_v37 = vpop.f32.mrf.mxu0  ;;  %v3963_v42 = vpop.f32.mrf.mxu2 }
 0x130   :  { %v3955_v41 = vpop.f32.mrf.mxu3  ;;  %5063 = vst [vmem:[#allocation79_spill] sm:$0xff] %v3957_v37  ;;  %v3959_v51 = vpop.f32.mrf.mxu1 }
 0x131   :  { %5062 = vst [vmem:[#allocation78_spill] sm:$0xff] %v3955_v41 }
 0x132   :  { %5064 = vst [vmem:[#allocation80_spill] sm:$0xff] %v3959_v51 }
 0x133   :  { %5066 = vst [vmem:[#allocation82_spill] sm:$0xff] %v3963_v42 }
 0x137   :  { %v715_v38 = vpop.f32.mrf.mxu0  ;;  %v3975_v53 = vpop.f32.mrf.mxu2 }
 0x138   :  { %v3971_v43 = vpop.f32.mrf.mxu3  ;;  %v790_v41 = vadd.f32 %v715_v38, %v376_v30  ;;  %v738_v36 = vpop.f32.mrf.mxu1  ;;  %5072 = vst [vmem:[#allocation84_spill] sm:$0xff] %v3975_v53 }
 0x139   :  { %5070 = vst [vmem:[#allocation28_spill] sm:$0xff] %v3971_v43  ;;  %v791_v37 = vadd.f32 %v738_v36, %v425_v39  ;;  %v427_v43 = vadd.f32 %v3789_v56, %v3965_v40  ;;  %v525_v56 = vadd.f32 %v3803_v34, %v3973_v35 }
 0x13a   :  { %v2795_v51 = vmul.f32 -1.442695, %v790_v41 }
 0x13b   :  { %v2797_v28 = vmul.f32 -1.442695, %v791_v37 }
 0x13c   :  { %2915 = vpow2.f32 %v2795_v51 }
 0x13d   :  { %2917 = vpow2.f32 %v2797_v28 }
 0x13f   :  { %v718_v30 = vpop.f32.mrf.mxu0  ;;  %v761_v1 = vpop.f32.mrf.mxu2 }
 0x140   :  { %v784_v38 = vpop.f32.mrf.mxu3  ;;  %v794_v39 = vadd.f32 %v718_v30, %v378_v44  ;;  %v741_v42 = vpop.f32.mrf.mxu1 }
 0x141   :  { %v793_v36 = vadd.f32 %v784_v38, %v523_v55  ;;  %v795_v41 = vadd.f32 %v741_v42, %v427_v43  ;;  %v474_v42 = vadd.f32 %v3779_v10, %v3983_v48 }
 0x142   :  { %v2916_v37 = vpop.eup %2915  ;;  %v2796_v28 = vmul.f32 -1.442695, %v794_v39 }
 0x143   :  { %v2799_v49 = vmul.f32 -1.442695, %v793_v36  ;;  %v2918_v53 = vpop.eup %2917  ;;  %v804_v51 = vadd.f32 1.0, %v2916_v37  ;;  %v2798_v31 = vmul.f32 -1.442695, %v795_v41  ;;  %v792_v38 = vadd.f32 %v761_v1, %v474_v42 }
 0x144   :  { %v842_v25 = vadd.f32 1.0, %v2918_v53  ;;  %v476_v37 = vadd.f32 %v3799_v33, %v3983_v48 }
 0x145   :  { %2919 = vpow2.f32 %v2799_v49  ;;  %v817_v1 = vand.u32 2147483648, %v804_v51  ;;  %vm811_vm3 = vweird.f32 %v804_v51 }
 0x146   :  { %2921 = vrcp.f32 %v804_v51  ;;  %v855_v42 = vand.u32 2147483648, %v842_v25  ;;  %v853_v35 = vand.u32 2147483647, %v842_v25  ;;  %vm849_vm2 = vweird.f32 %v842_v25 }
 0x147   :  { %2923 = vrcp.f32 %v842_v25 }
 0x148   :  { %2925 = vpow2.f32 %v2796_v28  ;;  %v787_v55 = vpop.f32.mrf.mxu3  ;;  %v856_v40 = vor.u32 1.1754944e-38, %v855_v42  ;;  %vm854_vm7 = vcmp.eq.f32.partialorder %v853_v35, 8.507059e+37 }
 0x149   :  { %2927 = vpow2.f32 %v2798_v31  ;;  %v797_v43 = vadd.f32 %v787_v55, %v525_v56  ;;  %v815_v56 = vand.u32 2147483647, %v804_v51 }
 0x14b   :  { %v2920_v44 = vpop.eup %2919  ;;  %v2800_v47 = vmul.f32 -1.442695, %v797_v43  ;;  %vm816_vm5 = vcmp.eq.f32.partialorder %v815_v56, 8.507059e+37 }
 0x14c   :  { %v2922_v30 = vpop.eup %2921  ;;  %v3989_v53 = vadd.f32 1.0, %v2920_v44  ;;  %v764_v44 = vpop.f32.mrf.mxu2 }
 0x14d   :  { %v2924_v49 = vpop.eup %2923  ;;  %v807_v36 = vmul.f32 %v2922_v30, %v804_v51  ;;  %2929 = vpow2.f32 %v2800_v47  ;;  %vm812_vm0 = vweird.f32 %v2922_v30 }
 0x14e   :  { %v2926_v39 = vpop.eup %2925  ;;  %v845_v34 = vmul.f32 %v2924_v49, %v842_v25  ;;  %2931 = vrcp.f32 %v3989_v53  ;;  %vm850_vm1 = vweird.f32 %v2924_v49  ;;  %vm813_vm4 = vmor %vm811_vm3, %vm812_vm0  ;;  %vm889_vm8 = vweird.f32 %v3989_v53 }
 0x14f   :  { %v2928_v41 = vpop.eup %2927  ;;  %v808_v10 = vsub.f32 1.0, %v807_v36  ;;  %2933 = vtanh.f32 %v792_v38  ;;  %v3994_v31 = vadd.f32 1.0, %v2926_v39  ;;  %v818_v39 = vor.u32 1.1754944e-38, %v817_v1  ;;  %vm851_vm6 = vmor %vm849_vm2, %vm850_vm1 }
 0x150   :  { %v846_v28 = vsub.f32 1.0, %v845_v34  ;;  %v3996_v55 = vadd.f32 1.0, %v2928_v41  ;;  %v796_v41 = vadd.f32 %v764_v44, %v476_v37 }
 0x151   :  { %v809_v43 = vmul.f32 %v2922_v30, %v808_v10  ;;  %2935 = vrcp.f32 %v3994_v31  ;;  %vm826_vm13 = vweird.f32 %v3994_v31 }
 0x152   :  { %v847_v47 = vmul.f32 %v2924_v49, %v846_v28  ;;  %2937 = vrcp.f32 %v3996_v55  ;;  %vm864_vm12 = vweird.f32 %v3996_v55 }
 0x153   :  { %v2930_v33 = vpop.eup %2929  ;;  %v810_v38 = vadd.f32 %v2922_v30, %v809_v43 }
 0x154   :  { %v4000_v36 = vpop.eup %2931  ;;  %v848_v34 = vadd.f32 %v2924_v49, %v847_v47  ;;  %v4002_v10 = vadd.f32 1.0, %v2930_v33 }
 0x155   :  { %v2934_v48 = vpop.eup %2933  ;;  %v814_v52 = vsel %vm813_vm4, %v2922_v30, %v810_v38  ;;  %v885_v28 = vmul.f32 %v4000_v36, %v3989_v53  ;;  %vm890_vm9 = vweird.f32 %v4000_v36 }
 0x156   :  { %v819_v25 = vsel %vm816_vm5, %v818_v39, %v814_v52  ;;  %v852_v43 = vsel %vm851_vm6, %v2924_v49, %v848_v34  ;;  %2939 = vrcp.f32 %v4002_v10  ;;  %v893_v52 = vand.u32 2147483647, %v3989_v53  ;;  %vm4031_vm14 = vmor %vm889_vm8, %vm890_vm9 }
 0x157   :  { %v2936_v51 = vpop.eup %2935  ;;  %v857_v1 = vsel %vm854_vm7, %v856_v40, %v852_v43  ;;  %v916_v47 = vmul.f32 %v2934_v48, %v819_v25  ;;  %v886_v37 = vsub.f32 1.0, %v885_v28  ;;  %2941 = vtanh.f32 %v796_v41 }
 0x158   :  { %v2938_v44 = vpop.eup %2937  ;;  %v914_v33 = vmul.f32 0.0, %v857_v1  ;;  %v822_v42 = vmul.f32 %v2936_v51, %v3994_v31  ;;  %v830_v40 = vand.u32 2147483647, %v3994_v31  ;;  %v895_v48 = vand.u32 2147483648, %v3989_v53 }
 0x159   :  { %v860_v30 = vmul.f32 %v2938_v44, %v3996_v55  ;;  %v887_v56 = vmul.f32 %v4000_v36, %v886_v37  ;;  %v832_v39 = vand.u32 2147483648, %v3994_v31  ;;  %v870_v28 = vand.u32 2147483648, %v3996_v55 }
 0x15a   :  { %v4013_v35 = vadd.f32 %v916_v47, %v914_v33  ;;  %v823_v49 = vsub.f32 1.0, %v822_v42  ;;  %vm827_vm10 = vweird.f32 %v2936_v51  ;;  %vm865_vm11 = vweird.f32 %v2938_v44 }
 0x15b   :  { %v861_v38 = vsub.f32 1.0, %v860_v30  ;;  %v888_v34 = vadd.f32 %v4000_v36, %v887_v56  ;;  %v868_v1 = vand.u32 2147483647, %v3996_v55  ;;  %vm828_vm15 = vmor %vm826_vm13, %vm827_vm10  ;;  %v833_v30 = vor.u32 1.1754944e-38, %v832_v39 }
 0x15c   :  { %5074 = vst [vmem:[#allocation86_spill] sm:$0xff] %v4013_v35  ;;  %v4020_v41 = vpop.eup %2939  ;;  %2943 = vtanh.f32 %v4013_v35  ;;  %v824_v25 = vmul.f32 %v2936_v51, %v823_v49  ;;  %v871_v35 = vor.u32 1.1754944e-38, %v870_v28  ;;  %vm831_vm0 = vcmp.eq.f32.partialorder %v830_v40, 8.507059e+37  ;;  %vm866_vm1 = vmor %vm864_vm12, %vm865_vm11  ;;  %v4067_v40 = vld [vmem:[#allocation9 + $0x1c8] sm:$0xff] }
 0x15d   :  { %v862_v43 = vmul.f32 %v2938_v44, %v861_v38  ;;  %v900_v47 = vmul.f32 %v4020_v41, %v4002_v10  ;;  %v2942_v37 = vpop.eup %2941  ;;  %v892_v38 = vsel %vm4031_vm14, %v4000_v36, %v888_v34  ;;  %v896_v31 = vor.u32 1.1754944e-38, %v895_v48  ;;  %v4073_v48 = vld [vmem:[#allocation9 + $0x1d0] sm:$0xff]  ;;  %v4076_v34 = vld [vmem:[#allocation9 + $0x1d8] sm:$0xff] }
 0x15e   :  { %v825_v33 = vadd.f32 %v2936_v51, %v824_v25  ;;  %vm869_vm2 = vcmp.eq.f32.partialorder %v868_v1, 8.507059e+37  ;;  %vm894_vm3 = vcmp.eq.f32.partialorder %v893_v52, 8.507059e+37  ;;  %vm905_vm4 = vweird.f32 %v4020_v41  ;;  %v4079_v1 = vld [vmem:[#allocation9 + $0x1a0] sm:$0xff] }
 0x15f   :  { %v863_v56 = vadd.f32 %v2938_v44, %v862_v43  ;;  %v901_v49 = vsub.f32 1.0, %v900_v47  ;;  %v897_v39 = vsel %vm894_vm3, %v896_v31, %v892_v38  ;;  %vm904_vm5 = vweird.f32 %v4002_v10  ;;  %v4094_v38 = vld [vmem:[#allocation9 + $0x188] sm:$0xff] }
 0x160   :  { %v829_v19 = vsel %vm828_vm15, %v2936_v51, %v825_v33  ;;  %v4046_v51 = vld [vmem:[#allocation9 + $0x1e0] sm:$0xff]  ;;  %vm4060_vm6 = vmor %vm904_vm5, %vm905_vm4  ;;  %v4085_v33 = vld [vmem:[#allocation9 + $0x1b0] sm:$0xff] }
 0x161   :  { %v834_v55 = vsel %vm831_vm0, %v833_v30, %v829_v19  ;;  %v867_v53 = vsel %vm866_vm1, %v2938_v44, %v863_v56  ;;  %v902_v43 = vmul.f32 %v4020_v41, %v901_v49  ;;  %v910_v19 = vand.u32 2147483648, %v4002_v10  ;;  %v4057_v44 = vld [vmem:[#allocation9 + $0x1f8] sm:$0xff]  ;;  %v4091_v49 = vld [vmem:[#allocation9 + $0x180] sm:$0xff] }
 0x162   :  { %v2944_v25 = vpop.eup %2943  ;;  %v872_v46 = vsel %vm869_vm2, %v871_v35, %v867_v53  ;;  %v917_v29 = vmul.f32 %v2942_v37, %v834_v55  ;;  %v4064_v35 = vld [vmem:[#allocation9 + $0x1c0] sm:$0xff]  ;;  %v4082_v37 = vld [vmem:[#allocation9 + $0x1a8] sm:$0xff]  ;;  %v4098_v55 = vld [vmem:[#allocation9 + $0x198] sm:$0xff] }
 0x163   :  { %v915_v47 = vmul.f32 0.0, %v872_v46  ;;  %v922_v26 = vmul.f32 %v2944_v25, %v897_v39  ;;  %v903_v36 = vadd.f32 %v4020_v41, %v902_v43  ;;  %v4049_v46 = vld [vmem:[#allocation9 + $0x1e8] sm:$0xff]  ;;  %v911_v28 = vor.u32 1.1754944e-38, %v910_v19  ;;  %v4101_v53 = vld [vmem:[#allocation9 + $0x160] sm:$0xff]  ;;  %v4108_v39 = vld [vmem:[#allocation9 + $0x178] sm:$0xff] }
 0x164   :  { %v4104_v25 = vld [vmem:[#allocation9 + $0x168] sm:$0xff] }
 0x165   :  { %v4040_v42 = vadd.f32 %v917_v29, %v915_v47  ;;  %949 = vmatmul.f32.vlgmr.msra.gmra.mxu0 %v922_v26  ;;  %972 = vmatmul.f32.vlgmr.msra.gmra.mxu1 %v922_v26  ;;  %v4054_v29 = vld [vmem:[#allocation9 + $0x1f0] sm:$0xff]  ;;  %v4114_v43 = vld [vmem:[#allocation9 + $0x148] sm:$0xff]  ;;  %v4118_v47 = vld [vmem:[#allocation9 + $0x158] sm:$0xff] }
 0x166   :  { %995 = vmatmul.f32.vlgmr.msra.gmra.mxu2 %v922_v26  ;;  %1018 = vmatmul.f32.vlgmr.msra.gmra.mxu3 %v922_v26  ;;  %v908_v26 = vand.u32 2147483647, %v4002_v10  ;;  %v907_v10 = vsel %vm4060_vm6, %v4020_v41, %v903_v36  ;;  %v4088_v41 = vld [vmem:[#allocation9 + $0x1b8] sm:$0xff] }
 0x167   :  { %2945 = vtanh.f32 %v4040_v42  ;;  %1403 = vmatpush.msra.mxu0 %v4046_v51  ;;  %1426 = vmatpush.msra.mxu1 %v4049_v46 }
 0x168   :  { %1449 = vmatpush.msra.mxu2 %v4054_v29  ;;  %1472 = vmatpush.msra.mxu3 %v4057_v44  ;;  %vm909_vm7 = vcmp.eq.f32.partialorder %v908_v26, 8.507059e+37 }
 0x169   :  { %1404 = vmatpush.msra.mxu0 %v4064_v35  ;;  %1427 = vmatpush.msra.mxu1 %v4067_v40  ;;  %v912_v56 = vsel %vm909_vm7, %v911_v28, %v907_v10 }
 0x16a   :  { %1450 = vmatpush.msra.mxu2 %v4073_v48  ;;  %1473 = vmatpush.msra.mxu3 %v4076_v34 }
 0x16b   :  { %1405 = vmatpush.msra.mxu0 %v4079_v1  ;;  %1428 = vmatpush.msra.mxu1 %v4082_v37 }
 0x16c   :  { %1451 = vmatpush.msra.mxu2 %v4085_v33  ;;  %1474 = vmatpush.msra.mxu3 %v4088_v41 }
 0x16d   :  { %v2946_v30 = vpop.eup %2945  ;;  %1406 = vmatpush.msra.mxu0 %v4091_v49  ;;  %1429 = vmatpush.msra.mxu1 %v4094_v38 }
 0x16e   :  { %v923_v31 = vmul.f32 %v2946_v30, %v912_v56  ;;  %1452 = vmatpush.msra.mxu2 %v3566_v50  ;;  %1475 = vmatpush.msra.mxu3 %v4098_v55  ;;  %v4111_v50 = vld [vmem:[#allocation9 + $0x140] sm:$0xff] }
 0x16f   :  { %1407 = vmatpush.msra.mxu0 %v4101_v53  ;;  %1430 = vmatpush.msra.mxu1 %v4104_v25 }
 0x170   :  { %952 = vmatmul.f32.gmra.mxu0 %v923_v31  ;;  %975 = vmatmul.f32.gmra.mxu1 %v923_v31 }
 0x171   :  { %998 = vmatmul.f32.gmra.mxu2 %v923_v31  ;;  %1021 = vmatmul.f32.gmra.mxu3 %v923_v31 }
 0x172   :  { %1453 = vmatpush.msra.mxu2 %v3578_v54  ;;  %1476 = vmatpush.msra.mxu3 %v4108_v39  ;;  %v5079_v54 = vld [vmem:[#allocation19_spill] sm:$0xff] }
 0x173   :  { %1408 = vmatpush.msra.mxu0 %v4111_v50  ;;  %1431 = vmatpush.msra.mxu1 %v4114_v43 }
 0x174   :  { %1454 = vmatpush.msra.mxu2 %v3596_v60  ;;  %1477 = vmatpush.msra.mxu3 %v4118_v47  ;;  %v5083_v60 = vld [vmem:[#allocation22_spill] sm:$0xff] }
 0x175   :  { %1409 = vmatpush.msra.mxu0 %v3588_v57  ;;  %1432 = vmatpush.msra.mxu1 %v3590_v58  ;;  %v5080_v57 = vld [vmem:[#allocation20_spill] sm:$0xff]  ;;  %v5081_v58 = vld [vmem:[#allocation21_spill] sm:$0xff] }
 0x176   :  { %1455 = vmatpush.msra.mxu2 %v3606_v0  ;;  %1478 = vmatpush.msra.mxu3 %v3592_v59  ;;  %v5082_v59 = vld [vmem:[#allocation25_spill] sm:$0xff]  ;;  %v5087_v0 = vld [vmem:[#allocation26_spill] sm:$0xff] }
 0x177   :  { %1410 = vmatpush.msra.mxu0 %v3598_v61  ;;  %1433 = vmatpush.msra.mxu1 %v3600_v62  ;;  %v5084_v61 = vld [vmem:[#allocation23_spill] sm:$0xff]  ;;  %v5085_v62 = vld [vmem:[#allocation24_spill] sm:$0xff] }
 0x178   :  { %1456 = vmatpush.msra.mxu2 %v3620_v5  ;;  %1479 = vmatpush.msra.mxu3 %v3604_v63  ;;  %v5086_v63 = vld [vmem:[#allocation27_spill] sm:$0xff] }
 0x179   :  { %1411 = vmatpush.msra.mxu0 %v3612_v2  ;;  %1434 = vmatpush.msra.mxu1 %v3614_v3  ;;  %v5088_v2 = vld [vmem:[#allocation81_spill] sm:$0xff]  ;;  %v5090_v5 = vld [vmem:[#allocation83_spill] sm:$0xff] }
 0x17a   :  { %1457 = vmatpush.msra.mxu2 %v3630_v9  ;;  %1480 = vmatpush.msra.mxu3 %v3616_v4  ;;  %v5089_v3 = vld [vmem:[#allocation17_spill] sm:$0xff] }
 0x17b   :  { %1412 = vmatpush.msra.mxu0 %v3622_v6  ;;  %1435 = vmatpush.msra.mxu1 %v3624_v7  ;;  %v381_v4 = vadd.f32 %v5089_v3, %v5088_v2  ;;  %v5091_v6 = vld [vmem:[#allocation30_spill] sm:$0xff] }
 0x17c   :  { %1458 = vmatpush.msra.mxu2 %v3644_v14  ;;  %1481 = vmatpush.msra.mxu3 %v3628_v8  ;;  %v430_v7 = vadd.f32 %v5091_v6, %v5090_v5 }
 0x17d   :  { %1413 = vmatpush.msra.mxu0 %v3636_v11  ;;  %1436 = vmatpush.msra.mxu1 %v3638_v12 }
 0x17e   :  { %1459 = vmatpush.msra.mxu2 %v3654_v18  ;;  %1482 = vmatpush.msra.mxu3 %v3640_v13 }
 0x17f   :  { %1414 = vmatpush.msra.mxu0 %v3646_v15  ;;  %1437 = vmatpush.msra.mxu1 %v3648_v16  ;;  %v5092_v15 = vld [vmem:[#allocation29_spill] sm:$0xff]  ;;  %v5093_v16 = vld [vmem:[#allocation32_spill] sm:$0xff] }
 0x180   :  { %1460 = vmatpush.msra.mxu2 %v3668_v23  ;;  %1483 = vmatpush.msra.mxu3 %v3652_v17  ;;  %v528_v17 = vadd.f32 %v5093_v16, %v5092_v15  ;;  %v5095_v23 = vld [vmem:[#allocation34_spill] sm:$0xff] }
 0x181   :  { %1415 = vmatpush.msra.mxu0 %v3660_v20  ;;  %1438 = vmatpush.msra.mxu1 %v3662_v21  ;;  %v5094_v21 = vld [vmem:[#allocation33_spill] sm:$0xff] }
 0x182   :  { %1461 = vmatpush.msra.mxu2 %v3678_v27  ;;  %1484 = vmatpush.msra.mxu3 %v3664_v22  ;;  %v383_v22 = vadd.f32 %v5094_v21, %v5088_v2 }
 0x183   :  { %1416 = vmatpush.msra.mxu0 %v3670_v24  ;;  %1439 = vmatpush.msra.mxu1 %v5017_v45  ;;  %v432_v24 = vadd.f32 %v5095_v23, %v5090_v5 }
 0x184   :  { %1462 = vmatpush.msra.mxu2 %v3692_v32  ;;  %1485 = vmatpush.msra.mxu3 %v5079_v54  ;;  %v5096_v54 = vld [vmem:[#allocation36_spill] sm:$0xff] }
 0x185   :  { %1417 = vmatpush.msra.mxu0 %v5080_v57  ;;  %1440 = vmatpush.msra.mxu1 %v5081_v58  ;;  %v530_v57 = vadd.f32 %v5096_v54, %v5092_v15 }
 0x186   :  { %1463 = vmatpush.msra.mxu2 %v5082_v59  ;;  %1486 = vmatpush.msra.mxu3 %v5083_v60  ;;  %v5097_v59 = vld [vmem:[#allocation85_spill] sm:$0xff]  ;;  %v5098_v60 = vld [vmem:[#allocation31_spill] sm:$0xff] }
 0x187   :  { %1418 = vmatpush.msra.mxu0 %v5084_v61  ;;  %1441 = vmatpush.msra.mxu1 %v5085_v62  ;;  %v479_v61 = vadd.f32 %v5098_v60, %v5097_v59 }
 0x188   :  { %1464 = vmatpush.msra.mxu2 %v5086_v63  ;;  %1487 = vmatpush.msra.mxu3 %v5087_v0 }
 0x1e2   :  { %v950_v8 = vpop.f32.mrf.mxu0  ;;  %v973_v9 = vpop.f32.mrf.mxu1 }
 0x1e3   :  { %v1025_v11 = vadd.f32 %v950_v8, %v381_v4  ;;  %v1026_v12 = vadd.f32 %v973_v9, %v430_v7 }
 0x1e5   :  { %v2801_v13 = vmul.f32 -1.442695, %v1025_v11  ;;  %v2803_v14 = vmul.f32 -1.442695, %v1026_v12  ;;  %v5099_v11 = vld [vmem:[#allocation35_spill] sm:$0xff] }
 0x1e6   :  { %v481_v12 = vadd.f32 %v5099_v11, %v5097_v59 }
 0x1e7   :  { %2947 = vpow2.f32 %v2801_v13 }
 0x1e8   :  { %2949 = vpow2.f32 %v2803_v14 }
 0x1e9   :  { %v1019_v18 = vpop.f32.mrf.mxu3  ;;  %v996_v30 = vpop.f32.mrf.mxu2 }
 0x1ea   :  { %v1028_v20 = vadd.f32 %v1019_v18, %v528_v17  ;;  %v1027_v4 = vadd.f32 %v996_v30, %v479_v61 }
 0x1ec   :  { %v2805_v27 = vmul.f32 -1.442695, %v1028_v20 }
 0x1ed   :  { %v2948_v32 = vpop.eup %2947  ;;  %v953_v45 = vpop.f32.mrf.mxu0 }
 0x1ee   :  { %v976_v36 = vpop.f32.mrf.mxu1  ;;  %v2950_v19 = vpop.eup %2949  ;;  %v1039_v26 = vadd.f32 1.0, %v2948_v32  ;;  %2951 = vpow2.f32 %v2805_v27  ;;  %v1029_v52 = vadd.f32 %v953_v45, %v383_v22 }
 0x1ef   :  { %v1030_v10 = vadd.f32 %v976_v36, %v432_v24  ;;  %v1077_v28 = vadd.f32 1.0, %v2950_v19 }
 0x1f0   :  { %2953 = vrcp.f32 %v1039_v26  ;;  %v2802_v56 = vmul.f32 -1.442695, %v1029_v52  ;;  %v1050_v17 = vand.u32 2147483647, %v1039_v26  ;;  %v1052_v18 = vand.u32 2147483648, %v1039_v26 }
 0x1f1   :  { %2955 = vrcp.f32 %v1077_v28  ;;  %v2804_v31 = vmul.f32 -1.442695, %v1030_v10  ;;  %v1090_v21 = vand.u32 2147483648, %v1077_v28  ;;  %v1088_v27 = vand.u32 2147483647, %v1077_v28 }
 0x1f2   :  { %2957 = vpow2.f32 %v2802_v56  ;;  %vm1084_vm10 = vweird.f32 %v1077_v28  ;;  %vm1046_vm11 = vweird.f32 %v1039_v26  ;;  %v1053_v52 = vor.u32 1.1754944e-38, %v1052_v18 }
 0x1f3   :  { %2959 = vpow2.f32 %v2804_v31  ;;  %v1091_v31 = vor.u32 1.1754944e-38, %v1090_v21  ;;  %vm1051_vm14 = vcmp.eq.f32.partialorder %v1050_v17, 8.507059e+37  ;;  %vm1089_vm15 = vcmp.eq.f32.partialorder %v1088_v27, 8.507059e+37 }
 0x1f4   :  { %v2952_v58 = vpop.eup %2951  ;;  %v1022_v62 = vpop.f32.mrf.mxu3 }
 0x1f5   :  { %v4175_v63 = vadd.f32 1.0, %v2952_v58  ;;  %v1032_v0 = vadd.f32 %v1022_v62, %v530_v57  ;;  %v999_v45 = vpop.f32.mrf.mxu2 }
 0x1f6   :  { %v2954_v3 = vpop.eup %2953  ;;  %v1031_v57 = vadd.f32 %v999_v45, %v481_v12  ;;  %v4272_v45 = vld [vmem:[#allocation9 + $0x138] sm:$0xff] }
 0x1f7   :  { %v2956_v6 = vpop.eup %2955  ;;  %v1042_v7 = vmul.f32 %v2954_v3, %v1039_v26  ;;  %2961 = vrcp.f32 %v4175_v63  ;;  %v2806_v8 = vmul.f32 -1.442695, %v1032_v0  ;;  %vm1047_vm8 = vweird.f32 %v2954_v3  ;;  %v5100_v0 = vld [vmem:[#allocation86_spill] sm:$0xff] }
 0x1f8   :  { %v1080_v9 = vmul.f32 %v2956_v6, %v1077_v28  ;;  %v2958_v14 = vpop.eup %2957  ;;  %vm1085_vm9 = vweird.f32 %v2956_v6  ;;  %vm1048_vm12 = vmor %vm1046_vm11, %vm1047_vm8  ;;  %v1130_v17 = vand.u32 2147483648, %v4175_v63  ;;  %vm1124_vm1 = vweird.f32 %v4175_v63 }
 0x1f9   :  { %v1043_v13 = vsub.f32 1.0, %v1042_v7  ;;  %2963 = vpow2.f32 %v2806_v8  ;;  %v2960_v20 = vpop.eup %2959  ;;  %v4180_v23 = vadd.f32 1.0, %v2958_v14  ;;  %vm1086_vm13 = vmor %vm1084_vm10, %vm1085_vm9  ;;  %v1128_v14 = vand.u32 2147483647, %v4175_v63 }
 0x1fa   :  { %v1081_v16 = vsub.f32 1.0, %v1080_v9  ;;  %2965 = vtanh.f32 %v1027_v4  ;;  %v4182_v32 = vadd.f32 1.0, %v2960_v20 }
 0x1fb   :  { %v1044_v22 = vmul.f32 %v2954_v3, %v1043_v13  ;;  %2967 = vrcp.f32 %v4180_v23  ;;  %v1065_v20 = vand.u32 2147483647, %v4180_v23  ;;  %v1067_v21 = vand.u32 2147483648, %v4180_v23 }
 0x1fc   :  { %v1082_v24 = vmul.f32 %v2956_v6, %v1081_v16  ;;  %2969 = vrcp.f32 %v4182_v32  ;;  %v1103_v27 = vand.u32 2147483647, %v4182_v32  ;;  %vm4217_vm5 = vcmp.eq.f32.partialorder %v1128_v14, 8.507059e+37 }
 0x1fd   :  { %v4184_v36 = vpop.eup %2961  ;;  %v1045_v19 = vadd.f32 %v2954_v3, %v1044_v22  ;;  %2971 = vtanh.f32 %v1031_v57  ;;  %v1105_v22 = vand.u32 2147483648, %v4182_v32  ;;  %vm1099_vm6 = vweird.f32 %v4182_v32 }
 0x1fe   :  { %v1083_v10 = vadd.f32 %v2956_v6, %v1082_v24  ;;  %v1120_v30 = vmul.f32 %v4184_v36, %v4175_v63  ;;  %vm1125_vm0 = vweird.f32 %v4184_v36  ;;  %vm1061_vm7 = vweird.f32 %v4180_v23 }
 0x1ff   :  { %v2964_v56 = vpop.eup %2963  ;;  %v1049_v54 = vsel %vm1048_vm12, %v2954_v3, %v1045_v19  ;;  %vm4210_vm3 = vmor %vm1124_vm1, %vm1125_vm0  ;;  %vm1066_vm9 = vcmp.eq.f32.partialorder %v1065_v20, 8.507059e+37  ;;  %vm1104_vm11 = vcmp.eq.f32.partialorder %v1103_v27, 8.507059e+37  ;;  %v4253_v20 = vld [vmem:[#allocation9 + $0x170] sm:$0xff] }
 0x200   :  { %v2966_v28 = vpop.eup %2965  ;;  %v1054_v58 = vsel %vm1051_vm14, %v1053_v52, %v1049_v54  ;;  %v1087_v26 = vsel %vm1086_vm13, %v2956_v6, %v1083_v10  ;;  %v1121_v60 = vsub.f32 1.0, %v1120_v30  ;;  %v4192_v7 = vadd.f32 1.0, %v2964_v56  ;;  %v4269_v27 = vld [vmem:[#allocation9 + $0x130] sm:$0xff]  ;;  %v4284_v30 = vld [vmem:[#allocation9 + $0x118] sm:$0xff] }
 0x201   :  { %v1092_v61 = vsel %vm1089_vm15, %v1091_v31, %v1087_v26  ;;  %v1151_v62 = vmul.f32 %v2966_v28, %v1054_v58  ;;  %v2968_v9 = vpop.eup %2967  ;;  %v1131_v31 = vor.u32 1.1754944e-38, %v1130_v17  ;;  %v1068_v54 = vor.u32 1.1754944e-38, %v1067_v21  ;;  %v4259_v21 = vld [vmem:[#allocation9 + $0x150] sm:$0xff] }
 0x202   :  { %v1149_v4 = vmul.f32 %v1092_v61, %v5100_v0  ;;  %v1122_v8 = vmul.f32 %v4184_v36, %v1121_v60  ;;  %v2970_v11 = vpop.eup %2969  ;;  %v1057_v3 = vmul.f32 %v2968_v9, %v4180_v23  ;;  %2973 = vrcp.f32 %v4192_v7 }
 0x203   :  { %v1095_v6 = vmul.f32 %v2970_v11, %v4182_v32  ;;  %vm1062_vm2 = vweird.f32 %v2968_v9  ;;  %v2972_v19 = vpop.eup %2971  ;;  %vm1100_vm4 = vweird.f32 %v2970_v11  ;;  %vm1139_vm13 = vweird.f32 %v4192_v7 }
 0x204   :  { %v4195_v13 = vadd.f32 %v1151_v62, %v1149_v4  ;;  %v1123_v12 = vadd.f32 %v4184_v36, %v1122_v8  ;;  %v1058_v16 = vsub.f32 1.0, %v1057_v3  ;;  %vm1063_vm8 = vmor %vm1061_vm7, %vm1062_vm2 }
 0x205   :  { %v1096_v18 = vsub.f32 1.0, %v1095_v6  ;;  %vm1101_vm10 = vmor %vm1099_vm6, %vm1100_vm4 }
 0x206   :  { %2975 = vtanh.f32 %v4195_v13  ;;  %v1059_v24 = vmul.f32 %v2968_v9, %v1058_v16  ;;  %v1127_v10 = vsel %vm4210_vm3, %v4184_v36, %v1123_v12  ;;  %v1106_v36 = vor.u32 1.1754944e-38, %v1105_v22  ;;  %v4263_v22 = vld [vmem:[#allocation9 + $0x120] sm:$0xff] }
 0x207   :  { %v1097_v52 = vmul.f32 %v2970_v11, %v1096_v18  ;;  %v1132_v60 = vsel %vm4217_vm5, %v1131_v31, %v1127_v10  ;;  %v4281_v10 = vld [vmem:[#allocation9 + $0x110] sm:$0xff] }
 0x208   :  { %v2974_v63 = vpop.eup %2973  ;;  %v1060_v56 = vadd.f32 %v2968_v9, %v1059_v24  ;;  %v4266_v24 = vld [vmem:[#allocation9 + $0x128] sm:$0xff]  ;;  %v4293_v31 = vld [vmem:[#allocation9 + $0xf0] sm:$0xff] }
 0x209   :  { %v1098_v57 = vadd.f32 %v2970_v11, %v1097_v52  ;;  %v1135_v28 = vmul.f32 %v2974_v63, %v4192_v7  ;;  %vm1140_vm12 = vweird.f32 %v2974_v63  ;;  %v4278_v52 = vld [vmem:[#allocation9 + $0x108] sm:$0xff] }
 0x20a   :  { %v1064_v26 = vsel %vm1063_vm8, %v2968_v9, %v1060_v56  ;;  %vm1141_vm14 = vmor %vm1139_vm13, %vm1140_vm12  ;;  %v4290_v56 = vld [vmem:[#allocation9 + $0xe8] sm:$0xff] }
 0x20b   :  { %v1069_v61 = vsel %vm1066_vm9, %v1068_v54, %v1064_v26  ;;  %v1102_v32 = vsel %vm1101_vm10, %v2970_v11, %v1098_v57  ;;  %v1136_v62 = vsub.f32 1.0, %v1135_v28  ;;  %v1143_v11 = vand.u32 2147483647, %v4192_v7  ;;  %v4296_v54 = vld [vmem:[#allocation9 + $0xf8] sm:$0xff]  ;;  %v4299_v57 = vld [vmem:[#allocation9 + $0xc0] sm:$0xff]  ;;  %v4302_v28 = vld [vmem:[#allocation9 + $0xc8] sm:$0xff] }
 0x20c   :  { %v2976_v58 = vpop.eup %2975  ;;  %v1107_v23 = vsel %vm1104_vm11, %v1106_v36, %v1102_v32  ;;  %v1152_v4 = vmul.f32 %v2972_v19, %v1069_v61  ;;  %v4275_v19 = vld [vmem:[#allocation9 + $0x100] sm:$0xff]  ;;  %5105 = vst [vmem:[#allocation19_spill] sm:$0xff] %v4299_v57  ;;  %v4308_v36 = vld [vmem:[#allocation9 + $0xd8] sm:$0xff]  ;;  %v4317_v61 = vld [vmem:[#allocation9 + $0xb0] sm:$0xff] }
 0x20d   :  { %v1157_v0 = vmul.f32 %v2976_v58, %v1132_v60  ;;  %v1150_v8 = vmul.f32 %v1107_v23, %v4040_v42  ;;  %v1137_v3 = vmul.f32 %v2974_v63, %v1136_v62  ;;  %v1145_v42 = vand.u32 2147483648, %v4192_v7  ;;  %v4247_v7 = vld [vmem:[#allocation9 + $0x190] sm:$0xff]  ;;  %5106 = vst [vmem:[#allocation20_spill] sm:$0xff] %v4302_v28  ;;  %v4311_v26 = vld [vmem:[#allocation9 + $0xa0] sm:$0xff]  ;;  %v4314_v60 = vld [vmem:[#allocation9 + $0xa8] sm:$0xff] }
 0x20e   :  { %vm1144_vm15 = vcmp.eq.f32.partialorder %v1143_v11, 8.507059e+37  ;;  %v4305_v58 = vld [vmem:[#allocation9 + $0xd0] sm:$0xff]  ;;  %5108 = vst [vmem:[#allocation25_spill] sm:$0xff] %v4308_v36  ;;  %v4320_v32 = vld [vmem:[#allocation9 + $0xb8] sm:$0xff]  ;;  %v4323_v62 = vld [vmem:[#allocation9 + $0x80] sm:$0xff] }
 0x20f   :  { %1184 = vmatmul.f32.vlgmr.msrb.gmra.mxu0 %v1157_v0  ;;  %1207 = vmatmul.f32.vlgmr.msrb.gmra.mxu1 %v1157_v0  ;;  %v4227_v6 = vadd.f32 %v1152_v4, %v1150_v8  ;;  %v1138_v9 = vadd.f32 %v2974_v63, %v1137_v3  ;;  %v1146_v14 = vor.u32 1.1754944e-38, %v1145_v42  ;;  %5107 = vst [vmem:[#allocation21_spill] sm:$0xff] %v4305_v58  ;;  %v4329_v23 = vld [vmem:[#allocation9 + $0x90] sm:$0xff]  ;;  %v4332_v4 = vld [vmem:[#allocation9 + $0x98] sm:$0xff]  ;;  %v4335_v8 = vld [vmem:[#allocation9 + $0x60] sm:$0xff] }
 0x210   :  { %1230 = vmatmul.f32.vlgmr.msrb.gmra.mxu2 %v1157_v0  ;;  %1253 = vmatmul.f32.vlgmr.msrb.gmra.mxu3 %v1157_v0  ;;  %5109 = vst [vmem:[#allocation22_spill] sm:$0xff] %v4311_v26  ;;  %v4326_v0 = vld [vmem:[#allocation9 + $0x88] sm:$0xff]  ;;  %v4344_v42 = vld [vmem:[#allocation9 + $0x78] sm:$0xff]  ;;  %v4347_v11 = vld [vmem:[#allocation9 + $0x40] sm:$0xff] }
 0x211   :  { %1638 = vmatpush.msrb.mxu0 %v4046_v51  ;;  %1661 = vmatpush.msrb.mxu1 %v4049_v46  ;;  %2977 = vtanh.f32 %v4227_v6  ;;  %v1142_v12 = vsel %vm1141_vm14, %v2974_v63, %v1138_v9  ;;  %v4287_v63 = vld [vmem:[#allocation9 + $0xe0] sm:$0xff]  ;;  %5110 = vst [vmem:[#allocation23_spill] sm:$0xff] %v4314_v60  ;;  %v4338_v3 = vld [vmem:[#allocation9 + $0x68] sm:$0xff]  ;;  %v4341_v9 = vld [vmem:[#allocation9 + $0x70] sm:$0xff] }
 0x212   :  { %1684 = vmatpush.msrb.mxu2 %v4054_v29  ;;  %1707 = vmatpush.msrb.mxu3 %v4057_v44  ;;  %v1147_v17 = vsel %vm1144_vm15, %v1146_v14, %v1142_v12  ;;  %5111 = vst [vmem:[#allocation24_spill] sm:$0xff] %v4317_v61  ;;  %v4350_v12 = vld [vmem:[#allocation9 + $0x48] sm:$0xff]  ;;  %v4353_v14 = vld [vmem:[#allocation9 + $0x50] sm:$0xff] }
 0x213   :  { %1639 = vmatpush.msrb.mxu0 %v4064_v35  ;;  %1662 = vmatpush.msrb.mxu1 %v4067_v40  ;;  %5112 = vst [vmem:[#allocation27_spill] sm:$0xff] %v4320_v32 }
 0x214   :  { %1685 = vmatpush.msrb.mxu2 %v4073_v48  ;;  %1708 = vmatpush.msrb.mxu3 %v4076_v34  ;;  %5113 = vst [vmem:[#allocation26_spill] sm:$0xff] %v4323_v62 }
 0x215   :  { %1640 = vmatpush.msrb.mxu0 %v4079_v1  ;;  %1663 = vmatpush.msrb.mxu1 %v4082_v37  ;;  %5114 = vst [vmem:[#allocation17_spill] sm:$0xff] %v4326_v0 }
 0x216   :  { %1686 = vmatpush.msrb.mxu2 %v4085_v33  ;;  %1709 = vmatpush.msrb.mxu3 %v4088_v41  ;;  %5115 = vst [vmem:[#allocation30_spill] sm:$0xff] %v4329_v23 }
 0x217   :  { %1641 = vmatpush.msrb.mxu0 %v4091_v49  ;;  %1664 = vmatpush.msrb.mxu1 %v4094_v38  ;;  %v2978_v16 = vpop.eup %2977  ;;  %5116 = vst [vmem:[#allocation32_spill] sm:$0xff] %v4332_v4 }
 0x218   :  { %1687 = vmatpush.msrb.mxu2 %v4247_v7  ;;  %1710 = vmatpush.msrb.mxu3 %v4098_v55  ;;  %v1158_v18 = vmul.f32 %v2978_v16, %v1147_v17  ;;  %5117 = vst [vmem:[#allocation33_spill] sm:$0xff] %v4335_v8  ;;  %v4356_v16 = vld [vmem:[#allocation9 + $0x58] sm:$0xff]  ;;  %v4359_v17 = vld [vmem:[#allocation9 + $0x20] sm:$0xff] }
 0x219   :  { %1642 = vmatpush.msrb.mxu0 %v4101_v53  ;;  %1665 = vmatpush.msrb.mxu1 %v4104_v25  ;;  %5118 = vst [vmem:[#allocation34_spill] sm:$0xff] %v4338_v3 }
 0x21a   :  { %1688 = vmatpush.msrb.mxu2 %v4253_v20  ;;  %1711 = vmatpush.msrb.mxu3 %v4108_v39  ;;  %5119 = vst [vmem:[#allocation36_spill] sm:$0xff] %v4341_v9 }
 0x21b   :  { %1643 = vmatpush.msrb.mxu0 %v4111_v50  ;;  %1666 = vmatpush.msrb.mxu1 %v4114_v43  ;;  %5120 = vst [vmem:[#allocation85_spill] sm:$0xff] %v4344_v42 }
 0x21c   :  { %1187 = vmatmul.f32.gmra.mxu0 %v1158_v18  ;;  %1210 = vmatmul.f32.gmra.mxu1 %v1158_v18  ;;  %5121 = vst [vmem:[#allocation31_spill] sm:$0xff] %v4347_v11 }
 0x21d   :  { %1233 = vmatmul.f32.gmra.mxu2 %v1158_v18  ;;  %1256 = vmatmul.f32.gmra.mxu3 %v1158_v18  ;;  %5122 = vst [vmem:[#allocation35_spill] sm:$0xff] %v4350_v12  ;;  %v4362_v18 = vld [vmem:[#allocation9 + $0x28] sm:$0xff] }
 0x21e   :  { %1689 = vmatpush.msrb.mxu2 %v4259_v21  ;;  %1712 = vmatpush.msrb.mxu3 %v4118_v47  ;;  %5123 = vst [vmem:[#allocation86_spill] sm:$0xff] %v4353_v14 }
 0x21f   :  { %1644 = vmatpush.msrb.mxu0 %v4263_v22  ;;  %1667 = vmatpush.msrb.mxu1 %v4266_v24  ;;  %5124 = vst [vmem:[#allocation87_spill] sm:$0xff] %v4356_v16 }
 0x220   :  { %1690 = vmatpush.msrb.mxu2 %v4269_v27  ;;  %1713 = vmatpush.msrb.mxu3 %v4272_v45  ;;  %5125 = vst [vmem:[#allocation88_spill] sm:$0xff] %v4359_v17 }
 0x221   :  { %1645 = vmatpush.msrb.mxu0 %v4275_v19  ;;  %1668 = vmatpush.msrb.mxu1 %v4278_v52  ;;  %5126 = vst [vmem:[#allocation89_spill] sm:$0xff] %v4362_v18 }
 0x222   :  { %1691 = vmatpush.msrb.mxu2 %v4281_v10  ;;  %1714 = vmatpush.msrb.mxu3 %v4284_v30 }
 0x223   :  { %1646 = vmatpush.msrb.mxu0 %v4287_v63  ;;  %1669 = vmatpush.msrb.mxu1 %v4290_v56 }
 0x224   :  { %1692 = vmatpush.msrb.mxu2 %v4293_v31  ;;  %1715 = vmatpush.msrb.mxu3 %v4296_v54 }
 0x225   :  { %1647 = vmatpush.msrb.mxu0 %v4299_v57  ;;  %1670 = vmatpush.msrb.mxu1 %v4302_v28 }
 0x226   :  { %1693 = vmatpush.msrb.mxu2 %v4305_v58  ;;  %1716 = vmatpush.msrb.mxu3 %v4308_v36 }
 0x227   :  { %1648 = vmatpush.msrb.mxu0 %v4311_v26  ;;  %1671 = vmatpush.msrb.mxu1 %v4314_v60 }
 0x228   :  { %1694 = vmatpush.msrb.mxu2 %v4317_v61  ;;  %1717 = vmatpush.msrb.mxu3 %v4320_v32 }
 0x229   :  { %1649 = vmatpush.msrb.mxu0 %v4323_v62  ;;  %1672 = vmatpush.msrb.mxu1 %v4326_v0  ;;  %v5135_v0 = vld [vmem:[#allocation39_spill] sm:$0xff] }
 0x22a   :  { %1695 = vmatpush.msrb.mxu2 %v4329_v23  ;;  %1718 = vmatpush.msrb.mxu3 %v4332_v4 }
 0x22b   :  { %1650 = vmatpush.msrb.mxu0 %v4335_v8  ;;  %1673 = vmatpush.msrb.mxu1 %v4338_v3 }
 0x22c   :  { %1696 = vmatpush.msrb.mxu2 %v4341_v9  ;;  %1719 = vmatpush.msrb.mxu3 %v4344_v42 }
 0x22d   :  { %1651 = vmatpush.msrb.mxu0 %v4347_v11  ;;  %1674 = vmatpush.msrb.mxu1 %v4350_v12  ;;  %v4365_v11 = vld [vmem:[#allocation9 + $0x30] sm:$0xff]  ;;  %v4368_v12 = vld [vmem:[#allocation9 + $0x38] sm:$0xff] }
 0x22e   :  { %1697 = vmatpush.msrb.mxu2 %v4353_v14  ;;  %1720 = vmatpush.msrb.mxu3 %v4356_v16  ;;  %5127 = vst [vmem:[#allocation90_spill] sm:$0xff] %v4365_v11  ;;  %v4371_v14 = vld [vmem:[#allocation9] sm:$0xff]  ;;  %v4374_v16 = vld [vmem:[#allocation9 + $0x8] sm:$0xff] }
 0x22f   :  { %1652 = vmatpush.msrb.mxu0 %v4359_v17  ;;  %1675 = vmatpush.msrb.mxu1 %v4362_v18  ;;  %5128 = vst [vmem:[#allocation91_spill] sm:$0xff] %v4368_v12  ;;  %v4377_v17 = vld [vmem:[#allocation9 + $0x10] sm:$0xff]  ;;  %v4380_v18 = vld [vmem:[#allocation9 + $0x18] sm:$0xff] }
 0x230   :  { %1698 = vmatpush.msrb.mxu2 %v4365_v11  ;;  %1721 = vmatpush.msrb.mxu3 %v4368_v12  ;;  %5129 = vst [vmem:[#allocation92_spill] sm:$0xff] %v4371_v14  ;;  %v5133_v11 = vld [vmem:[#allocation37_spill] sm:$0xff]  ;;  %v5134_v12 = vld [vmem:[#allocation38_spill] sm:$0xff] }
 0x231   :  { %1653 = vmatpush.msrb.mxu0 %v4371_v14  ;;  %5130 = vst [vmem:[#allocation93_spill] sm:$0xff] %v4374_v16  ;;  %1676 = vmatpush.msrb.mxu1 %v4374_v16  ;;  %v386_v42 = vadd.f32 %v5133_v11, %v5088_v2  ;;  %v435_v9 = vadd.f32 %v5134_v12, %v5090_v5 }
 0x232   :  { %5131 = vst [vmem:[#allocation94_spill] sm:$0xff] %v4377_v17  ;;  %1699 = vmatpush.msrb.mxu2 %v4377_v17  ;;  %1722 = vmatpush.msrb.mxu3 %v4380_v18  ;;  %v533_v17 = vadd.f32 %v5135_v0, %v5092_v15 }
 0x233   :  { %5132 = vst [vmem:[#allocation95_spill] sm:$0xff] %v4380_v18 }
 0x28c   :  { %v1185_v3 = vpop.f32.mrf.mxu0  ;;  %v1208_v14 = vpop.f32.mrf.mxu1 }
 0x28d   :  { %v1260_v8 = vadd.f32 %v1185_v3, %v386_v42  ;;  %v1261_v4 = vadd.f32 %v1208_v14, %v435_v9  ;;  %v5136_v3 = vld [vmem:[#allocation40_spill] sm:$0xff] }
 0x28e   :  { %v388_v9 = vadd.f32 %v5136_v3, %v5088_v2  ;;  %v5139_v3 = vld [vmem:[#allocation43_spill] sm:$0xff] }
 0x28f   :  { %v2807_v23 = vmul.f32 -1.442695, %v1260_v8  ;;  %v2809_v16 = vmul.f32 -1.442695, %v1261_v4  ;;  %v5137_v4 = vld [vmem:[#allocation41_spill] sm:$0xff]  ;;  %v535_v2 = vadd.f32 %v5139_v3, %v5092_v15 }
 0x291   :  { %2979 = vpow2.f32 %v2807_v23  ;;  %v437_v23 = vadd.f32 %v5137_v4, %v5090_v5 }
 0x292   :  { %2981 = vpow2.f32 %v2809_v16 }
 0x293   :  { %v1254_v62 = vpop.f32.mrf.mxu3  ;;  %v1231_v0 = vpop.f32.mrf.mxu2 }
 0x294   :  { %v1263_v32 = vadd.f32 %v1254_v62, %v533_v17 }
 0x296   :  { %v2811_v18 = vmul.f32 -1.442695, %v1263_v32  ;;  %v5138_v32 = vld [vmem:[#allocation18_spill] sm:$0xff] }
 0x297   :  { %v2980_v61 = vpop.eup %2979  ;;  %v484_v62 = vadd.f32 %v5138_v32, %v5097_v59 }
 0x298   :  { %v2982_v60 = vpop.eup %2981  ;;  %v1274_v11 = vadd.f32 1.0, %v2980_v61  ;;  %2983 = vpow2.f32 %v2811_v18 }
 0x299   :  { %v1312_v26 = vadd.f32 1.0, %v2982_v60  ;;  %v1188_v12 = vpop.f32.mrf.mxu0  ;;  %v1211_v36 = vpop.f32.mrf.mxu1  ;;  %v1262_v60 = vadd.f32 %v1231_v0, %v484_v62 }
 0x29a   :  { %2985 = vrcp.f32 %v1274_v11  ;;  %v1264_v8 = vadd.f32 %v1188_v12, %v388_v9  ;;  %v1265_v42 = vadd.f32 %v1211_v36, %v437_v23  ;;  %v1287_v0 = vand.u32 2147483648, %v1274_v11 }
 0x29b   :  { %2987 = vrcp.f32 %v1312_v26  ;;  %v1325_v32 = vand.u32 2147483648, %v1312_v26  ;;  %vm1319_vm2 = vweird.f32 %v1312_v26  ;;  %vm1281_vm3 = vweird.f32 %v1274_v11 }
 0x29c   :  { %v2808_v61 = vmul.f32 -1.442695, %v1264_v8  ;;  %v2810_v16 = vmul.f32 -1.442695, %v1265_v42  ;;  %v1285_v8 = vand.u32 2147483647, %v1274_v11 }
 0x29e   :  { %v2984_v14 = vpop.eup %2983  ;;  %2989 = vpow2.f32 %v2808_v61  ;;  %v1323_v61 = vand.u32 2147483647, %v1312_v26  ;;  %vm1286_vm5 = vcmp.eq.f32.partialorder %v1285_v8, 8.507059e+37 }
 0x29f   :  { %v4395_v17 = vadd.f32 1.0, %v2984_v14 }
 0x2a0   :  { %v2986_v18 = vpop.eup %2985  ;;  %v1257_v4 = vpop.f32.mrf.mxu3  ;;  %vm1324_vm7 = vcmp.eq.f32.partialorder %v1323_v61, 8.507059e+37 }
 0x2a1   :  { %v2988_v5 = vpop.eup %2987  ;;  %v1277_v58 = vmul.f32 %v2986_v18, %v1274_v11  ;;  %2991 = vrcp.f32 %v4395_v17  ;;  %v1267_v12 = vadd.f32 %v1257_v4, %v535_v2  ;;  %vm1282_vm0 = vweird.f32 %v2986_v18 }
 0x2a2   :  { %v1315_v36 = vmul.f32 %v2988_v5, %v1312_v26  ;;  %2993 = vpow2.f32 %v2810_v16  ;;  %vm1320_vm1 = vweird.f32 %v2988_v5  ;;  %vm1283_vm4 = vmor %vm1281_vm3, %vm1282_vm0  ;;  %v1288_v16 = vor.u32 1.1754944e-38, %v1287_v0  ;;  %v1234_v0 = vpop.f32.mrf.mxu2 }
 0x2a3   :  { %v1278_v9 = vsub.f32 1.0, %v1277_v58  ;;  %2995 = vtanh.f32 %v1262_v60  ;;  %v2812_v42 = vmul.f32 -1.442695, %v1267_v12  ;;  %vm1321_vm6 = vmor %vm1319_vm2, %vm1320_vm1  ;;  %v1326_v12 = vor.u32 1.1754944e-38, %v1325_v32 }
 0x2a4   :  { %v1316_v23 = vsub.f32 1.0, %v1315_v36  ;;  %v2990_v14 = vpop.eup %2989  ;;  %v1363_v61 = vand.u32 2147483647, %v4395_v17  ;;  %vm1359_vm9 = vweird.f32 %v4395_v17 }
 0x2a5   :  { %v1279_v62 = vmul.f32 %v2986_v18, %v1278_v9  ;;  %2997 = vpow2.f32 %v2812_v42  ;;  %v4402_v2 = vadd.f32 1.0, %v2990_v14 }
 0x2a6   :  { %v1317_v3 = vmul.f32 %v2988_v5, %v1316_v23  ;;  %vm1364_vm11 = vcmp.eq.f32.partialorder %v1363_v61, 8.507059e+37 }
 0x2a7   :  { %v4400_v15 = vpop.eup %2991  ;;  %v1280_v28 = vadd.f32 %v2986_v18, %v1279_v62  ;;  %2999 = vrcp.f32 %v4402_v2  ;;  %vm1296_vm14 = vweird.f32 %v4402_v2 }
 0x2a8   :  { %v2994_v58 = vpop.eup %2993  ;;  %v1318_v60 = vadd.f32 %v2988_v5, %v1317_v3  ;;  %v1355_v4 = vmul.f32 %v4400_v15, %v4395_v17  ;;  %v5140_v3 = vld [vmem:[#allocation42_spill] sm:$0xff]  ;;  %vm1360_vm8 = vweird.f32 %v4400_v15 }
 0x2a9   :  { %v2996_v36 = vpop.eup %2995  ;;  %v1284_v9 = vsel %vm1283_vm4, %v2986_v18, %v1280_v28  ;;  %v4408_v26 = vadd.f32 1.0, %v2994_v58  ;;  %v486_v57 = vadd.f32 %v5140_v3, %v5097_v59  ;;  %vm4428_vm10 = vmor %vm1359_vm9, %vm1360_vm8 }
 0x2aa   :  { %v1289_v11 = vsel %vm1286_vm5, %v1288_v16, %v1284_v9  ;;  %v1322_v23 = vsel %vm1321_vm6, %v2988_v5, %v1318_v60  ;;  %v1356_v42 = vsub.f32 1.0, %v1355_v4  ;;  %v1365_v4 = vand.u32 2147483648, %v4395_v17 }
 0x2ab   :  { %v1327_v62 = vsel %vm1324_vm7, %v1326_v12, %v1322_v23  ;;  %v1386_v8 = vmul.f32 %v2996_v36, %v1289_v11  ;;  %3001 = vrcp.f32 %v4408_v26  ;;  %v2998_v14 = vpop.eup %2997  ;;  %v1266_v5 = vadd.f32 %v1234_v0, %v486_v57 }
 0x2ac   :  { %v1384_v32 = vmul.f32 %v1327_v62, %v4195_v13  ;;  %v4414_v28 = vadd.f32 1.0, %v2998_v14  ;;  %v1357_v18 = vmul.f32 %v4400_v15, %v1356_v42  ;;  %v1302_v11 = vand.u32 2147483648, %v4402_v2 }
 0x2ad   :  { %v3000_v16 = vpop.eup %2999  ;;  %v1366_v42 = vor.u32 1.1754944e-38, %v1365_v4  ;;  %v1300_v17 = vand.u32 2147483647, %v4402_v2  ;;  %v1340_v14 = vand.u32 2147483648, %v4408_v26  ;;  %v1338_v3 = vand.u32 2147483647, %v4408_v26 }
 0x2ae   :  { %v4417_v58 = vadd.f32 %v1386_v8, %v1384_v32  ;;  %3003 = vrcp.f32 %v4414_v28  ;;  %v1358_v60 = vadd.f32 %v4400_v15, %v1357_v18  ;;  %v1292_v13 = vmul.f32 %v3000_v16, %v4402_v2 }
 0x2af   :  { %vm1297_vm12 = vweird.f32 %v3000_v16  ;;  %vm1334_vm15 = vweird.f32 %v4408_v26  ;;  %vm1301_vm1 = vcmp.eq.f32.partialorder %v1300_v17, 8.507059e+37  ;;  %v1341_v2 = vor.u32 1.1754944e-38, %v1340_v14  ;;  %v5162_v17 = vld [vmem:[#allocation86_spill] sm:$0xff]  ;;  %v5164_v14 = vld [vmem:[#allocation88_spill] sm:$0xff] }
 0x2b0   :  { %5141 = vst [vmem:[#allocation37_spill] sm:$0xff] %v4417_v58  ;;  %3005 = vtanh.f32 %v4417_v58  ;;  %v1293_v12 = vsub.f32 1.0, %v1292_v13  ;;  %v1362_v23 = vsel %vm4428_vm10, %v4400_v15, %v1358_v60  ;;  %vm1298_vm0 = vmor %vm1296_vm14, %vm1297_vm12  ;;  %v1303_v60 = vor.u32 1.1754944e-38, %v1302_v11 }
 0x2b1   :  { %v3002_v36 = vpop.eup %3001  ;;  %3007 = vtanh.f32 %v1266_v5  ;;  %v1367_v61 = vsel %vm1364_vm11, %v1366_v42, %v1362_v23  ;;  %vm1339_vm3 = vcmp.eq.f32.partialorder %v1338_v3, 8.507059e+37  ;;  %vm1374_vm5 = vweird.f32 %v4414_v28  ;;  %v5160_v23 = vld [vmem:[#allocation31_spill] sm:$0xff]  ;;  %v5165_v3 = vld [vmem:[#allocation89_spill] sm:$0xff] }
 0x2b2   :  { %v1330_v57 = vmul.f32 %v3002_v36, %v4408_v26  ;;  %v1294_v8 = vmul.f32 %v3000_v16, %v1293_v12  ;;  %vm1335_vm13 = vweird.f32 %v3002_v36  ;;  %v5161_v42 = vld [vmem:[#allocation35_spill] sm:$0xff] }
 0x2b3   :  { %vm1336_vm2 = vmor %vm1334_vm15, %vm1335_vm13 }
 0x2b4   :  { %v1331_v62 = vsub.f32 1.0, %v1330_v57  ;;  %v4437_v0 = vpop.eup %3003  ;;  %v1295_v5 = vadd.f32 %v3000_v16, %v1294_v8 }
 0x2b5   :  { %v1370_v15 = vmul.f32 %v4437_v0, %v4414_v28  ;;  %vm1375_vm4 = vweird.f32 %v4437_v0 }
 0x2b6   :  { %v3006_v32 = vpop.eup %3005  ;;  %v1332_v18 = vmul.f32 %v3002_v36, %v1331_v62  ;;  %v1299_v12 = vsel %vm1298_vm0, %v3000_v16, %v1295_v5  ;;  %vm1376_vm6 = vmor %vm1374_vm5, %vm1375_vm4  ;;  %v5168_v5 = vld [vmem:[#allocation92_spill] sm:$0xff] }
 0x2b7   :  { %v1392_v4 = vmul.f32 %v3006_v32, %v1367_v61  ;;  %v3008_v13 = vpop.eup %3007  ;;  %v1371_v9 = vsub.f32 1.0, %v1370_v15  ;;  %v1304_v58 = vsel %vm1301_vm1, %v1303_v60, %v1299_v12  ;;  %v5166_v32 = vld [vmem:[#allocation90_spill] sm:$0xff]  ;;  %v5169_v15 = vld [vmem:[#allocation93_spill] sm:$0xff]  ;;  %v5171_v60 = vld [vmem:[#allocation95_spill] sm:$0xff] }
 0x2b8   :  { %v1333_v57 = vadd.f32 %v3002_v36, %v1332_v18  ;;  %v1387_v8 = vmul.f32 %v3008_v13, %v1304_v58  ;;  %v5167_v18 = vld [vmem:[#allocation91_spill] sm:$0xff]  ;;  %v5170_v61 = vld [vmem:[#allocation94_spill] sm:$0xff]  ;;  %v5173_v13 = vld [vmem:[#allocation44_spill] sm:$0xff] }
 0x2b9   :  { %1419 = vmatmul.f32.vlgmr.msra.gmra.mxu0 %v1392_v4  ;;  %1442 = vmatmul.f32.vlgmr.msra.gmra.mxu1 %v1392_v4  ;;  %v1372_v11 = vmul.f32 %v4437_v0, %v1371_v9  ;;  %v5175_v9 = vld [vmem:[#allocation45_spill] sm:$0xff] }
 0x2ba   :  { %v1337_v62 = vsel %vm1336_vm2, %v3002_v36, %v1333_v57  ;;  %1465 = vmatmul.f32.vlgmr.msra.gmra.mxu2 %v1392_v4  ;;  %1488 = vmatmul.f32.vlgmr.msra.gmra.mxu3 %v1392_v4  ;;  %v5159_v36 = vld [vmem:[#allocation85_spill] sm:$0xff]  ;;  %v5174_v57 = vld [vmem:[#allocation83_spill] sm:$0xff] }
 0x2bb   :  { %v1342_v26 = vsel %vm1339_vm3, %v1341_v2, %v1337_v62  ;;  %1873 = vmatpush.msra.mxu0 %v4046_v51  ;;  %1896 = vmatpush.msra.mxu1 %v4049_v46  ;;  %v1373_v51 = vadd.f32 %v4437_v0, %v1372_v11  ;;  %v1380_v46 = vand.u32 2147483648, %v4414_v28  ;;  %v5172_v4 = vld [vmem:[#allocation81_spill] sm:$0xff]  ;;  %v440_v2 = vadd.f32 %v5175_v9, %v5174_v57  ;;  %v5178_v9 = vld [vmem:[#allocation48_spill] sm:$0xff] }
 0x2bc   :  { %v1385_v16 = vmul.f32 %v1342_v26, %v4227_v6  ;;  %1919 = vmatpush.msra.mxu2 %v4054_v29  ;;  %1942 = vmatpush.msra.mxu3 %v4057_v44  ;;  %v1378_v29 = vand.u32 2147483647, %v4414_v28  ;;  %v5157_v6 = vld [vmem:[#allocation34_spill] sm:$0xff]  ;;  %v5158_v28 = vld [vmem:[#allocation36_spill] sm:$0xff]  ;;  %v391_v12 = vadd.f32 %v5173_v13, %v5172_v4 }
 0x2bd   :  { %1874 = vmatpush.msra.mxu0 %v4064_v35  ;;  %1897 = vmatpush.msra.mxu1 %v4067_v40  ;;  %v1377_v44 = vsel %vm1376_vm6, %v4437_v0, %v1373_v51  ;;  %v1381_v35 = vor.u32 1.1754944e-38, %v1380_v46  ;;  %v5163_v0 = vld [vmem:[#allocation87_spill] sm:$0xff]  ;;  %v5176_v46 = vld [vmem:[#allocation29_spill] sm:$0xff] }
 0x2be   :  { %v4454_v58 = vadd.f32 %v1387_v8, %v1385_v16  ;;  %1920 = vmatpush.msra.mxu2 %v4073_v48  ;;  %1943 = vmatpush.msra.mxu3 %v4076_v34  ;;  %vm1379_vm7 = vcmp.eq.f32.partialorder %v1378_v29, 8.507059e+37  ;;  %v5177_v29 = vld [vmem:[#allocation47_spill] sm:$0xff] }
 0x2bf   :  { %1875 = vmatpush.msra.mxu0 %v4079_v1  ;;  %1898 = vmatpush.msra.mxu1 %v4082_v37  ;;  %v1382_v48 = vsel %vm1379_vm7, %v1381_v35, %v1377_v44  ;;  %v5144_v1 = vld [vmem:[#allocation19_spill] sm:$0xff]  ;;  %v5145_v37 = vld [vmem:[#allocation20_spill] sm:$0xff]  ;;  %v538_v44 = vadd.f32 %v5177_v29, %v5176_v46 }
 0x2c0   :  { %3009 = vtanh.f32 %v4454_v58  ;;  %1921 = vmatpush.msra.mxu2 %v4085_v33  ;;  %1944 = vmatpush.msra.mxu3 %v4088_v41  ;;  %v5146_v33 = vld [vmem:[#allocation21_spill] sm:$0xff] }
 0x2c1   :  { %1876 = vmatpush.msra.mxu0 %v4091_v49  ;;  %1899 = vmatpush.msra.mxu1 %v4094_v38  ;;  %v5147_v41 = vld [vmem:[#allocation25_spill] sm:$0xff]  ;;  %v5148_v49 = vld [vmem:[#allocation22_spill] sm:$0xff]  ;;  %v5149_v38 = vld [vmem:[#allocation23_spill] sm:$0xff] }
 0x2c2   :  { %1922 = vmatpush.msra.mxu2 %v4247_v7  ;;  %1945 = vmatpush.msra.mxu3 %v4098_v55  ;;  %v5150_v55 = vld [vmem:[#allocation24_spill] sm:$0xff] }
 0x2c3   :  { %1877 = vmatpush.msra.mxu0 %v4101_v53  ;;  %1900 = vmatpush.msra.mxu1 %v4104_v25  ;;  %v5151_v53 = vld [vmem:[#allocation27_spill] sm:$0xff]  ;;  %v5152_v25 = vld [vmem:[#allocation26_spill] sm:$0xff] }
 0x2c4   :  { %1923 = vmatpush.msra.mxu2 %v4253_v20  ;;  %1946 = vmatpush.msra.mxu3 %v4108_v39  ;;  %v5153_v39 = vld [vmem:[#allocation17_spill] sm:$0xff] }
 0x2c5   :  { %1878 = vmatpush.msra.mxu0 %v4111_v50  ;;  %1901 = vmatpush.msra.mxu1 %v4114_v43  ;;  %v5154_v50 = vld [vmem:[#allocation30_spill] sm:$0xff]  ;;  %v5155_v43 = vld [vmem:[#allocation32_spill] sm:$0xff] }
 0x2c6   :  { %v3010_v40 = vpop.eup %3009  ;;  %1924 = vmatpush.msra.mxu2 %v4259_v21  ;;  %1947 = vmatpush.msra.mxu3 %v4118_v47  ;;  %v5156_v47 = vld [vmem:[#allocation33_spill] sm:$0xff] }
 0x2c7   :  { %v1393_v34 = vmul.f32 %v3010_v40, %v1382_v48  ;;  %1879 = vmatpush.msra.mxu0 %v4263_v22  ;;  %1902 = vmatpush.msra.mxu1 %v4266_v24 }
 0x2c8   :  { %1925 = vmatpush.msra.mxu2 %v4269_v27  ;;  %1948 = vmatpush.msra.mxu3 %v4272_v45 }
 0x2c9   :  { %1422 = vmatmul.f32.gmra.mxu0 %v1393_v34  ;;  %1445 = vmatmul.f32.gmra.mxu1 %v1393_v34 }
 0x2ca   :  { %1468 = vmatmul.f32.gmra.mxu2 %v1393_v34  ;;  %1491 = vmatmul.f32.gmra.mxu3 %v1393_v34 }
 0x2cb   :  { %1880 = vmatpush.msra.mxu0 %v4275_v19  ;;  %1903 = vmatpush.msra.mxu1 %v4278_v52 }
 0x2cc   :  { %1926 = vmatpush.msra.mxu2 %v4281_v10  ;;  %1949 = vmatpush.msra.mxu3 %v4284_v30 }
 0x2cd   :  { %1881 = vmatpush.msra.mxu0 %v4287_v63  ;;  %1904 = vmatpush.msra.mxu1 %v4290_v56 }
 0x2ce   :  { %1927 = vmatpush.msra.mxu2 %v4293_v31  ;;  %1950 = vmatpush.msra.mxu3 %v4296_v54 }
 0x2cf   :  { %1882 = vmatpush.msra.mxu0 %v5144_v1  ;;  %1905 = vmatpush.msra.mxu1 %v5145_v37 }
 0x2d0   :  { %1928 = vmatpush.msra.mxu2 %v5146_v33  ;;  %1951 = vmatpush.msra.mxu3 %v5147_v41 }
 0x2d1   :  { %1883 = vmatpush.msra.mxu0 %v5148_v49  ;;  %1906 = vmatpush.msra.mxu1 %v5149_v38 }
 0x2d2   :  { %1929 = vmatpush.msra.mxu2 %v5150_v55  ;;  %1952 = vmatpush.msra.mxu3 %v5151_v53 }
 0x2d3   :  { %1884 = vmatpush.msra.mxu0 %v5152_v25  ;;  %1907 = vmatpush.msra.mxu1 %v5153_v39 }
 0x2d4   :  { %1930 = vmatpush.msra.mxu2 %v5154_v50  ;;  %1953 = vmatpush.msra.mxu3 %v5155_v43 }
 0x2d5   :  { %1885 = vmatpush.msra.mxu0 %v5156_v47  ;;  %1908 = vmatpush.msra.mxu1 %v5157_v6 }
 0x2d6   :  { %1931 = vmatpush.msra.mxu2 %v5158_v28  ;;  %1954 = vmatpush.msra.mxu3 %v5159_v36 }
 0x2d7   :  { %1886 = vmatpush.msra.mxu0 %v5160_v23  ;;  %1909 = vmatpush.msra.mxu1 %v5161_v42 }
 0x2d8   :  { %1932 = vmatpush.msra.mxu2 %v5162_v17  ;;  %1955 = vmatpush.msra.mxu3 %v5163_v0 }
 0x2d9   :  { %1887 = vmatpush.msra.mxu0 %v5164_v14  ;;  %1910 = vmatpush.msra.mxu1 %v5165_v3  ;;  %v5182_v3 = vld [vmem:[#allocation37_spill] sm:$0xff] }
 0x2da   :  { %1933 = vmatpush.msra.mxu2 %v5166_v32  ;;  %1956 = vmatpush.msra.mxu3 %v5167_v18 }
 0x2db   :  { %1888 = vmatpush.msra.mxu0 %v5168_v5  ;;  %1911 = vmatpush.msra.mxu1 %v5169_v15 }
 0x2dc   :  { %1934 = vmatpush.msra.mxu2 %v5170_v61  ;;  %1957 = vmatpush.msra.mxu3 %v5171_v60 }
 0x336   :  { %v1420_v62 = vpop.f32.mrf.mxu0  ;;  %v1443_v8 = vpop.f32.mrf.mxu1 }
 0x337   :  { %v1495_v26 = vadd.f32 %v1420_v62, %v391_v12  ;;  %v1496_v11 = vadd.f32 %v1443_v8, %v440_v2  ;;  %v393_v12 = vadd.f32 %v5178_v9, %v5172_v4  ;;  %v5179_v2 = vld [vmem:[#allocation49_spill] sm:$0xff] }
 0x338   :  { %v442_v62 = vadd.f32 %v5179_v2, %v5174_v57  ;;  %v5181_v2 = vld [vmem:[#allocation51_spill] sm:$0xff] }
 0x339   :  { %v2813_v16 = vmul.f32 -1.442695, %v1495_v26  ;;  %v2815_v51 = vmul.f32 -1.442695, %v1496_v11  ;;  %v540_v57 = vadd.f32 %v5181_v2, %v5176_v46 }
 0x33b   :  { %3011 = vpow2.f32 %v2813_v16 }
 0x33c   :  { %3013 = vpow2.f32 %v2815_v51 }
 0x33d   :  { %v1489_v35 = vpop.f32.mrf.mxu3  ;;  %v1466_v11 = vpop.f32.mrf.mxu2 }
 0x33e   :  { %v1498_v40 = vadd.f32 %v1489_v35, %v538_v44  ;;  %v5180_v44 = vld [vmem:[#allocation46_spill] sm:$0xff] }
 0x33f   :  { %v489_v35 = vadd.f32 %v5180_v44, %v5097_v59 }
 0x340   :  { %v2817_v48 = vmul.f32 -1.442695, %v1498_v40 }
 0x341   :  { %v3012_v34 = vpop.eup %3011  ;;  %v1497_v15 = vadd.f32 %v1466_v11, %v489_v35 }
 0x342   :  { %v3014_v60 = vpop.eup %3013  ;;  %v1509_v13 = vadd.f32 1.0, %v3012_v34  ;;  %3015 = vpow2.f32 %v2817_v48 }
 0x343   :  { %v1547_v61 = vadd.f32 1.0, %v3014_v60 }
 0x344   :  { %3017 = vrcp.f32 %v1509_v13  ;;  %vm1516_vm11 = vweird.f32 %v1509_v13 }
 0x345   :  { %3019 = vrcp.f32 %v1547_v61  ;;  %v1558_v11 = vand.u32 2147483647, %v1547_v61  ;;  %vm1554_vm10 = vweird.f32 %v1547_v61 }
 0x346   :  { %v1423_v8 = vpop.f32.mrf.mxu0  ;;  %v1446_v26 = vpop.f32.mrf.mxu1 }
 0x347   :  { %v1499_v16 = vadd.f32 %v1423_v8, %v393_v12  ;;  %v1500_v51 = vadd.f32 %v1446_v26, %v442_v62  ;;  %v1520_v62 = vand.u32 2147483647, %v1509_v13  ;;  %vm1559_vm15 = vcmp.eq.f32.partialorder %v1558_v11, 8.507059e+37 }
 0x348   :  { %v3016_v29 = vpop.eup %3015 }
 0x349   :  { %v4533_v40 = vadd.f32 1.0, %v3016_v29  ;;  %v2814_v60 = vmul.f32 -1.442695, %v1499_v16  ;;  %v2816_v48 = vmul.f32 -1.442695, %v1500_v51  ;;  %v1522_v29 = vand.u32 2147483648, %v1509_v13 }
 0x34a   :  { %v3018_v34 = vpop.eup %3017  ;;  %v1560_v51 = vand.u32 2147483648, %v1547_v61  ;;  %vm1521_vm12 = vcmp.eq.f32.partialorder %v1520_v62, 8.507059e+37 }
 0x34b   :  { %v3020_v9 = vpop.eup %3019  ;;  %v1512_v4 = vmul.f32 %v3018_v34, %v1509_v13  ;;  %3021 = vrcp.f32 %v4533_v40  ;;  %vm1517_vm8 = vweird.f32 %v3018_v34  ;;  %vm1594_vm1 = vweird.f32 %v4533_v40 }
 0x34c   :  { %v1550_v5 = vmul.f32 %v3020_v9, %v1547_v61  ;;  %3023 = vpow2.f32 %v2814_v60  ;;  %vm1555_vm9 = vweird.f32 %v3020_v9  ;;  %vm1518_vm13 = vmor %vm1516_vm11, %vm1517_vm8  ;;  %v1523_v60 = vor.u32 1.1754944e-38, %v1522_v29 }
 0x34d   :  { %v1513_v12 = vsub.f32 1.0, %v1512_v4  ;;  %3025 = vpow2.f32 %v2816_v48  ;;  %v1492_v8 = vpop.f32.mrf.mxu3  ;;  %vm1556_vm14 = vmor %vm1554_vm10, %vm1555_vm9  ;;  %v1469_v0 = vpop.f32.mrf.mxu2 }
 0x34e   :  { %v1551_v26 = vsub.f32 1.0, %v1550_v5  ;;  %3027 = vtanh.f32 %v1497_v15  ;;  %v1502_v16 = vadd.f32 %v1492_v8, %v540_v57  ;;  %v1561_v57 = vor.u32 1.1754944e-38, %v1560_v51 }
 0x34f   :  { %v1514_v44 = vmul.f32 %v3018_v34, %v1513_v12 }
 0x350   :  { %v1552_v35 = vmul.f32 %v3020_v9, %v1551_v26  ;;  %v2818_v18 = vmul.f32 -1.442695, %v1502_v16 }
 0x351   :  { %v3022_v32 = vpop.eup %3021  ;;  %v1515_v2 = vadd.f32 %v3018_v34, %v1514_v44 }
 0x352   :  { %v3024_v4 = vpop.eup %3023  ;;  %v1553_v48 = vadd.f32 %v3020_v9, %v1552_v35  ;;  %v1590_v5 = vmul.f32 %v3022_v32, %v4533_v40  ;;  %3029 = vpow2.f32 %v2818_v18  ;;  %vm1595_vm0 = vweird.f32 %v3022_v32 }
 0x353   :  { %v3026_v15 = vpop.eup %3025  ;;  %v1519_v12 = vsel %vm1518_vm13, %v3018_v34, %v1515_v2  ;;  %v1510_v8 = vadd.f32 1.0, %v3024_v4  ;;  %v5183_v34 = vld [vmem:[#allocation50_spill] sm:$0xff]  ;;  %v1598_v2 = vand.u32 2147483647, %v4533_v40  ;;  %vm4550_vm2 = vmor %vm1594_vm1, %vm1595_vm0 }
 0x354   :  { %v3028_v26 = vpop.eup %3027  ;;  %v1524_v16 = vsel %vm1521_vm12, %v1523_v60, %v1519_v12  ;;  %v1557_v46 = vsel %vm1556_vm14, %v3020_v9, %v1553_v48  ;;  %v1591_v61 = vsub.f32 1.0, %v1590_v5  ;;  %v1548_v44 = vadd.f32 1.0, %v3026_v15 }
 0x355   :  { %v1562_v13 = vsel %vm1559_vm15, %v1561_v57, %v1557_v46  ;;  %v1621_v62 = vmul.f32 %v3028_v26, %v1524_v16  ;;  %3031 = vrcp.f32 %v1510_v8  ;;  %v491_v51 = vadd.f32 %v5183_v34, %v5097_v59 }
 0x356   :  { %v1619_v29 = vmul.f32 %v1562_v13, %v5182_v3  ;;  %v1592_v35 = vmul.f32 %v3022_v32, %v1591_v61  ;;  %3033 = vrcp.f32 %v1548_v44  ;;  %v1600_v9 = vand.u32 2147483648, %v4533_v40 }
 0x357   :  { %v1501_v4 = vadd.f32 %v1469_v0, %v491_v51  ;;  %vm1599_vm3 = vcmp.eq.f32.partialorder %v1598_v2, 8.507059e+37  ;;  %v1575_v16 = vand.u32 2147483648, %v1548_v44  ;;  %v1537_v61 = vand.u32 2147483648, %v1510_v8  ;;  %v4611_v2 = vld [vmem:[#allocation9 + $0x180] sm:$0xff] }
 0x358   :  { %v3030_v14 = vpop.eup %3029  ;;  %v4540_v18 = vadd.f32 %v1621_v62, %v1619_v29  ;;  %v1593_v11 = vadd.f32 %v3022_v32, %v1592_v35  ;;  %v1535_v13 = vand.u32 2147483647, %v1510_v8  ;;  %v1573_v35 = vand.u32 2147483647, %v1548_v44 }
 0x359   :  { %v4546_v46 = vadd.f32 1.0, %v3030_v14  ;;  %v1601_v14 = vor.u32 1.1754944e-38, %v1600_v9  ;;  %vm1531_vm6 = vweird.f32 %v1510_v8  ;;  %vm1569_vm7 = vweird.f32 %v1548_v44 }
 0x35a   :  { %3035 = vtanh.f32 %v4540_v18  ;;  %v1597_v57 = vsel %vm4550_vm2, %v3022_v32, %v1593_v11  ;;  %v1538_v32 = vor.u32 1.1754944e-38, %v1537_v61  ;;  %vm1536_vm10 = vcmp.eq.f32.partialorder %v1535_v13, 8.507059e+37  ;;  %v4576_v61 = vld [vmem:[#allocation9 + $0x1f8] sm:$0xff]  ;;  %v4584_v13 = vld [vmem:[#allocation9 + $0x1c8] sm:$0xff] }
 0x35b   :  { %v3032_v3 = vpop.eup %3031  ;;  %3037 = vrcp.f32 %v4546_v46  ;;  %v1602_v62 = vsel %vm1599_vm3, %v1601_v14, %v1597_v57  ;;  %vm1574_vm11 = vcmp.eq.f32.partialorder %v1573_v35, 8.507059e+37  ;;  %v4567_v14 = vld [vmem:[#allocation9 + $0x1e0] sm:$0xff]  ;;  %vm1609_vm13 = vweird.f32 %v4546_v46 }
 0x35c   :  { %v3034_v60 = vpop.eup %3033  ;;  %v1527_v5 = vmul.f32 %v3032_v3, %v1510_v8  ;;  %3039 = vtanh.f32 %v1501_v4  ;;  %vm1532_vm4 = vweird.f32 %v3032_v3  ;;  %v1576_v4 = vor.u32 1.1754944e-38, %v1575_v16  ;;  %v4573_v16 = vld [vmem:[#allocation9 + $0x1f0] sm:$0xff] }
 0x35d   :  { %v1565_v15 = vmul.f32 %v3034_v60, %v1548_v44  ;;  %vm1570_vm5 = vweird.f32 %v3034_v60  ;;  %vm1533_vm8 = vmor %vm1531_vm6, %vm1532_vm4 }
 0x35e   :  { %v1528_v12 = vsub.f32 1.0, %v1527_v5  ;;  %vm4561_vm9 = vmor %vm1569_vm7, %vm1570_vm5 }
 0x35f   :  { %v1566_v26 = vsub.f32 1.0, %v1565_v15 }
 0x360   :  { %v3036_v0 = vpop.eup %3035  ;;  %v1529_v40 = vmul.f32 %v3032_v3, %v1528_v12  ;;  %v4570_v12 = vld [vmem:[#allocation9 + $0x1e8] sm:$0xff] }
 0x361   :  { %v1567_v29 = vmul.f32 %v3034_v60, %v1566_v26  ;;  %v1627_v34 = vmul.f32 %v3036_v0, %v1602_v62  ;;  %v4557_v51 = vpop.eup %3037  ;;  %v4587_v62 = vld [vmem:[#allocation9 + $0x1d0] sm:$0xff] }
 0x362   :  { %v1530_v48 = vadd.f32 %v3032_v3, %v1529_v40  ;;  %v1605_v9 = vmul.f32 %v4557_v51, %v4546_v46  ;;  %v3040_v15 = vpop.eup %3039  ;;  %v4581_v40 = vld [vmem:[#allocation9 + $0x1c0] sm:$0xff]  ;;  %vm1610_vm12 = vweird.f32 %v4557_v51 }
 0x363   :  { %v1568_v11 = vadd.f32 %v3034_v60, %v1567_v29  ;;  %1654 = vmatmul.f32.vlgmr.msrb.gmra.mxu0 %v1627_v34  ;;  %1677 = vmatmul.f32.vlgmr.msrb.gmra.mxu1 %v1627_v34  ;;  %v4590_v29 = vld [vmem:[#allocation9 + $0x1d8] sm:$0xff]  ;;  %vm4625_vm14 = vmor %vm1609_vm13, %vm1610_vm12 }
 0x364   :  { %v1534_v5 = vsel %vm1533_vm8, %v3032_v3, %v1530_v48  ;;  %1700 = vmatmul.f32.vlgmr.msrb.gmra.mxu2 %v1627_v34  ;;  %1723 = vmatmul.f32.vlgmr.msrb.gmra.mxu3 %v1627_v34  ;;  %v1606_v57 = vsub.f32 1.0, %v1605_v9  ;;  %v4598_v34 = vld [vmem:[#allocation9 + $0x1a8] sm:$0xff]  ;;  %v1615_v9 = vand.u32 2147483648, %v4546_v46 }
 0x365   :  { %v1539_v8 = vsel %vm1536_vm10, %v1538_v32, %v1534_v5  ;;  %v1572_v44 = vsel %vm4561_vm9, %v3034_v60, %v1568_v11  ;;  %2108 = vmatpush.msrb.mxu0 %v4567_v14  ;;  %2131 = vmatpush.msrb.mxu1 %v4570_v12  ;;  %v4603_v32 = vld [vmem:[#allocation9 + $0x1b0] sm:$0xff]  ;;  %v4606_v11 = vld [vmem:[#allocation9 + $0x1b8] sm:$0xff]  ;;  %v1613_v5 = vand.u32 2147483647, %v4546_v46 }
 0x366   :  { %v1577_v26 = vsel %vm1574_vm11, %v1576_v4, %v1572_v44  ;;  %v1622_v3 = vmul.f32 %v3040_v15, %v1539_v8  ;;  %2154 = vmatpush.msrb.mxu2 %v4573_v16  ;;  %2177 = vmatpush.msrb.mxu3 %v4576_v61  ;;  %v1607_v0 = vmul.f32 %v4557_v51, %v1606_v57  ;;  %v4614_v4 = vld [vmem:[#allocation9 + $0x188] sm:$0xff]  ;;  %v4620_v15 = vld [vmem:[#allocation9 + $0x198] sm:$0xff]  ;;  %v4629_v44 = vld [vmem:[#allocation9 + $0x160] sm:$0xff] }
 0x367   :  { %v1620_v60 = vmul.f32 %v1577_v26, %v4454_v58  ;;  %2109 = vmatpush.msrb.mxu0 %v4581_v40  ;;  %2132 = vmatpush.msrb.mxu1 %v4584_v13  ;;  %v4595_v58 = vld [vmem:[#allocation9 + $0x1a0] sm:$0xff]  ;;  %v4632_v57 = vld [vmem:[#allocation9 + $0x168] sm:$0xff]  ;;  %v4639_v46 = vld [vmem:[#allocation9 + $0x178] sm:$0xff]  ;;  %v1616_v26 = vor.u32 1.1754944e-38, %v1615_v9  ;;  %vm1614_vm15 = vcmp.eq.f32.partialorder %v1613_v5, 8.507059e+37 }
 0x368   :  { %2155 = vmatpush.msrb.mxu2 %v4587_v62  ;;  %2178 = vmatpush.msrb.mxu3 %v4590_v29  ;;  %v1608_v48 = vadd.f32 %v4557_v51, %v1607_v0  ;;  %v4649_v0 = vld [vmem:[#allocation9 + $0x158] sm:$0xff]  ;;  %v5206_v5 = vld [vmem:[#allocation57_spill] sm:$0xff] }
 0x369   :  { %v4593_v35 = vadd.f32 %v1622_v3, %v1620_v60  ;;  %2110 = vmatpush.msrb.mxu0 %v4595_v58  ;;  %2133 = vmatpush.msrb.mxu1 %v4598_v34  ;;  %v4642_v3 = vld [vmem:[#allocation9 + $0x140] sm:$0xff]  ;;  %v4645_v60 = vld [vmem:[#allocation9 + $0x148] sm:$0xff] }
 0x36a   :  { %2156 = vmatpush.msrb.mxu2 %v4603_v32  ;;  %2179 = vmatpush.msrb.mxu3 %v4606_v11 }
 0x36b   :  { %3041 = vtanh.f32 %v4593_v35  ;;  %2111 = vmatpush.msrb.mxu0 %v4611_v2  ;;  %2134 = vmatpush.msrb.mxu1 %v4614_v4 }
 0x36c   :  { %2157 = vmatpush.msrb.mxu2 %v4247_v7  ;;  %2180 = vmatpush.msrb.mxu3 %v4620_v15  ;;  %v1612_v7 = vsel %vm4625_vm14, %v4557_v51, %v1608_v48 }
 0x36d   :  { %2112 = vmatpush.msrb.mxu0 %v4629_v44  ;;  %2135 = vmatpush.msrb.mxu1 %v4632_v57  ;;  %v1617_v51 = vsel %vm1614_vm15, %v1616_v26, %v1612_v7 }
 0x36e   :  { %2158 = vmatpush.msrb.mxu2 %v4253_v20  ;;  %2181 = vmatpush.msrb.mxu3 %v4639_v46 }
 0x36f   :  { %2113 = vmatpush.msrb.mxu0 %v4642_v3  ;;  %2136 = vmatpush.msrb.mxu1 %v4645_v60 }
 0x370   :  { %2159 = vmatpush.msrb.mxu2 %v4259_v21  ;;  %2182 = vmatpush.msrb.mxu3 %v4649_v0  ;;  %v5190_v21 = vld [vmem:[#allocation87_spill] sm:$0xff] }
 0x371   :  { %v3042_v20 = vpop.eup %3041  ;;  %2114 = vmatpush.msrb.mxu0 %v4263_v22  ;;  %2137 = vmatpush.msrb.mxu1 %v4266_v24  ;;  %v5191_v22 = vld [vmem:[#allocation88_spill] sm:$0xff]  ;;  %v5192_v24 = vld [vmem:[#allocation89_spill] sm:$0xff] }
 0x372   :  { %v1628_v48 = vmul.f32 %v3042_v20, %v1617_v51  ;;  %2160 = vmatpush.msrb.mxu2 %v4269_v27  ;;  %2183 = vmatpush.msrb.mxu3 %v4272_v45  ;;  %v5193_v27 = vld [vmem:[#allocation90_spill] sm:$0xff]  ;;  %v5194_v45 = vld [vmem:[#allocation91_spill] sm:$0xff] }
 0x373   :  { %2115 = vmatpush.msrb.mxu0 %v4275_v19  ;;  %2138 = vmatpush.msrb.mxu1 %v4278_v52  ;;  %v5195_v19 = vld [vmem:[#allocation92_spill] sm:$0xff]  ;;  %v5196_v52 = vld [vmem:[#allocation93_spill] sm:$0xff] }
 0x374   :  { %1657 = vmatmul.f32.gmra.mxu0 %v1628_v48  ;;  %1680 = vmatmul.f32.gmra.mxu1 %v1628_v48 }
 0x375   :  { %1703 = vmatmul.f32.gmra.mxu2 %v1628_v48  ;;  %1726 = vmatmul.f32.gmra.mxu3 %v1628_v48  ;;  %v5207_v48 = vld [vmem:[#allocation54_spill] sm:$0xff] }
 0x376   :  { %2161 = vmatpush.msrb.mxu2 %v4281_v10  ;;  %2184 = vmatpush.msrb.mxu3 %v4284_v30  ;;  %v5197_v10 = vld [vmem:[#allocation94_spill] sm:$0xff]  ;;  %v5198_v30 = vld [vmem:[#allocation95_spill] sm:$0xff] }
 0x377   :  { %2116 = vmatpush.msrb.mxu0 %v4287_v63  ;;  %2139 = vmatpush.msrb.mxu1 %v4290_v56  ;;  %v5199_v63 = vld [vmem:[#allocation81_spill] sm:$0xff]  ;;  %v5200_v56 = vld [vmem:[#allocation52_spill] sm:$0xff] }
 0x378   :  { %2162 = vmatpush.msrb.mxu2 %v4293_v31  ;;  %2185 = vmatpush.msrb.mxu3 %v4296_v54  ;;  %v396_v31 = vadd.f32 %v5200_v56, %v5199_v63  ;;  %v5201_v54 = vld [vmem:[#allocation83_spill] sm:$0xff] }
 0x379   :  { %2117 = vmatpush.msrb.mxu0 %v5144_v1  ;;  %2140 = vmatpush.msrb.mxu1 %v5145_v37  ;;  %v5202_v1 = vld [vmem:[#allocation53_spill] sm:$0xff]  ;;  %v447_v8 = vadd.f32 %v5206_v5, %v5201_v54 }
 0x37a   :  { %2163 = vmatpush.msrb.mxu2 %v5146_v33  ;;  %2186 = vmatpush.msrb.mxu3 %v5147_v41  ;;  %v445_v37 = vadd.f32 %v5202_v1, %v5201_v54  ;;  %v5208_v1 = vld [vmem:[#allocation59_spill] sm:$0xff] }
 0x37b   :  { %2118 = vmatpush.msrb.mxu0 %v5148_v49  ;;  %2141 = vmatpush.msrb.mxu1 %v5149_v38 }
 0x37c   :  { %2164 = vmatpush.msrb.mxu2 %v5150_v55  ;;  %2187 = vmatpush.msrb.mxu3 %v5151_v53 }
 0x37d   :  { %2119 = vmatpush.msrb.mxu0 %v5152_v25  ;;  %2142 = vmatpush.msrb.mxu1 %v5153_v39  ;;  %v5203_v25 = vld [vmem:[#allocation29_spill] sm:$0xff]  ;;  %v5204_v39 = vld [vmem:[#allocation55_spill] sm:$0xff] }
 0x37e   :  { %2165 = vmatpush.msrb.mxu2 %v5154_v50  ;;  %2188 = vmatpush.msrb.mxu3 %v5155_v43  ;;  %v543_v50 = vadd.f32 %v5204_v39, %v5203_v25 }
 0x37f   :  { %2120 = vmatpush.msrb.mxu0 %v5156_v47  ;;  %2143 = vmatpush.msrb.mxu1 %v5157_v6 }
 0x380   :  { %2166 = vmatpush.msrb.mxu2 %v5158_v28  ;;  %2189 = vmatpush.msrb.mxu3 %v5159_v36 }
 0x381   :  { %2121 = vmatpush.msrb.mxu0 %v5160_v23  ;;  %2144 = vmatpush.msrb.mxu1 %v5161_v42 }
 0x382   :  { %2167 = vmatpush.msrb.mxu2 %v5162_v17  ;;  %2190 = vmatpush.msrb.mxu3 %v5190_v21  ;;  %v5205_v17 = vld [vmem:[#allocation56_spill] sm:$0xff]  ;;  %v494_v21 = vadd.f32 %v5207_v48, %v5097_v59 }
 0x383   :  { %2122 = vmatpush.msrb.mxu0 %v5191_v22  ;;  %2145 = vmatpush.msrb.mxu1 %v5192_v24  ;;  %v398_v9 = vadd.f32 %v5205_v17, %v5199_v63 }
 0x384   :  { %2168 = vmatpush.msrb.mxu2 %v5193_v27  ;;  %2191 = vmatpush.msrb.mxu3 %v5194_v45 }
 0x385   :  { %2123 = vmatpush.msrb.mxu0 %v5195_v19  ;;  %2146 = vmatpush.msrb.mxu1 %v5196_v52 }
 0x386   :  { %2169 = vmatpush.msrb.mxu2 %v5197_v10  ;;  %2192 = vmatpush.msrb.mxu3 %v5198_v30 }
 0x3e0   :  { %v1655_v33 = vpop.f32.mrf.mxu0  ;;  %v1678_v41 = vpop.f32.mrf.mxu1 }
 0x3e1   :  { %v1730_v49 = vadd.f32 %v1655_v33, %v396_v31  ;;  %v1731_v38 = vadd.f32 %v1678_v41, %v445_v37  ;;  %v545_v37 = vadd.f32 %v5208_v1, %v5203_v25 }
 0x3e3   :  { %v2819_v55 = vmul.f32 -1.442695, %v1730_v49  ;;  %v2821_v53 = vmul.f32 -1.442695, %v1731_v38 }
 0x3e5   :  { %3043 = vpow2.f32 %v2819_v55 }
 0x3e6   :  { %3045 = vpow2.f32 %v2821_v53 }
 0x3e7   :  { %v1724_v43 = vpop.f32.mrf.mxu3  ;;  %v1701_v7 = vpop.f32.mrf.mxu2 }
 0x3e8   :  { %v1733_v47 = vadd.f32 %v1724_v43, %v543_v50  ;;  %v1732_v19 = vadd.f32 %v1701_v7, %v494_v21 }
 0x3ea   :  { %v2823_v6 = vmul.f32 -1.442695, %v1733_v47 }
 0x3eb   :  { %v3044_v28 = vpop.eup %3043 }
 0x3ec   :  { %v3046_v36 = vpop.eup %3045  ;;  %v1744_v23 = vadd.f32 1.0, %v3044_v28  ;;  %3047 = vpow2.f32 %v2823_v6 }
 0x3ed   :  { %v1782_v42 = vadd.f32 1.0, %v3046_v36 }
 0x3ee   :  { %3049 = vrcp.f32 %v1744_v23  ;;  %v1755_v41 = vand.u32 2147483647, %v1744_v23  ;;  %v1757_v55 = vand.u32 2147483648, %v1744_v23  ;;  %vm1751_vm2 = vweird.f32 %v1744_v23 }
 0x3ef   :  { %3051 = vrcp.f32 %v1782_v42  ;;  %v1795_v38 = vand.u32 2147483648, %v1782_v42  ;;  %v1793_v50 = vand.u32 2147483647, %v1782_v42  ;;  %vm1789_vm3 = vweird.f32 %v1782_v42 }
 0x3f0   :  { %vm1756_vm4 = vcmp.eq.f32.partialorder %v1755_v41, 8.507059e+37  ;;  %v1758_v5 = vor.u32 1.1754944e-38, %v1757_v55 }
 0x3f1   :  { %v1658_v26 = vpop.f32.mrf.mxu0  ;;  %v1681_v20 = vpop.f32.mrf.mxu1  ;;  %vm1794_vm7 = vcmp.eq.f32.partialorder %v1793_v50, 8.507059e+37 }
 0x3f2   :  { %v3048_v51 = vpop.eup %3047  ;;  %v1734_v22 = vadd.f32 %v1658_v26, %v398_v9  ;;  %v1735_v24 = vadd.f32 %v1681_v20, %v447_v8  ;;  %v1796_v9 = vor.u32 1.1754944e-38, %v1795_v38 }
 0x3f3   :  { %v4704_v27 = vadd.f32 1.0, %v3048_v51 }
 0x3f4   :  { %v3050_v45 = vpop.eup %3049  ;;  %v2820_v52 = vmul.f32 -1.442695, %v1734_v22  ;;  %v2822_v10 = vmul.f32 -1.442695, %v1735_v24 }
 0x3f5   :  { %v3052_v30 = vpop.eup %3051  ;;  %v1747_v56 = vmul.f32 %v3050_v45, %v1744_v23  ;;  %3053 = vrcp.f32 %v4704_v27  ;;  %vm1752_vm0 = vweird.f32 %v3050_v45  ;;  %vm1829_vm9 = vweird.f32 %v4704_v27 }
 0x3f6   :  { %v1785_v31 = vmul.f32 %v3052_v30, %v1782_v42  ;;  %3055 = vpow2.f32 %v2820_v52  ;;  %vm1790_vm1 = vweird.f32 %v3052_v30  ;;  %vm1753_vm5 = vmor %vm1751_vm2, %vm1752_vm0 }
 0x3f7   :  { %v1748_v33 = vsub.f32 1.0, %v1747_v56  ;;  %3057 = vpow2.f32 %v2822_v10  ;;  %vm1791_vm6 = vmor %vm1789_vm3, %vm1790_vm1 }
 0x3f8   :  { %v1786_v49 = vsub.f32 1.0, %v1785_v31  ;;  %3059 = vtanh.f32 %v1732_v19  ;;  %v1727_v53 = vpop.f32.mrf.mxu3  ;;  %v1704_v31 = vpop.f32.mrf.mxu2 }
 0x3f9   :  { %v1749_v39 = vmul.f32 %v3050_v45, %v1748_v33  ;;  %v1737_v43 = vadd.f32 %v1727_v53, %v545_v37  ;;  %v3274_v53 = vld [vmem:[#allocation9 + $0xd8] sm:$0xff] }
 0x3fa   :  { %v1787_v47 = vmul.f32 %v3052_v30, %v1786_v49  ;;  %v1833_v49 = vand.u32 2147483647, %v4704_v27 }
 0x3fb   :  { %v3054_v6 = vpop.eup %3053  ;;  %v1750_v28 = vadd.f32 %v3050_v45, %v1749_v39  ;;  %v2824_v36 = vmul.f32 -1.442695, %v1737_v43 }
 0x3fc   :  { %v3056_v17 = vpop.eup %3055  ;;  %v1788_v8 = vadd.f32 %v3052_v30, %v1787_v47  ;;  %v1825_v7 = vmul.f32 %v3054_v6, %v4704_v27  ;;  %vm1830_vm8 = vweird.f32 %v3054_v6  ;;  %vm1834_vm11 = vcmp.eq.f32.partialorder %v1833_v49, 8.507059e+37  ;;  %v3270_v49 = vld [vmem:[#allocation9 + $0xf8] sm:$0xff] }
 0x3fd   :  { %v3058_v26 = vpop.eup %3057  ;;  %v1754_v20 = vsel %vm1753_vm5, %v3050_v45, %v1750_v28  ;;  %v1745_v51 = vadd.f32 1.0, %v3056_v17  ;;  %3061 = vpow2.f32 %v2824_v36  ;;  %v5209_v45 = vld [vmem:[#allocation58_spill] sm:$0xff]  ;;  %vm4721_vm10 = vmor %vm1829_vm9, %vm1830_vm8 }
 0x3fe   :  { %v3060_v48 = vpop.eup %3059  ;;  %v1759_v23 = vsel %vm1756_vm4, %v1758_v5, %v1754_v20  ;;  %v1792_v21 = vsel %vm1791_vm6, %v3052_v30, %v1788_v8  ;;  %v1826_v42 = vsub.f32 1.0, %v1825_v7  ;;  %v1783_v22 = vadd.f32 1.0, %v3058_v26 }
 0x3ff   :  { %v1797_v24 = vsel %vm1794_vm7, %v1796_v9, %v1792_v21  ;;  %v1856_v19 = vmul.f32 %v3060_v48, %v1759_v23  ;;  %3063 = vrcp.f32 %v1745_v51  ;;  %v496_v37 = vadd.f32 %v5209_v45, %v5097_v59 }
 0x400   :  { %v1854_v52 = vmul.f32 %v1797_v24, %v4540_v18  ;;  %v1827_v10 = vmul.f32 %v3054_v6, %v1826_v42  ;;  %3065 = vrcp.f32 %v1783_v22  ;;  %v1835_v30 = vand.u32 2147483648, %v4704_v27 }
 0x401   :  { %v1736_v38 = vadd.f32 %v1704_v31, %v496_v37  ;;  %v1810_v17 = vand.u32 2147483648, %v1783_v22  ;;  %v1772_v9 = vand.u32 2147483648, %v1745_v51  ;;  %v1770_v8 = vand.u32 2147483647, %v1745_v51 }
 0x402   :  { %v4711_v56 = vadd.f32 %v1856_v19, %v1854_v52  ;;  %v1828_v33 = vadd.f32 %v3054_v6, %v1827_v10  ;;  %v1836_v47 = vor.u32 1.1754944e-38, %v1835_v30  ;;  %v1808_v20 = vand.u32 2147483647, %v1783_v22  ;;  %v3268_v30 = vld [vmem:[#allocation9 + $0xe8] sm:$0xff] }
 0x403   :  { %v3062_v1 = vpop.eup %3061  ;;  %vm1766_vm14 = vweird.f32 %v1745_v51  ;;  %vm1804_vm15 = vweird.f32 %v1783_v22  ;;  %v1811_v19 = vor.u32 1.1754944e-38, %v1810_v17  ;;  %vm1771_vm2 = vcmp.eq.f32.partialorder %v1770_v8, 8.507059e+37  ;;  %v3281_v17 = vld [vmem:[#allocation9 + $0x90] sm:$0xff] }
 0x404   :  { %3067 = vtanh.f32 %v4711_v56  ;;  %v4717_v41 = vadd.f32 1.0, %v3062_v1  ;;  %v1832_v43 = vsel %vm4721_vm10, %v3054_v6, %v1828_v33  ;;  %v1773_v6 = vor.u32 1.1754944e-38, %v1772_v9  ;;  %v3282_v9 = vld [vmem:[#allocation9 + $0x98] sm:$0xff]  ;;  %v3285_v8 = vld [vmem:[#allocation9 + $0x70] sm:$0xff] }
 0x405   :  { %v3064_v18 = vpop.eup %3063  ;;  %v1837_v7 = vsel %vm1834_vm11, %v1836_v47, %v1832_v43  ;;  %vm1809_vm3 = vcmp.eq.f32.partialorder %v1808_v20, 8.507059e+37  ;;  %v3277_v43 = vld [vmem:[#allocation9 + $0xb0] sm:$0xff]  ;;  %v3278_v47 = vld [vmem:[#allocation9 + $0xb8] sm:$0xff]  ;;  %v3288_v20 = vld [vmem:[#allocation9 + $0x48] sm:$0xff] }
 0x406   :  { %v3066_v55 = vpop.eup %3065  ;;  %v1762_v39 = vmul.f32 %v3064_v18, %v1745_v51  ;;  %3069 = vrcp.f32 %v4717_v41  ;;  %vm1767_vm12 = vweird.f32 %v3064_v18  ;;  %vm1844_vm5 = vweird.f32 %v4717_v41 }
 0x407   :  { %v1800_v50 = vmul.f32 %v3066_v55, %v1783_v22  ;;  %3071 = vtanh.f32 %v1736_v38  ;;  %vm1805_vm13 = vweird.f32 %v3066_v55  ;;  %vm1768_vm0 = vmor %vm1766_vm14, %vm1767_vm12  ;;  %v3272_v38 = vld [vmem:[#allocation9 + $0xc8] sm:$0xff] }
 0x408   :  { %v1763_v28 = vsub.f32 1.0, %v1762_v39  ;;  %vm1806_vm1 = vmor %vm1804_vm15, %vm1805_vm13  ;;  %v3275_v39 = vld [vmem:[#allocation9 + $0xa0] sm:$0xff] }
 0x409   :  { %v1801_v36 = vsub.f32 1.0, %v1800_v50  ;;  %v3276_v50 = vld [vmem:[#allocation9 + $0xa8] sm:$0xff] }
 0x40a   :  { %v3068_v27 = vpop.eup %3067  ;;  %v1764_v5 = vmul.f32 %v3064_v18, %v1763_v28  ;;  %v3279_v28 = vld [vmem:[#allocation9 + $0x80] sm:$0xff] }
 0x40b   :  { %v1802_v26 = vmul.f32 %v3066_v55, %v1801_v36  ;;  %v1862_v48 = vmul.f32 %v3068_v27, %v1837_v7  ;;  %v3280_v36 = vld [vmem:[#allocation9 + $0x88] sm:$0xff]  ;;  %v3283_v27 = vld [vmem:[#allocation9 + $0x60] sm:$0xff]  ;;  %v3286_v7 = vld [vmem:[#allocation9 + $0x78] sm:$0xff] }
 0x40c   :  { %v4728_v23 = vpop.eup %3069  ;;  %v1765_v21 = vadd.f32 %v3064_v18, %v1764_v5  ;;  %v3284_v5 = vld [vmem:[#allocation9 + $0x68] sm:$0xff] }
 0x40d   :  { %v1803_v42 = vadd.f32 %v3066_v55, %v1802_v26  ;;  %v1840_v24 = vmul.f32 %v4728_v23, %v4717_v41  ;;  %1889 = vmatmul.f32.vlgmr.msra.gmra.mxu0 %v1862_v48  ;;  %1912 = vmatmul.f32.vlgmr.msra.gmra.mxu1 %v1862_v48  ;;  %v3072_v10 = vpop.eup %3071  ;;  %vm1845_vm4 = vweird.f32 %v4728_v23  ;;  %v3287_v26 = vld [vmem:[#allocation9 + $0x40] sm:$0xff] }
 0x40e   :  { %v1769_v52 = vsel %vm1768_vm0, %v3064_v18, %v1765_v21  ;;  %1935 = vmatmul.f32.vlgmr.msra.gmra.mxu2 %v1862_v48  ;;  %1958 = vmatmul.f32.vlgmr.msra.gmra.mxu3 %v1862_v48  ;;  %vm4757_vm6 = vmor %vm1844_vm5, %vm1845_vm4  ;;  %v3271_v18 = vld [vmem:[#allocation9 + $0xc0] sm:$0xff]  ;;  %v3289_v48 = vld [vmem:[#allocation9 + $0x50] sm:$0xff] }
 0x40f   :  { %v1774_v31 = vsel %vm1771_vm2, %v1773_v6, %v1769_v52  ;;  %v1807_v1 = vsel %vm1806_vm1, %v3066_v55, %v1803_v42  ;;  %v1841_v51 = vsub.f32 1.0, %v1840_v24  ;;  %2343 = vmatpush.msra.mxu0 %v4567_v14  ;;  %2366 = vmatpush.msra.mxu1 %v4570_v12  ;;  %v3273_v55 = vld [vmem:[#allocation9 + $0xd0] sm:$0xff]  ;;  %v3291_v21 = vld [vmem:[#allocation9 + $0x20] sm:$0xff]  ;;  %v3292_v6 = vld [vmem:[#allocation9 + $0x28] sm:$0xff] }
 0x410   :  { %v1812_v22 = vsel %vm1809_vm3, %v1811_v19, %v1807_v1  ;;  %v1857_v45 = vmul.f32 %v3072_v10, %v1774_v31  ;;  %2389 = vmatpush.msra.mxu2 %v4573_v16  ;;  %2412 = vmatpush.msra.mxu3 %v4576_v61  ;;  %v1850_v16 = vand.u32 2147483648, %v4717_v41  ;;  %v1848_v61 = vand.u32 2147483647, %v4717_v41  ;;  %v3269_v41 = vld [vmem:[#allocation9 + $0xf0] sm:$0xff]  ;;  %v3294_v24 = vld [vmem:[#allocation9 + $0x38] sm:$0xff]  ;;  %v3295_v19 = vld [vmem:[#allocation9] sm:$0xff] }
 0x411   :  { %v1855_v37 = vmul.f32 %v1812_v22, %v4593_v35  ;;  %v1842_v33 = vmul.f32 %v4728_v23, %v1841_v51  ;;  %2344 = vmatpush.msra.mxu0 %v4581_v40  ;;  %2367 = vmatpush.msra.mxu1 %v4584_v13  ;;  %v3256_v40 = vld [vmem:[#allocation9 + $0x190] sm:$0xff]  ;;  %v3296_v52 = vld [vmem:[#allocation9 + $0x8] sm:$0xff]  ;;  %v3298_v31 = vld [vmem:[#allocation9 + $0x18] sm:$0xff] }
 0x412   :  { %2390 = vmatpush.msra.mxu2 %v4587_v62  ;;  %2413 = vmatpush.msra.mxu3 %v4590_v29  ;;  %v3257_v29 = vld [vmem:[#allocation9 + $0x170] sm:$0xff]  ;;  %v1851_v35 = vor.u32 1.1754944e-38, %v1850_v16  ;;  %vm1849_vm7 = vcmp.eq.f32.partialorder %v1848_v61, 8.507059e+37  ;;  %v5214_v1 = vld [vmem:[#allocation60_spill] sm:$0xff]  ;;  %v5216_v13 = vld [vmem:[#allocation63_spill] sm:$0xff] }
 0x413   :  { %v4742_v14 = vadd.f32 %v1857_v45, %v1855_v37  ;;  %2345 = vmatpush.msra.mxu0 %v4595_v58  ;;  %2368 = vmatpush.msra.mxu1 %v4598_v34  ;;  %v1843_v12 = vadd.f32 %v4728_v23, %v1842_v33  ;;  %v3258_v58 = vld [vmem:[#allocation9 + $0x150] sm:$0xff]  ;;  %v401_v51 = vadd.f32 %v5214_v1, %v5199_v63 }
 0x414   :  { %2391 = vmatpush.msra.mxu2 %v4603_v32  ;;  %2414 = vmatpush.msra.mxu3 %v4606_v11  ;;  %v3259_v11 = vld [vmem:[#allocation9 + $0x120] sm:$0xff]  ;;  %v3293_v42 = vld [vmem:[#allocation9 + $0x30] sm:$0xff] }
 0x415   :  { %3073 = vtanh.f32 %v4742_v14  ;;  %2346 = vmatpush.msra.mxu0 %v4611_v2  ;;  %2369 = vmatpush.msra.mxu1 %v4614_v4  ;;  %v1847_v62 = vsel %vm4757_vm6, %v4728_v23, %v1843_v12  ;;  %v3260_v2 = vld [vmem:[#allocation9 + $0x128] sm:$0xff]  ;;  %v3290_v23 = vld [vmem:[#allocation9 + $0x58] sm:$0xff]  ;;  %v3297_v10 = vld [vmem:[#allocation9 + $0x10] sm:$0xff] }
 0x416   :  { %2392 = vmatpush.msra.mxu2 %v3256_v40  ;;  %2415 = vmatpush.msra.mxu3 %v4620_v15  ;;  %v1852_v32 = vsel %vm1849_vm7, %v1851_v35, %v1847_v62  ;;  %v3261_v15 = vld [vmem:[#allocation9 + $0x130] sm:$0xff]  ;;  %v548_v62 = vadd.f32 %v5216_v13, %v5203_v25 }
 0x417   :  { %2347 = vmatpush.msra.mxu0 %v4629_v44  ;;  %2370 = vmatpush.msra.mxu1 %v4632_v57  ;;  %v3262_v44 = vld [vmem:[#allocation9 + $0x138] sm:$0xff]  ;;  %v3263_v57 = vld [vmem:[#allocation9 + $0x100] sm:$0xff]  ;;  %v5215_v22 = vld [vmem:[#allocation61_spill] sm:$0xff] }
 0x418   :  { %2393 = vmatpush.msra.mxu2 %v3257_v29  ;;  %2416 = vmatpush.msra.mxu3 %v4639_v46  ;;  %v3264_v46 = vld [vmem:[#allocation9 + $0x108] sm:$0xff]  ;;  %v450_v45 = vadd.f32 %v5215_v22, %v5201_v54 }
 0x419   :  { %2348 = vmatpush.msra.mxu0 %v4642_v3  ;;  %2371 = vmatpush.msra.mxu1 %v4645_v60  ;;  %v3265_v3 = vld [vmem:[#allocation9 + $0x110] sm:$0xff]  ;;  %v3266_v60 = vld [vmem:[#allocation9 + $0x118] sm:$0xff] }
 0x41a   :  { %2394 = vmatpush.msra.mxu2 %v3258_v58  ;;  %2417 = vmatpush.msra.mxu3 %v4649_v0  ;;  %v3267_v0 = vld [vmem:[#allocation9 + $0xe0] sm:$0xff] }
 0x41b   :  { %v3074_v34 = vpop.eup %3073  ;;  %2349 = vmatpush.msra.mxu0 %v3259_v11  ;;  %2372 = vmatpush.msra.mxu1 %v3260_v2 }
 0x41c   :  { %v1863_v4 = vmul.f32 %v3074_v34, %v1852_v32  ;;  %2395 = vmatpush.msra.mxu2 %v3261_v15  ;;  %2418 = vmatpush.msra.mxu3 %v3262_v44  ;;  %v5218_v44 = vld [vmem:[#allocation65_spill] sm:$0xff] }
 0x41d   :  { %2350 = vmatpush.msra.mxu0 %v3263_v57  ;;  %2373 = vmatpush.msra.mxu1 %v3264_v46  ;;  %v452_v57 = vadd.f32 %v5218_v44, %v5201_v54 }
 0x41e   :  { %1892 = vmatmul.f32.gmra.mxu0 %v1863_v4  ;;  %1915 = vmatmul.f32.gmra.mxu1 %v1863_v4 }
 0x41f   :  { %1938 = vmatmul.f32.gmra.mxu2 %v1863_v4  ;;  %1961 = vmatmul.f32.gmra.mxu3 %v1863_v4  ;;  %v5217_v4 = vld [vmem:[#allocation64_spill] sm:$0xff] }
 0x420   :  { %2396 = vmatpush.msra.mxu2 %v3265_v3  ;;  %2419 = vmatpush.msra.mxu3 %v3266_v60  ;;  %v403_v15 = vadd.f32 %v5217_v4, %v5199_v63 }
 0x421   :  { %2351 = vmatpush.msra.mxu0 %v3267_v0  ;;  %2374 = vmatpush.msra.mxu1 %v3268_v30  ;;  %v5219_v30 = vld [vmem:[#allocation62_spill] sm:$0xff] }
 0x422   :  { %2397 = vmatpush.msra.mxu2 %v3269_v41  ;;  %2420 = vmatpush.msra.mxu3 %v3270_v49  ;;  %v499_v41 = vadd.f32 %v5219_v30, %v5097_v59 }
 0x423   :  { %2352 = vmatpush.msra.mxu0 %v3271_v18  ;;  %2375 = vmatpush.msra.mxu1 %v3272_v38 }
 0x424   :  { %2398 = vmatpush.msra.mxu2 %v3273_v55  ;;  %2421 = vmatpush.msra.mxu3 %v3274_v53 }
 0x425   :  { %2353 = vmatpush.msra.mxu0 %v3275_v39  ;;  %2376 = vmatpush.msra.mxu1 %v3276_v50 }
 0x426   :  { %2399 = vmatpush.msra.mxu2 %v3277_v43  ;;  %2422 = vmatpush.msra.mxu3 %v3278_v47 }
 0x427   :  { %2354 = vmatpush.msra.mxu0 %v3279_v28  ;;  %2377 = vmatpush.msra.mxu1 %v3280_v36  ;;  %v5220_v36 = vld [vmem:[#allocation67_spill] sm:$0xff] }
 0x428   :  { %2400 = vmatpush.msra.mxu2 %v3281_v17  ;;  %2423 = vmatpush.msra.mxu3 %v3282_v9  ;;  %v550_v17 = vadd.f32 %v5220_v36, %v5203_v25 }
 0x429   :  { %2355 = vmatpush.msra.mxu0 %v3283_v27  ;;  %2378 = vmatpush.msra.mxu1 %v3284_v5 }
 0x42a   :  { %2401 = vmatpush.msra.mxu2 %v3285_v8  ;;  %2424 = vmatpush.msra.mxu3 %v3286_v7 }
 0x42b   :  { %2356 = vmatpush.msra.mxu0 %v3287_v26  ;;  %2379 = vmatpush.msra.mxu1 %v3288_v20 }
 0x42c   :  { %2402 = vmatpush.msra.mxu2 %v3289_v48  ;;  %2425 = vmatpush.msra.mxu3 %v3290_v23 }
 0x42d   :  { %2357 = vmatpush.msra.mxu0 %v3291_v21  ;;  %2380 = vmatpush.msra.mxu1 %v3292_v6 }
 0x42e   :  { %2403 = vmatpush.msra.mxu2 %v3293_v42  ;;  %2426 = vmatpush.msra.mxu3 %v3294_v24 }
 0x42f   :  { %2358 = vmatpush.msra.mxu0 %v3295_v19  ;;  %2381 = vmatpush.msra.mxu1 %v3296_v52 }
 0x430   :  { %2404 = vmatpush.msra.mxu2 %v3297_v10  ;;  %2427 = vmatpush.msra.mxu3 %v3298_v31 }
 0x48a   :  { %v1890_v37 = vpop.f32.mrf.mxu0  ;;  %v1913_v33 = vpop.f32.mrf.mxu1 }
 0x48b   :  { %v1965_v12 = vadd.f32 %v1890_v37, %v401_v51  ;;  %v1966_v16 = vadd.f32 %v1913_v33, %v450_v45 }
 0x48d   :  { %v2825_v61 = vmul.f32 -1.442695, %v1965_v12  ;;  %v2827_v40 = vmul.f32 -1.442695, %v1966_v16 }
 0x48f   :  { %3075 = vpow2.f32 %v2825_v61 }
 0x490   :  { %3077 = vpow2.f32 %v2827_v40 }
 0x491   :  { %v1959_v29 = vpop.f32.mrf.mxu3  ;;  %v1936_v46 = vpop.f32.mrf.mxu2 }
 0x492   :  { %v1968_v35 = vadd.f32 %v1959_v29, %v548_v62  ;;  %v1967_v53 = vadd.f32 %v1936_v46, %v499_v41 }
 0x494   :  { %v2829_v58 = vmul.f32 -1.442695, %v1968_v35 }
 0x495   :  { %v3076_v34 = vpop.eup %3075 }
 0x496   :  { %v3078_v32 = vpop.eup %3077  ;;  %v1979_v11 = vadd.f32 1.0, %v3076_v34  ;;  %3079 = vpow2.f32 %v2829_v58 }
 0x497   :  { %v2017_v2 = vadd.f32 1.0, %v3078_v32  ;;  %v5221_v32 = vld [vmem:[#allocation66_spill] sm:$0xff] }
 0x498   :  { %3081 = vrcp.f32 %v1979_v11  ;;  %v1990_v27 = vand.u32 2147483647, %v1979_v11  ;;  %v1992_v7 = vand.u32 2147483648, %v1979_v11  ;;  %vm1986_vm10 = vweird.f32 %v1979_v11 }
 0x499   :  { %3083 = vrcp.f32 %v2017_v2  ;;  %v2030_v8 = vand.u32 2147483648, %v2017_v2  ;;  %v2028_v48 = vand.u32 2147483647, %v2017_v2  ;;  %vm2024_vm11 = vweird.f32 %v2017_v2 }
 0x49a   :  { %vm1991_vm12 = vcmp.eq.f32.partialorder %v1990_v27, 8.507059e+37  ;;  %v1993_v10 = vor.u32 1.1754944e-38, %v1992_v7 }
 0x49b   :  { %v1893_v3 = vpop.f32.mrf.mxu0  ;;  %v1916_v60 = vpop.f32.mrf.mxu1  ;;  %v2031_v52 = vor.u32 1.1754944e-38, %v2030_v8  ;;  %vm2029_vm15 = vcmp.eq.f32.partialorder %v2028_v48, 8.507059e+37 }
 0x49c   :  { %v3080_v0 = vpop.eup %3079  ;;  %v1969_v49 = vadd.f32 %v1893_v3, %v403_v15  ;;  %v1970_v18 = vadd.f32 %v1916_v60, %v452_v57  ;;  %v5227_v3 = vld [vmem:[#allocation72_spill] sm:$0xff] }
 0x49d   :  { %v4782_v38 = vadd.f32 1.0, %v3080_v0 }
 0x49e   :  { %v3082_v55 = vpop.eup %3081  ;;  %v2826_v39 = vmul.f32 -1.442695, %v1969_v49  ;;  %v2828_v50 = vmul.f32 -1.442695, %v1970_v18 }
 0x49f   :  { %v3084_v43 = vpop.eup %3083  ;;  %v1982_v47 = vmul.f32 %v3082_v55, %v1979_v11  ;;  %3085 = vrcp.f32 %v4782_v38  ;;  %vm1987_vm8 = vweird.f32 %v3082_v55  ;;  %v501_v11 = vadd.f32 %v5221_v32, %v5097_v59  ;;  %v5226_v32 = vld [vmem:[#allocation71_spill] sm:$0xff] }
 0x4a0   :  { %v2020_v28 = vmul.f32 %v3084_v43, %v2017_v2  ;;  %3087 = vpow2.f32 %v2826_v39  ;;  %vm2025_vm9 = vweird.f32 %v3084_v43  ;;  %vm1988_vm13 = vmor %vm1986_vm10, %vm1987_vm8  ;;  %v2070_v4 = vand.u32 2147483648, %v4782_v38 }
 0x4a1   :  { %v1983_v9 = vsub.f32 1.0, %v1982_v47  ;;  %3089 = vpow2.f32 %v2828_v50  ;;  %vm2026_vm14 = vmor %vm2024_vm11, %vm2025_vm9  ;;  %v2068_v44 = vand.u32 2147483647, %v4782_v38  ;;  %vm2064_vm1 = vweird.f32 %v4782_v38 }
 0x4a2   :  { %v2021_v5 = vsub.f32 1.0, %v2020_v28  ;;  %3091 = vtanh.f32 %v1967_v53  ;;  %v1962_v26 = vpop.f32.mrf.mxu3  ;;  %v1939_v58 = vpop.f32.mrf.mxu2  ;;  %v2071_v41 = vor.u32 1.1754944e-38, %v2070_v4 }
 0x4a3   :  { %v1984_v20 = vmul.f32 %v3082_v55, %v1983_v9  ;;  %v1972_v23 = vadd.f32 %v1962_v26, %v550_v17  ;;  %vm2069_vm3 = vcmp.eq.f32.partialorder %v2068_v44, 8.507059e+37 }
 0x4a4   :  { %v2022_v21 = vmul.f32 %v3084_v43, %v2021_v5 }
 0x4a5   :  { %v3086_v6 = vpop.eup %3085  ;;  %v1985_v42 = vadd.f32 %v3082_v55, %v1984_v20  ;;  %v2830_v24 = vmul.f32 -1.442695, %v1972_v23 }
 0x4a6   :  { %v3088_v19 = vpop.eup %3087  ;;  %v2023_v31 = vadd.f32 %v3084_v43, %v2022_v21  ;;  %v2060_v1 = vmul.f32 %v3086_v6, %v4782_v38  ;;  %vm2065_vm0 = vweird.f32 %v3086_v6 }
 0x4a7   :  { %v3090_v51 = vpop.eup %3089  ;;  %v1989_v22 = vsel %vm1988_vm13, %v3082_v55, %v1985_v42  ;;  %v1980_v45 = vadd.f32 1.0, %v3088_v19  ;;  %3093 = vpow2.f32 %v2830_v24  ;;  %vm4797_vm2 = vmor %vm2064_vm1, %vm2065_vm0 }
 0x4a8   :  { %v3092_v37 = vpop.eup %3091  ;;  %v1994_v33 = vsel %vm1991_vm12, %v1993_v10, %v1989_v22  ;;  %v2027_v12 = vsel %vm2026_vm14, %v3084_v43, %v2023_v31  ;;  %v2061_v16 = vsub.f32 1.0, %v2060_v1  ;;  %v2018_v61 = vadd.f32 1.0, %v3090_v51 }
 0x4a9   :  { %v2032_v40 = vsel %vm2029_vm15, %v2031_v52, %v2027_v12  ;;  %v2091_v13 = vmul.f32 %v3092_v37, %v1994_v33  ;;  %3095 = vrcp.f32 %v1980_v45  ;;  %v2007_v53 = vand.u32 2147483648, %v1980_v45 }
 0x4aa   :  { %v2089_v62 = vmul.f32 %v2032_v40, %v4711_v56  ;;  %v2062_v29 = vmul.f32 %v3086_v6, %v2061_v16  ;;  %3097 = vrcp.f32 %v2018_v61  ;;  %v1971_v56 = vadd.f32 %v1939_v58, %v501_v11  ;;  %v5225_v16 = vld [vmem:[#allocation69_spill] sm:$0xff] }
 0x4ab   :  { %v2045_v55 = vand.u32 2147483648, %v2018_v61  ;;  %v2005_v50 = vand.u32 2147483647, %v1980_v45  ;;  %v2043_v28 = vand.u32 2147483647, %v2018_v61  ;;  %vm2001_vm6 = vweird.f32 %v1980_v45 }
 0x4ac   :  { %v4789_v35 = vadd.f32 %v2091_v13, %v2089_v62  ;;  %v2063_v2 = vadd.f32 %v3086_v6, %v2062_v29  ;;  %vm2039_vm7 = vweird.f32 %v2018_v61  ;;  %v2008_v27 = vor.u32 1.1754944e-38, %v2007_v53  ;;  %v5229_v53 = vld [vmem:[#allocation70_spill] sm:$0xff] }
 0x4ad   :  { %v3094_v34 = vpop.eup %3093  ;;  %v2046_v7 = vor.u32 1.1754944e-38, %v2045_v55  ;;  %vm2006_vm10 = vcmp.eq.f32.partialorder %v2005_v50, 8.507059e+37  ;;  %vm2044_vm11 = vcmp.eq.f32.partialorder %v2043_v28, 8.507059e+37  ;;  %v553_v11 = vadd.f32 %v5226_v32, %v5203_v25 }
 0x4ae   :  { %3099 = vtanh.f32 %v4789_v35  ;;  %v2058_v15 = vadd.f32 1.0, %v3094_v34  ;;  %v2067_v30 = vsel %vm4797_vm2, %v3086_v6, %v2063_v2 }
 0x4af   :  { %v3096_v57 = vpop.eup %3095  ;;  %v2072_v43 = vsel %vm2069_vm3, %v2071_v41, %v2067_v30 }
 0x4b0   :  { %v3098_v46 = vpop.eup %3097  ;;  %v1997_v60 = vmul.f32 %v3096_v57, %v1980_v45  ;;  %3101 = vrcp.f32 %v2058_v15  ;;  %vm2002_vm4 = vweird.f32 %v3096_v57  ;;  %v2085_v31 = vand.u32 2147483648, %v2058_v15 }
 0x4b1   :  { %v2035_v0 = vmul.f32 %v3098_v46, %v2018_v61  ;;  %3103 = vtanh.f32 %v1971_v56  ;;  %vm2040_vm5 = vweird.f32 %v3098_v46  ;;  %vm2003_vm8 = vmor %vm2001_vm6, %vm2002_vm4  ;;  %vm2079_vm13 = vweird.f32 %v2058_v15 }
 0x4b2   :  { %v1998_v49 = vsub.f32 1.0, %v1997_v60  ;;  %vm2041_vm9 = vmor %vm2039_vm7, %vm2040_vm5  ;;  %v2083_v1 = vand.u32 2147483647, %v2058_v15  ;;  %v2086_v22 = vor.u32 1.1754944e-38, %v2085_v31  ;;  %v455_v61 = vadd.f32 %v5225_v16, %v5201_v54 }
 0x4b3   :  { %v2036_v18 = vsub.f32 1.0, %v2035_v0  ;;  %v408_v60 = vadd.f32 %v5227_v3, %v5199_v63  ;;  %v5228_v0 = vld [vmem:[#allocation73_spill] sm:$0xff] }
 0x4b4   :  { %v3100_v38 = vpop.eup %3099  ;;  %v1999_v39 = vmul.f32 %v3096_v57, %v1998_v49  ;;  %vm2084_vm15 = vcmp.eq.f32.partialorder %v2083_v1, 8.507059e+37  ;;  %v457_v30 = vadd.f32 %v5228_v0, %v5201_v54 }
 0x4b5   :  { %v2037_v47 = vmul.f32 %v3098_v46, %v2036_v18  ;;  %v2097_v36 = vmul.f32 %v3100_v38, %v2072_v43  ;;  %v504_v38 = vadd.f32 %v5229_v53, %v5097_v59 }
 0x4b6   :  { %v3102_v17 = vpop.eup %3101  ;;  %v2000_v9 = vadd.f32 %v3096_v57, %v1999_v39 }
 0x4b7   :  { %v2038_v5 = vadd.f32 %v3098_v46, %v2037_v47  ;;  %v2075_v8 = vmul.f32 %v3102_v17, %v2058_v15  ;;  %2124 = vmatmul.f32.vlgmr.msrb.gmra.mxu0 %v2097_v36  ;;  %2147 = vmatmul.f32.vlgmr.msrb.gmra.mxu1 %v2097_v36  ;;  %v3104_v20 = vpop.eup %3103  ;;  %vm2080_vm12 = vweird.f32 %v3102_v17 }
 0x4b8   :  { %v2004_v26 = vsel %vm2003_vm8, %v3096_v57, %v2000_v9  ;;  %2170 = vmatmul.f32.vlgmr.msrb.gmra.mxu2 %v2097_v36  ;;  %2193 = vmatmul.f32.vlgmr.msrb.gmra.mxu3 %v2097_v36  ;;  %vm2081_vm14 = vmor %vm2079_vm13, %vm2080_vm12 }
 0x4b9   :  { %v2009_v48 = vsel %vm2006_vm10, %v2008_v27, %v2004_v26  ;;  %v2042_v23 = vsel %vm2041_vm9, %v3098_v46, %v2038_v5  ;;  %v2076_v21 = vsub.f32 1.0, %v2075_v8  ;;  %v5230_v8 = vld [vmem:[#allocation74_spill] sm:$0xff] }
 0x4ba   :  { %v2047_v6 = vsel %vm2044_vm11, %v2046_v7, %v2042_v23  ;;  %v2092_v42 = vmul.f32 %v3104_v20, %v2009_v48  ;;  %v555_v7 = vadd.f32 %v5230_v8, %v5203_v25 }
 0x4bb   :  { %v2090_v24 = vmul.f32 %v2047_v6, %v4742_v14  ;;  %v2077_v19 = vmul.f32 %v3102_v17, %v2076_v21  ;;  %v5224_v14 = vld [vmem:[#allocation68_spill] sm:$0xff] }
 0x4bc   :  { %v406_v12 = vadd.f32 %v5224_v14, %v5199_v63 }
 0x4bd   :  { %v4804_v52 = vadd.f32 %v2092_v42, %v2090_v24  ;;  %v2078_v10 = vadd.f32 %v3102_v17, %v2077_v19 }
 0x4bf   :  { %3105 = vtanh.f32 %v4804_v52  ;;  %v2082_v51 = vsel %vm2081_vm14, %v3102_v17, %v2078_v10 }
 0x4c0   :  { %v2087_v37 = vsel %vm2084_vm15, %v2086_v22, %v2082_v51 }
 0x4c5   :  { %v3106_v45 = vpop.eup %3105 }
 0x4c6   :  { %v2098_v33 = vmul.f32 %v3106_v45, %v2087_v37 }
 0x4c8   :  { %2127 = vmatmul.f32.gmra.mxu0 %v2098_v33  ;;  %2150 = vmatmul.f32.gmra.mxu1 %v2098_v33 }
 0x4c9   :  { %2173 = vmatmul.f32.gmra.mxu2 %v2098_v33  ;;  %2196 = vmatmul.f32.gmra.mxu3 %v2098_v33 }
 0x534   :  { %v2125_v40 = vpop.f32.mrf.mxu0  ;;  %v2148_v13 = vpop.f32.mrf.mxu1 }
 0x535   :  { %v2200_v62 = vadd.f32 %v2125_v40, %v406_v12  ;;  %v2201_v29 = vadd.f32 %v2148_v13, %v455_v61 }
 0x537   :  { %v2831_v58 = vmul.f32 -1.442695, %v2200_v62  ;;  %v2833_v34 = vmul.f32 -1.442695, %v2201_v29 }
 0x539   :  { %3107 = vpow2.f32 %v2831_v58 }
 0x53a   :  { %3109 = vpow2.f32 %v2833_v34 }
 0x53b   :  { %v2194_v2 = vpop.f32.mrf.mxu3  ;;  %v2171_v41 = vpop.f32.mrf.mxu2 }
 0x53c   :  { %v2203_v4 = vadd.f32 %v2194_v2, %v553_v11  ;;  %v2202_v28 = vadd.f32 %v2171_v41, %v504_v38 }
 0x53e   :  { %v2835_v15 = vmul.f32 -1.442695, %v2203_v4 }
 0x53f   :  { %v3108_v44 = vpop.eup %3107 }
 0x540   :  { %v3110_v57 = vpop.eup %3109  ;;  %v2214_v56 = vadd.f32 1.0, %v3108_v44  ;;  %3111 = vpow2.f32 %v2835_v15 }
 0x541   :  { %v2252_v46 = vadd.f32 1.0, %v3110_v57  ;;  %v5231_v57 = vld [vmem:[#allocation76_spill] sm:$0xff] }
 0x542   :  { %3113 = vrcp.f32 %v2214_v56  ;;  %v2225_v20 = vand.u32 2147483647, %v2214_v56  ;;  %v2227_v21 = vand.u32 2147483648, %v2214_v56  ;;  %vm2221_vm2 = vweird.f32 %v2214_v56 }
 0x543   :  { %3115 = vrcp.f32 %v2252_v46  ;;  %v2265_v23 = vand.u32 2147483648, %v2252_v46  ;;  %v2263_v24 = vand.u32 2147483647, %v2252_v46  ;;  %vm2259_vm3 = vweird.f32 %v2252_v46 }
 0x544   :  { %vm2226_vm4 = vcmp.eq.f32.partialorder %v2225_v20, 8.507059e+37  ;;  %v2228_v37 = vor.u32 1.1754944e-38, %v2227_v21 }
 0x545   :  { %v2128_v49 = vpop.f32.mrf.mxu0  ;;  %v2151_v18 = vpop.f32.mrf.mxu1  ;;  %v2266_v45 = vor.u32 1.1754944e-38, %v2265_v23  ;;  %vm2264_vm7 = vcmp.eq.f32.partialorder %v2263_v24, 8.507059e+37 }
 0x546   :  { %v3112_v55 = vpop.eup %3111  ;;  %v2204_v39 = vadd.f32 %v2128_v49, %v408_v60  ;;  %v2205_v50 = vadd.f32 %v2151_v18, %v457_v30 }
 0x547   :  { %v4819_v43 = vadd.f32 1.0, %v3112_v55 }
 0x548   :  { %v3114_v47 = vpop.eup %3113  ;;  %v2832_v36 = vmul.f32 -1.442695, %v2204_v39  ;;  %v2834_v17 = vmul.f32 -1.442695, %v2205_v50 }
 0x549   :  { %v3116_v9 = vpop.eup %3115  ;;  %v2217_v27 = vmul.f32 %v3114_v47, %v2214_v56  ;;  %3117 = vrcp.f32 %v4819_v43  ;;  %vm2222_vm0 = vweird.f32 %v3114_v47  ;;  %v506_v56 = vadd.f32 %v5231_v57, %v5097_v59 }
 0x54a   :  { %v2255_v5 = vmul.f32 %v3116_v9, %v2252_v46  ;;  %3119 = vpow2.f32 %v2832_v36  ;;  %vm2260_vm1 = vweird.f32 %v3116_v9  ;;  %vm2223_vm5 = vmor %vm2221_vm2, %vm2222_vm0  ;;  %v2305_v3 = vand.u32 2147483648, %v4819_v43 }
 0x54b   :  { %v2218_v26 = vsub.f32 1.0, %v2217_v27  ;;  %3121 = vpow2.f32 %v2834_v17  ;;  %vm2261_vm6 = vmor %vm2259_vm3, %vm2260_vm1  ;;  %v2303_v0 = vand.u32 2147483647, %v4819_v43  ;;  %vm2299_vm9 = vweird.f32 %v4819_v43 }
 0x54c   :  { %v2256_v48 = vsub.f32 1.0, %v2255_v5  ;;  %3123 = vtanh.f32 %v2202_v28  ;;  %v2197_v6 = vpop.f32.mrf.mxu3  ;;  %v2174_v15 = vpop.f32.mrf.mxu2  ;;  %v2306_v38 = vor.u32 1.1754944e-38, %v2305_v3  ;;  %v2579_v3 = vld [vmem:[#allocation11 + $0x50] sm:$0xff] }
 0x54d   :  { %v2219_v42 = vmul.f32 %v3114_v47, %v2218_v26  ;;  %v2207_v19 = vadd.f32 %v2197_v6, %v555_v7  ;;  %vm2304_vm11 = vcmp.eq.f32.partialorder %v2303_v0, 8.507059e+37 }
 0x54e   :  { %v2257_v10 = vmul.f32 %v3116_v9, %v2256_v48 }
 0x54f   :  { %v3118_v31 = vpop.eup %3117  ;;  %v2220_v1 = vadd.f32 %v3114_v47, %v2219_v42  ;;  %v2836_v51 = vmul.f32 -1.442695, %v2207_v19 }
 0x550   :  { %v3120_v22 = vpop.eup %3119  ;;  %v2258_v33 = vadd.f32 %v3116_v9, %v2257_v10  ;;  %v2295_v14 = vmul.f32 %v3118_v31, %v4819_v43  ;;  %vm2300_vm8 = vweird.f32 %v3118_v31 }
 0x551   :  { %v3122_v12 = vpop.eup %3121  ;;  %v2224_v16 = vsel %vm2223_vm5, %v3114_v47, %v2220_v1  ;;  %v2215_v61 = vadd.f32 1.0, %v3120_v22  ;;  %3125 = vpow2.f32 %v2836_v51  ;;  %vm4834_vm10 = vmor %vm2299_vm9, %vm2300_vm8 }
 0x552   :  { %v3124_v40 = vpop.eup %3123  ;;  %v2229_v13 = vsel %vm2226_vm4, %v2228_v37, %v2224_v16  ;;  %v2262_v62 = vsel %vm2261_vm6, %v3116_v9, %v2258_v33  ;;  %v2296_v29 = vsub.f32 1.0, %v2295_v14  ;;  %v2253_v58 = vadd.f32 1.0, %v3122_v12 }
 0x553   :  { %v2267_v34 = vsel %vm2264_vm7, %v2266_v45, %v2262_v62  ;;  %v2326_v32 = vmul.f32 %v3124_v40, %v2229_v13  ;;  %3127 = vrcp.f32 %v2215_v61  ;;  %v2242_v28 = vand.u32 2147483648, %v2215_v61  ;;  %v2583_v62 = vld [vmem:[#allocation11 + $0x70] sm:$0xff] }
 0x554   :  { %v2324_v11 = vmul.f32 %v2267_v34, %v4789_v35  ;;  %v2297_v2 = vmul.f32 %v3118_v31, %v2296_v29  ;;  %3129 = vrcp.f32 %v2253_v58  ;;  %v2206_v35 = vadd.f32 %v2174_v15, %v506_v56  ;;  %v2582_v29 = vld [vmem:[#allocation11 + $0x68] sm:$0xff]  ;;  %v5234_v34 = vld [vmem:[#allocation75_spill] sm:$0xff]  ;;  %v2580_v15 = vld [vmem:[#allocation11 + $0x58] sm:$0xff] }
 0x555   :  { %v2280_v47 = vand.u32 2147483648, %v2253_v58  ;;  %v2240_v17 = vand.u32 2147483647, %v2215_v61  ;;  %v2278_v5 = vand.u32 2147483647, %v2253_v58  ;;  %vm2236_vm14 = vweird.f32 %v2215_v61 }
 0x556   :  { %v4826_v4 = vadd.f32 %v2326_v32, %v2324_v11  ;;  %v2298_v46 = vadd.f32 %v3118_v31, %v2297_v2  ;;  %vm2274_vm15 = vweird.f32 %v2253_v58  ;;  %v2243_v20 = vor.u32 1.1754944e-38, %v2242_v28  ;;  %v5235_v11 = vld [vmem:[#allocation77_spill] sm:$0xff] }
 0x557   :  { %v3126_v44 = vpop.eup %3125  ;;  %v2281_v21 = vor.u32 1.1754944e-38, %v2280_v47  ;;  %vm2241_vm2 = vcmp.eq.f32.partialorder %v2240_v17, 8.507059e+37  ;;  %vm2279_vm3 = vcmp.eq.f32.partialorder %v2278_v5, 8.507059e+37  ;;  %v411_v32 = vadd.f32 %v5234_v34, %v5199_v63  ;;  %v2574_v47 = vld [vmem:[#allocation11 + $0x28] sm:$0xff]  ;;  %v2573_v17 = vld [vmem:[#allocation11 + $0x20] sm:$0xff] }
 0x558   :  { %3131 = vtanh.f32 %v4826_v4  ;;  %v2293_v60 = vadd.f32 1.0, %v3126_v44  ;;  %v2302_v53 = vsel %vm4834_vm10, %v3118_v31, %v2298_v46  ;;  %v460_v2 = vadd.f32 %v5235_v11, %v5201_v54 }
 0x559   :  { %v3128_v30 = vpop.eup %3127  ;;  %v2307_v9 = vsel %vm2304_vm11, %v2306_v38, %v2302_v53  ;;  %v2575_v38 = vld [vmem:[#allocation11 + $0x30] sm:$0xff] }
 0x55a   :  { %v3130_v41 = vpop.eup %3129  ;;  %v2232_v18 = vmul.f32 %v3128_v30, %v2215_v61  ;;  %3133 = vrcp.f32 %v2293_v60  ;;  %vm2237_vm12 = vweird.f32 %v3128_v30  ;;  %v2320_v33 = vand.u32 2147483648, %v2293_v60 }
 0x55b   :  { %v2270_v55 = vmul.f32 %v3130_v41, %v2253_v58  ;;  %3135 = vtanh.f32 %v2206_v35  ;;  %vm2275_vm13 = vweird.f32 %v3130_v41  ;;  %vm2238_vm0 = vmor %vm2236_vm14, %vm2237_vm12  ;;  %vm2314_vm5 = vweird.f32 %v2293_v60  ;;  %v2581_v58 = vld [vmem:[#allocation11 + $0x60] sm:$0xff] }
 0x55c   :  { %v2233_v39 = vsub.f32 1.0, %v2232_v18  ;;  %vm2276_vm1 = vmor %vm2274_vm15, %vm2275_vm13  ;;  %v2318_v14 = vand.u32 2147483647, %v2293_v60  ;;  %v2321_v16 = vor.u32 1.1754944e-38, %v2320_v33  ;;  %v2577_v35 = vld [vmem:[#allocation11 + $0x40] sm:$0xff] }
 0x55d   :  { %v2271_v50 = vsub.f32 1.0, %v2270_v55  ;;  %v2576_v55 = vld [vmem:[#allocation11 + $0x38] sm:$0xff]  ;;  %v2569_v33 = vld [vmem:[#allocation11] sm:$0xff] }
 0x55e   :  { %v3132_v43 = vpop.eup %3131  ;;  %v2234_v36 = vmul.f32 %v3128_v30, %v2233_v39  ;;  %vm2319_vm7 = vcmp.eq.f32.partialorder %v2318_v14, 8.507059e+37 }
 0x55f   :  { %v2272_v27 = vmul.f32 %v3130_v41, %v2271_v50  ;;  %v2332_v8 = vmul.f32 %v3132_v43, %v2307_v9  ;;  %v2572_v9 = vld [vmem:[#allocation11 + $0x18] sm:$0xff] }
 0x560   :  { %v3134_v7 = vpop.eup %3133  ;;  %v2235_v26 = vadd.f32 %v3128_v30, %v2234_v36 }
 0x561   :  { %v2273_v48 = vadd.f32 %v3130_v41, %v2272_v27  ;;  %v2310_v23 = vmul.f32 %v3134_v7, %v2293_v60  ;;  %2359 = vmatmul.f32.vlgmr.msra.gmra.mxu0 %v2332_v8  ;;  %2382 = vmatmul.f32.vlgmr.msra.gmra.mxu1 %v2332_v8  ;;  %v3136_v42 = vpop.eup %3135  ;;  %vm2315_vm4 = vweird.f32 %v3134_v7  ;;  %v5237_v27 = vld [vmem:[#allocation79_spill] sm:$0xff] }
 0x562   :  { %v2239_v6 = vsel %vm2238_vm0, %v3128_v30, %v2235_v26  ;;  %2405 = vmatmul.f32.vlgmr.msra.gmra.mxu2 %v2332_v8  ;;  %2428 = vmatmul.f32.vlgmr.msra.gmra.mxu3 %v2332_v8  ;;  %vm2316_vm6 = vmor %vm2314_vm5, %vm2315_vm4  ;;  %v2578_v30 = vld [vmem:[#allocation11 + $0x48] sm:$0xff]  ;;  %v413_v5 = vadd.f32 %v5237_v27, %v5199_v63 }
 0x563   :  { %v2244_v24 = vsel %vm2241_vm2, %v2243_v20, %v2239_v6  ;;  %v2277_v19 = vsel %vm2276_vm1, %v3130_v41, %v2273_v48  ;;  %v2311_v10 = vsub.f32 1.0, %v2310_v23  ;;  %v5236_v41 = vld [vmem:[#allocation78_spill] sm:$0xff]  ;;  %v5238_v8 = vld [vmem:[#allocation80_spill] sm:$0xff]  ;;  %v2571_v23 = vld [vmem:[#allocation11 + $0x10] sm:$0xff] }
 0x564   :  { %v2282_v31 = vsel %vm2279_vm3, %v2281_v21, %v2277_v19  ;;  %v2327_v1 = vmul.f32 %v3136_v42, %v2244_v24  ;;  %v558_v49 = vadd.f32 %v5236_v41, %v5203_v25  ;;  %v5239_v6 = vld [vmem:[#allocation82_spill] sm:$0xff]  ;;  %v2570_v63 = vld [vmem:[#allocation11 + $0x8] sm:$0xff] }
 0x565   :  { %v2325_v51 = vmul.f32 %v2282_v31, %v4804_v52  ;;  %v2312_v22 = vmul.f32 %v3134_v7, %v2311_v10  ;;  %v2584_v52 = vld [vmem:[#allocation11 + $0x78] sm:$0xff]  ;;  %v509_v42 = vadd.f32 %v5239_v6, %v5097_v59 }
 0x566   :  { %2589 = vmatpush.msrb.mxu0 %v2584_v52  ;;  %2883 = vmatpush.msrb.mxu1 %v2584_v52 }
 0x567   :  { %v4841_v45 = vadd.f32 %v2327_v1, %v2325_v51  ;;  %v2313_v37 = vadd.f32 %v3134_v7, %v2312_v22 }
 0x568   :  { %2590 = vmatpush.msrb.mxu0 %v2583_v62  ;;  %2884 = vmatpush.msrb.mxu1 %v2583_v62 }
 0x569   :  { %3137 = vtanh.f32 %v4841_v45  ;;  %v2317_v12 = vsel %vm2316_vm6, %v3134_v7, %v2313_v37  ;;  %v462_v7 = vadd.f32 %v5238_v8, %v5201_v54 }
 0x56a   :  { %v2322_v40 = vsel %vm2319_vm7, %v2321_v16, %v2317_v12  ;;  %2591 = vmatpush.msrb.mxu0 %v2582_v29  ;;  %2885 = vmatpush.msrb.mxu1 %v2582_v29  ;;  %v5240_v12 = vld [vmem:[#allocation28_spill] sm:$0xff] }
 0x56b   :  { %v560_v16 = vadd.f32 %v5240_v12, %v5203_v25 }
 0x56c   :  { %2592 = vmatpush.msrb.mxu0 %v2581_v58  ;;  %2886 = vmatpush.msrb.mxu1 %v2581_v58 }
 0x56e   :  { %2593 = vmatpush.msrb.mxu0 %v2580_v15  ;;  %2887 = vmatpush.msrb.mxu1 %v2580_v15 }
 0x56f   :  { %v3138_v61 = vpop.eup %3137 }
 0x570   :  { %v2333_v13 = vmul.f32 %v3138_v61, %v2322_v40  ;;  %2594 = vmatpush.msrb.mxu0 %v2579_v3  ;;  %2888 = vmatpush.msrb.mxu1 %v2579_v3 }
 0x572   :  { %2362 = vmatmul.f32.gmra.mxu0 %v2333_v13  ;;  %2385 = vmatmul.f32.gmra.mxu1 %v2333_v13 }
 0x573   :  { %2408 = vmatmul.f32.gmra.mxu2 %v2333_v13  ;;  %2431 = vmatmul.f32.gmra.mxu3 %v2333_v13 }
 0x574   :  { %2595 = vmatpush.msrb.mxu0 %v2578_v30  ;;  %2889 = vmatpush.msrb.mxu1 %v2578_v30 }
 0x576   :  { %2596 = vmatpush.msrb.mxu0 %v2577_v35  ;;  %2890 = vmatpush.msrb.mxu1 %v2577_v35 }
 0x578   :  { %2597 = vmatpush.msrb.mxu0 %v2576_v55  ;;  %2891 = vmatpush.msrb.mxu1 %v2576_v55 }
 0x57a   :  { %2598 = vmatpush.msrb.mxu0 %v2575_v38  ;;  %2892 = vmatpush.msrb.mxu1 %v2575_v38 }
 0x57c   :  { %2599 = vmatpush.msrb.mxu0 %v2574_v47  ;;  %2893 = vmatpush.msrb.mxu1 %v2574_v47 }
 0x57e   :  { %2600 = vmatpush.msrb.mxu0 %v2573_v17  ;;  %2894 = vmatpush.msrb.mxu1 %v2573_v17 }
 0x580   :  { %2601 = vmatpush.msrb.mxu0 %v2572_v9  ;;  %2895 = vmatpush.msrb.mxu1 %v2572_v9 }
 0x582   :  { %2602 = vmatpush.msrb.mxu0 %v2571_v23  ;;  %2896 = vmatpush.msrb.mxu1 %v2571_v23 }
 0x584   :  { %2603 = vmatpush.msrb.mxu0 %v2570_v63  ;;  %2897 = vmatpush.msrb.mxu1 %v2570_v63 }
 0x586   :  { %2604 = vmatpush.msrb.mxu0 %v2569_v33  ;;  %2898 = vmatpush.msrb.mxu1 %v2569_v33 }
 0x5de   :  { %v2360_v44 = vpop.f32.mrf.mxu0  ;;  %v2383_v57 = vpop.f32.mrf.mxu1 }
 0x5df   :  { %v2435_v56 = vadd.f32 %v2360_v44, %v411_v32  ;;  %v2436_v46 = vadd.f32 %v2383_v57, %v460_v2 }
 0x5e1   :  { %v2837_v60 = vmul.f32 -1.442695, %v2435_v56  ;;  %v2839_v0 = vmul.f32 -1.442695, %v2436_v46 }
 0x5e3   :  { %3139 = vpow2.f32 %v2837_v60 }
 0x5e4   :  { %3141 = vpow2.f32 %v2839_v0 }
 0x5e5   :  { %v2429_v18 = vpop.f32.mrf.mxu3  ;;  %v2406_v26 = vpop.f32.mrf.mxu2 }
 0x5e6   :  { %v2438_v53 = vadd.f32 %v2429_v18, %v558_v49  ;;  %v2437_v1 = vadd.f32 %v2406_v26, %v509_v42 }
 0x5e8   :  { %v2841_v39 = vmul.f32 -1.442695, %v2438_v53 }
 0x5e9   :  { %v3140_v50 = vpop.eup %3139 }
 0x5ea   :  { %v3142_v28 = vpop.eup %3141  ;;  %v4850_v43 = vadd.f32 1.0, %v3140_v50  ;;  %3143 = vpow2.f32 %v2841_v39 }
 0x5eb   :  { %v4852_v36 = vadd.f32 1.0, %v3142_v28 }
 0x5ec   :  { %3145 = vrcp.f32 %v4850_v43  ;;  %v2460_v40 = vand.u32 2147483647, %v4850_v43  ;;  %v2462_v62 = vand.u32 2147483648, %v4850_v43  ;;  %vm2456_vm10 = vweird.f32 %v4850_v43 }
 0x5ed   :  { %3147 = vrcp.f32 %v4852_v36  ;;  %v2500_v52 = vand.u32 2147483648, %v4852_v36  ;;  %v2498_v34 = vand.u32 2147483647, %v4852_v36  ;;  %vm2494_vm11 = vweird.f32 %v4852_v36 }
 0x5ee   :  { %vm2461_vm12 = vcmp.eq.f32.partialorder %v2460_v40, 8.507059e+37  ;;  %v2463_v56 = vor.u32 1.1754944e-38, %v2462_v62 }
 0x5ef   :  { %v2363_v20 = vpop.f32.mrf.mxu0  ;;  %v2386_v48 = vpop.f32.mrf.mxu1  ;;  %v2501_v57 = vor.u32 1.1754944e-38, %v2500_v52  ;;  %vm2499_vm15 = vcmp.eq.f32.partialorder %v2498_v34, 8.507059e+37 }
 0x5f0   :  { %v3144_v21 = vpop.eup %3143  ;;  %v2439_v24 = vadd.f32 %v2363_v20, %v413_v5  ;;  %v2440_v19 = vadd.f32 %v2386_v48, %v462_v7 }
 0x5f1   :  { %v4862_v10 = vadd.f32 1.0, %v3144_v21 }
 0x5f2   :  { %v3146_v31 = vpop.eup %3145  ;;  %v2838_v54 = vmul.f32 -1.442695, %v2439_v24  ;;  %v2840_v51 = vmul.f32 -1.442695, %v2440_v19 }
 0x5f3   :  { %v3148_v22 = vpop.eup %3147  ;;  %v2452_v37 = vmul.f32 %v3146_v31, %v4850_v43  ;;  %3149 = vrcp.f32 %v4862_v10  ;;  %vm2457_vm8 = vweird.f32 %v3146_v31  ;;  %v2540_v27 = vand.u32 2147483648, %v4862_v10 }
 0x5f4   :  { %v2490_v14 = vmul.f32 %v3148_v22, %v4852_v36  ;;  %3151 = vpow2.f32 %v2838_v54  ;;  %vm2495_vm9 = vweird.f32 %v3148_v22  ;;  %vm2458_vm13 = vmor %vm2456_vm10, %vm2457_vm8  ;;  %v5241_v36 = vld [vmem:[#allocation84_spill] sm:$0xff]  ;;  %v2538_v8 = vand.u32 2147483647, %v4862_v10 }
 0x5f5   :  { %v2453_v61 = vsub.f32 1.0, %v2452_v37  ;;  %3153 = vpow2.f32 %v2840_v51  ;;  %vm2496_vm14 = vmor %vm2494_vm11, %vm2495_vm9  ;;  %v511_v17 = vadd.f32 %v5241_v36, %v5097_v59  ;;  %vm2534_vm1 = vweird.f32 %v4862_v10 }
 0x5f6   :  { %v2491_v13 = vsub.f32 1.0, %v2490_v14  ;;  %3155 = vtanh.f32 %v2437_v1  ;;  %v2432_v29 = vpop.f32.mrf.mxu3  ;;  %v2409_v28 = vpop.f32.mrf.mxu2  ;;  %v2541_v21 = vor.u32 1.1754944e-38, %v2540_v27  ;;  %vm2539_vm3 = vcmp.eq.f32.partialorder %v2538_v8, 8.507059e+37 }
 0x5f7   :  { %v2454_v58 = vmul.f32 %v3146_v31, %v2453_v61  ;;  %v2442_v32 = vadd.f32 %v2432_v29, %v560_v16 }
 0x5f8   :  { %v2492_v11 = vmul.f32 %v3148_v22, %v2491_v13 }
 0x5f9   :  { %v3150_v25 = vpop.eup %3149  ;;  %v2455_v2 = vadd.f32 %v3146_v31, %v2454_v58  ;;  %v2842_v15 = vmul.f32 -1.442695, %v2442_v32 }
 0x5fa   :  { %v3152_v44 = vpop.eup %3151  ;;  %v2493_v46 = vadd.f32 %v3148_v22, %v2492_v11  ;;  %v2530_v3 = vmul.f32 %v3150_v25, %v4862_v10  ;;  %vm2535_vm0 = vweird.f32 %v3150_v25 }
 0x5fb   :  { %v3154_v60 = vpop.eup %3153  ;;  %v2459_v0 = vsel %vm2458_vm13, %v3146_v31, %v2455_v2  ;;  %v2450_v30 = vadd.f32 1.0, %v3152_v44  ;;  %3157 = vpow2.f32 %v2842_v15  ;;  %vm4882_vm2 = vmor %vm2534_vm1, %vm2535_vm0 }
 0x5fc   :  { %v3156_v35 = vpop.eup %3155  ;;  %v2464_v41 = vsel %vm2461_vm12, %v2463_v56, %v2459_v0  ;;  %v2497_v49 = vsel %vm2496_vm14, %v3148_v22, %v2493_v46  ;;  %v2531_v18 = vsub.f32 1.0, %v2530_v3  ;;  %v2488_v55 = vadd.f32 1.0, %v3154_v60 }
 0x5fd   :  { %v2502_v53 = vsel %vm2499_vm15, %v2501_v57, %v2497_v49  ;;  %v2561_v38 = vmul.f32 %v3156_v35, %v2464_v41  ;;  %3159 = vrcp.f32 %v2450_v30  ;;  %v2477_v19 = vand.u32 2147483648, %v2450_v30 }
 0x5fe   :  { %v2559_v39 = vmul.f32 %v2502_v53, %v4826_v4  ;;  %v2532_v50 = vmul.f32 %v3150_v25, %v2531_v18  ;;  %3161 = vrcp.f32 %v2488_v55  ;;  %v2441_v4 = vadd.f32 %v2409_v28, %v511_v17 }
 0x5ff   :  { %v2515_v24 = vand.u32 2147483648, %v2488_v55  ;;  %v2475_v31 = vand.u32 2147483647, %v2450_v30  ;;  %v2513_v51 = vand.u32 2147483647, %v2488_v55  ;;  %vm2471_vm6 = vweird.f32 %v2450_v30 }
 0x600   :  { %v2563_v47 = vadd.f32 %v2561_v38, %v2559_v39  ;;  %v2533_v9 = vadd.f32 %v3150_v25, %v2532_v50  ;;  %vm2509_vm7 = vweird.f32 %v2488_v55  ;;  %v2478_v14 = vor.u32 1.1754944e-38, %v2477_v19 }
 0x601   :  { %v3158_v43 = vpop.eup %3157  ;;  %v2516_v61 = vor.u32 1.1754944e-38, %v2515_v24  ;;  %vm2476_vm10 = vcmp.eq.f32.partialorder %v2475_v31, 8.507059e+37  ;;  %vm2514_vm11 = vcmp.eq.f32.partialorder %v2513_v51, 8.507059e+37 }
 0x602   :  { %3163 = vtanh.f32 %v2563_v47  ;;  %v2528_v5 = vadd.f32 1.0, %v3158_v43  ;;  %v2537_v23 = vsel %vm4882_vm2, %v3150_v25, %v2533_v9 }
 0x603   :  { %v3160_v7 = vpop.eup %3159  ;;  %v2542_v1 = vsel %vm2539_vm3, %v2541_v21, %v2537_v23 }
 0x604   :  { %v3162_v26 = vpop.eup %3161  ;;  %v2467_v48 = vmul.f32 %v3160_v7, %v2450_v30  ;;  %3165 = vrcp.f32 %v2528_v5  ;;  %vm2472_vm4 = vweird.f32 %v3160_v7  ;;  %v2555_v15 = vand.u32 2147483648, %v2528_v5 }
 0x605   :  { %v2505_v59 = vmul.f32 %v3162_v26, %v2488_v55  ;;  %3167 = vtanh.f32 %v2441_v4  ;;  %vm2510_vm5 = vweird.f32 %v3162_v26  ;;  %vm2473_vm8 = vmor %vm2471_vm6, %vm2472_vm4  ;;  %vm2549_vm13 = vweird.f32 %v2528_v5 }
 0x606   :  { %v2468_v6 = vsub.f32 1.0, %v2467_v48  ;;  %vm2511_vm9 = vmor %vm2509_vm7, %vm2510_vm5  ;;  %v2553_v44 = vand.u32 2147483647, %v2528_v5  ;;  %v2556_v56 = vor.u32 1.1754944e-38, %v2555_v15 }
 0x607   :  { %v2506_v42 = vsub.f32 1.0, %v2505_v59 }
 0x608   :  { %v3164_v10 = vpop.eup %3163  ;;  %v2469_v63 = vmul.f32 %v3160_v7, %v2468_v6  ;;  %vm2554_vm15 = vcmp.eq.f32.partialorder %v2553_v44, 8.507059e+37 }
 0x609   :  { %v2507_v54 = vmul.f32 %v3162_v26, %v2506_v42  ;;  %v2567_v22 = vmul.f32 %v3164_v10, %v2542_v1 }
 0x60a   :  { %v3166_v37 = vpop.eup %3165  ;;  %v2470_v33 = vadd.f32 %v3160_v7, %v2469_v63 }
 0x60b   :  { %v2508_v12 = vadd.f32 %v3162_v26, %v2507_v54  ;;  %v2545_v16 = vmul.f32 %v3166_v37, %v2528_v5  ;;  %2605 = vmatmul.f32.vlgmr.msrb.gmra.mxu0 %v2567_v22  ;;  %v3168_v13 = vpop.eup %3167  ;;  %vm2550_vm12 = vweird.f32 %v3166_v37 }
 0x60c   :  { %v2474_v40 = vsel %vm2473_vm8, %v3160_v7, %v2470_v33  ;;  %vm2551_vm14 = vmor %vm2549_vm13, %vm2550_vm12 }
 0x60d   :  { %v2479_v52 = vsel %vm2476_vm10, %v2478_v14, %v2474_v40  ;;  %v2512_v62 = vsel %vm2511_vm9, %v3162_v26, %v2508_v12  ;;  %v2546_v29 = vsub.f32 1.0, %v2545_v16 }
 0x60e   :  { %v2517_v58 = vsel %vm2514_vm11, %v2516_v61, %v2512_v62  ;;  %v2562_v34 = vmul.f32 %v3168_v13, %v2479_v52 }
 0x60f   :  { %v2560_v32 = vmul.f32 %v2517_v58, %v4841_v45  ;;  %v2547_v11 = vmul.f32 %v3166_v37, %v2546_v29  ;;  %v2914_v45 = vld [vmem:[%s4903_s5] ss:$0 sm:$0xff] }
 0x611   :  { %v2564_v25 = vadd.f32 %v2562_v34, %v2560_v32  ;;  %v2548_v2 = vadd.f32 %v3166_v37, %v2547_v11 }
 0x613   :  { %3169 = vtanh.f32 %v2564_v25  ;;  %v2552_v57 = vsel %vm2551_vm14, %v3166_v37, %v2548_v2 }
 0x614   :  { %v2557_v3 = vsel %vm2554_vm15, %v2556_v56, %v2552_v57 }
 0x619   :  { %v3170_v46 = vpop.eup %3169 }
 0x61a   :  { %v2568_v60 = vmul.f32 %v3170_v46, %v2557_v3 }
 0x61c   :  { %2608 = vmatmul.f32.vlgmr.msrb.gmra.mxu1 %v2568_v60 }
 0x688   :  { %v2606_v0 = vpop.f32.mrf.mxu0 }
 0x689   :  { %v2607_v30 = vadd.f32 %v2914_v45, %v2606_v0 }
 0x68b   :  { %2612 = vst [vmem:[#allocation12] sm:$0xff] %v2607_v30 }
 0x699   :  { %v2609_v35 = vpop.f32.mrf.mxu1 }
 0x69a   :  { %v2610_v41 = vadd.f32 %v2914_v45, %v2609_v35 }
 0x69c   :  { %2613 = vst [vmem:[#allocation12 + $0x8] sm:$0xff] %v2610_v41 }
 0x69d   :  { %2626 = dma.vmem_to_hbm [thread:$0]  %s2619_s28, 256, %s2621_s7, [#allocation5], %s3462_s25, %s3462_s25, %s3463_s26  }
 0x69e   :  { %3449 = dma.done.wait [#allocation5], 256  }
 0x69f   :  { %3450 = vsyncadd [#allocation5], 4294967040 }
 0x6a0   :  { %2631 = vsyncpa [#allocation4], 1 }
 0x6a1   :  { %2632 = vsyncpa [#allocation7], 1 }
 0x6a2   :  { %2633 = vsyncpa [#allocation10], 1 }
 0x6a3   :  { %2634 = vsyncpa [#allocation5], 1 }

</bundles_post_ra>
